<compile_context>
chip_gen: v7x
topology: tpu7x:2x2x1
jax: 0.10.0
libtpu: 0.0.40
codegen_flags: <defaults>
</compile_context>

<pallas_src>
import functools
import math

import numpy as np
import jax
import jax.numpy as jnp
from jax.experimental import pallas as pl
from jax.experimental.pallas import tpu as pltpu


# ----------------------------------------------------------------------------
# One-time parameter folding (host-side NumPy; "reorder weights at init").
# ----------------------------------------------------------------------------
def _bilinear_matrix(out_size, in_size):
    """(out_size, in_size) interpolation matrix matching
    nn.Upsample(mode='bilinear', align_corners=False).  Rows sum to 1."""
    W = np.zeros((out_size, in_size), dtype=np.float32)
    scale = in_size / out_size
    for i in range(out_size):
        src = max((i + 0.5) * scale - 0.5, 0.0)
        i0 = min(int(math.floor(src)), in_size - 1)
        i1 = min(i0 + 1, in_size - 1)
        frac = src - i0
        W[i, i0] += 1.0 - frac
        W[i, i1] += frac
    return W


def _dense_conv3x3_s2_matrix(w, H, W, in_layout):
    """Fold Conv2d(k=3, s=2, p=1) into a dense (H*W*Cin, Ho*Wo*Cout) matrix.

    Input features are flattened in `in_layout` order ('chw' for the NCHW
    network input, 'hwc' for channels-last intermediates); output features are
    always channels-last (ho, wo, co) so every matmul output is lane-major.
    """
    Cout, Cin, KH, KW = w.shape
    Ho, Wo = H // 2, W // 2
    M = np.zeros((H * W * Cin, Ho * Wo * Cout), dtype=np.float32)
    for ho in range(Ho):
        for wo in range(Wo):
            col = (ho * Wo + wo) * Cout
            for kh in range(KH):
                h = 2 * ho + kh - 1
                if not 0 <= h < H:
                    continue
                for kw in range(KW):
                    x = 2 * wo + kw - 1
                    if not 0 <= x < W:
                        continue
                    for ci in range(Cin):
                        row = ((ci * H + h) * W + x if in_layout == "chw"
                               else (h * W + x) * Cin + ci)
                        M[row, col:col + Cout] = w[:, ci, kh, kw]
    return M


def prepare_params(params, *, latent_size, compute_dtype=jnp.bfloat16):
    """Fold the PyTorch-layout parameters into the fused-kernel operand set."""
    p = {k: np.asarray(v, np.float32) for k, v in params.items()}
    S = latent_size
    S2, S4, S8 = S // 2, S // 4, S // 8
    out_dim = p["out_w"].shape[0]
    hidden = p["fc_w"].shape[0]
    c3 = p["conv3_w"].shape[0]                               # 64

    # conv1/2/3: dense per-layer matrices + spatially tiled biases.
    m1 = _dense_conv3x3_s2_matrix(p["conv1_w"], S, S, "chw")   # (1024, 1024)
    m2 = _dense_conv3x3_s2_matrix(p["conv2_w"], S2, S2, "hwc")  # (1024,  512)
    m3 = _dense_conv3x3_s2_matrix(p["conv3_w"], S4, S4, "hwc")  # ( 512,  256)
    b1 = np.tile(p["conv1_b"], S2 * S2)
    b2 = np.tile(p["conv2_b"], S4 * S4)
    b3 = np.tile(p["conv3_b"], S8 * S8)

    # mask 1x1 conv + x8 bilinear upsample folded into one kron-style matrix:
    # (S8*S8*64, out_dim*S*S).  Interp rows sum to 1, so the conv bias passes
    # through unchanged to every upsampled pixel.
    Wh = _bilinear_matrix(S, S8)
    Ww = _bilinear_matrix(S, S8)
    wm = p["mask_w"].reshape(out_dim, c3)                     # (out, 64)
    mmu = np.einsum("oc,hp,wq->pqcohw", wm, Wh, Ww)
    mmu = mmu.reshape(S8 * S8 * c3, out_dim * S * S)          # (256, 2048)
    bmu = np.repeat(p["mask_b"], S * S)

    # fc: permute columns once so it consumes the (hs, ws, c) channels-last
    # flatten while reproducing PyTorch's NCHW nn.Flatten ordering exactly.
    mfc = p["fc_w"].reshape(hidden, c3, S8, S8).transpose(2, 3, 1, 0)
    mfc = mfc.reshape(S8 * S8 * c3, hidden)                   # (256, hidden)
    mout = p["out_w"].T                                       # (hidden, out)

    cd = compute_dtype
    f32 = jnp.float32
    return dict(
        m1=jnp.asarray(m1, cd), b1=jnp.asarray(b1[None, :], f32),
        m2=jnp.asarray(m2, cd), b2=jnp.asarray(b2[None, :], f32),
        m3=jnp.asarray(m3, cd), b3=jnp.asarray(b3[None, :], f32),
        mmu=jnp.asarray(mmu, cd), bmu=jnp.asarray(bmu[None, :], f32),
        mfc=jnp.asarray(mfc, cd), bfc=jnp.asarray(p["fc_b"][None, :], f32),
        mout=jnp.asarray(mout, cd), bout=jnp.asarray(p["out_b"][None, :], f32),
    )


# ----------------------------------------------------------------------------
# The fused Pallas kernel: whole forward, all operands VMEM-resident.
# ----------------------------------------------------------------------------
def _fused_forward_kernel(x_ref, m1_ref, b1_ref, m2_ref, b2_ref, m3_ref, b3_ref,
                          mmu_ref, bmu_ref, mfc_ref, bfc_ref, mout_ref, bout_ref,
                          cls_ref, mask_ref):
    cdt = m1_ref.dtype  # bf16 operand dtype for the MXU

    def dense(a, m_ref, b_ref, relu):
        # bf16 x bf16 MXU matmul with f32 accumulation; bias + ReLU in f32.
        acc = jnp.dot(a.astype(cdt), m_ref[...],
                      preferred_element_type=jnp.float32) + b_ref[...]
        return jnp.maximum(acc, 0.0) if relu else acc

    a1 = dense(x_ref[...], m1_ref, b1_ref, True)    # conv1+ReLU: (B, 1024)
    a2 = dense(a1, m2_ref, b2_ref, True)            # conv2+ReLU: (B,  512)
    a3 = dense(a2, m3_ref, b3_ref, True)            # conv3+ReLU: (B,  256)

    # mask head: 1x1 conv + x8 bilinear upsample as ONE lane-dense matmul.
    mask_ref[...] = dense(a3, mmu_ref, bmu_ref, False).astype(mask_ref.dtype)

    # classification head: fc(+ReLU) -> out; hidden never leaves the chip.
    h = dense(a3, mfc_ref, bfc_ref, True)           # (B, hidden)
    cls_ref[...] = dense(h, mout_ref, bout_ref, False).astype(cls_ref.dtype)


@functools.partial(jax.jit, static_argnames=("out_dim", "latent_size"))
def concept_classifier_segmenter_forward(x, prep, *, out_dim, latent_size):
    """x: (B, latent_channels, S, S) NCHW -> (logits_cls (B, out_dim),
                                              logits_mask (B, out_dim, S, S))."""
    B = x.shape[0]
    S = latent_size
    # conv1's folded matrix is built for the raw NCHW flatten -> free reshape.
    x_flat = x.reshape(B, -1)

    cls, mask_flat = pl.pallas_call(
        _fused_forward_kernel,
        out_shape=(
            jax.ShapeDtypeStruct((B, out_dim), jnp.float32),
            jax.ShapeDtypeStruct((B, out_dim * S * S), jnp.float32),
        ),
        # No grid / no BlockSpecs: default whole-array blocks, all in VMEM,
        # single launch, single-buffered (~<10 MB total, fits every TPU gen).
        compiler_params=pltpu.CompilerParams(vmem_limit_bytes=32 * 1024 * 1024),
    )(x_flat,
      prep["m1"], prep["b1"], prep["m2"], prep["b2"], prep["m3"], prep["b3"],
      prep["mmu"], prep["bmu"], prep["mfc"], prep["bfc"],
      prep["mout"], prep["bout"])

    # Free row-major reshape of the lane-dense (B, out*S*S) slab to NCHW.
    return cls, mask_flat.reshape(B, out_dim, S, S)


# ----------------------------------------------------------------------------
# Parameter init (PyTorch-style ranges) and a plain-JAX f32 reference.
# ----------------------------------------------------------------------------
def init_params(key, latent_channels=4, latent_size=16, out_dim=8, hidden_dim=32):
    ks = jax.random.split(key, 12)
    fc_in = 64 * (latent_size // 8) * (latent_size // 8)

    def w(k, shape, fan_in):
        bound = 1.0 / math.sqrt(fan_in)
        return jax.random.uniform(k, shape, jnp.float32, -bound, bound)

    return dict(
        conv1_w=w(ks[0], (16, latent_channels, 3, 3), latent_channels * 9),
        conv1_b=w(ks[1], (16,), latent_channels * 9),
        conv2_w=w(ks[2], (32, 16, 3, 3), 16 * 9),
        conv2_b=w(ks[3], (32,), 16 * 9),
        conv3_w=w(ks[4], (64, 32, 3, 3), 32 * 9),
        conv3_b=w(ks[5], (64,), 32 * 9),
        fc_w=w(ks[6], (hidden_dim, fc_in), fc_in),
        fc_b=w(ks[7], (hidden_dim,), fc_in),
        out_w=w(ks[8], (out_dim, hidden_dim), hidden_dim),
        out_b=w(ks[9], (out_dim,), hidden_dim),
        mask_w=w(ks[10], (out_dim, 64, 1, 1), 64),
        mask_b=w(ks[11], (out_dim,), 64),
    )


def _reference_forward(x, params, *, latent_size):
    """Plain-JAX f32 reference of the PyTorch module (for a numeric check)."""
    hp = jax.lax.Precision.HIGHEST

    def conv(z, w, b, stride, pad):
        y = jax.lax.conv_general_dilated(
            z, w, window_strides=(stride, stride),
            padding=((pad, pad), (pad, pad)),
            dimension_numbers=("NCHW", "OIHW", "NCHW"), precision=hp)
        return y + b.reshape(1, -1, 1, 1)

    h = jax.nn.relu(conv(x, params["conv1_w"], params["conv1_b"], 2, 1))
    h = jax.nn.relu(conv(h, params["conv2_w"], params["conv2_b"], 2, 1))
    h = jax.nn.relu(conv(h, params["conv3_w"], params["conv3_b"], 2, 1))
    mask8 = conv(h, params["mask_w"], params["mask_b"], 1, 0)
    S = latent_size
    Wi = jnp.asarray(_bilinear_matrix(S, S // 8))
    logits_mask = jnp.einsum("hp,wq,bopq->bohw", Wi, Wi, mask8, precision=hp)
    x_flat = h.reshape(h.shape[0], -1)
    x_fc = jax.nn.relu(x_flat @ params["fc_w"].T + params["fc_b"])
    logits_cls = x_fc @ params["out_w"].T + params["out_b"]
    return logits_cls, logits_mask


if __name__ == "__main__":
    B, C, S = 2, 4, 16
    out_dim, hidden_dim = 8, 32

    x = jax.random.normal(jax.random.PRNGKey(0), (B, C, S, S), dtype=jnp.float32)
    params = init_params(jax.random.PRNGKey(42), latent_channels=C,
                         latent_size=S, out_dim=out_dim, hidden_dim=hidden_dim)
    prep = prepare_params(params, latent_size=S)

    logits_cls, logits_mask = concept_classifier_segmenter_forward(
        x, prep, out_dim=out_dim, latent_size=S)
    jax.block_until_ready((logits_cls, logits_mask))

    assert logits_cls.shape == (B, out_dim)
    assert logits_mask.shape == (B, out_dim, S, S)

    # Numeric check vs. the f32 reference (tolerance covers bf16 operands).
    ref_cls, ref_mask = _reference_forward(x, params, latent_size=S)
    np.testing.assert_allclose(np.asarray(logits_cls), np.asarray(ref_cls),
                               rtol=0.1, atol=0.05)
    np.testing.assert_allclose(np.asarray(logits_mask), np.asarray(ref_mask),
                               rtol=0.1, atol=0.05)

    print("KERNEL_OK")
</pallas_src>

<mosaic_0001>
module attributes {stable_mosaic.version = 11 : i64} {
  func.func @_fused_forward_kernel(%arg0: memref<2x1024xf32, #tpu.memory_space<vmem>>, %arg1: memref<1024x1024xbf16, #tpu.memory_space<vmem>>, %arg2: memref<1x1024xf32, #tpu.memory_space<vmem>>, %arg3: memref<1024x512xbf16, #tpu.memory_space<vmem>>, %arg4: memref<1x512xf32, #tpu.memory_space<vmem>>, %arg5: memref<512x256xbf16, #tpu.memory_space<vmem>>, %arg6: memref<1x256xf32, #tpu.memory_space<vmem>>, %arg7: memref<256x2048xbf16, #tpu.memory_space<vmem>>, %arg8: memref<1x2048xf32, #tpu.memory_space<vmem>>, %arg9: memref<256x32xbf16, #tpu.memory_space<vmem>>, %arg10: memref<1x32xf32, #tpu.memory_space<vmem>>, %arg11: memref<32x8xbf16, #tpu.memory_space<vmem>>, %arg12: memref<1x8xf32, #tpu.memory_space<vmem>>, %arg13: memref<2x8xf32, #tpu.memory_space<vmem>>, %arg14: memref<2x2048xf32, #tpu.memory_space<vmem>>) attributes {dimension_semantics = [], scalar_prefetch = 0 : i64, scratch_operands = 0 : i64, tpu.core_type = #tpu.core_type<tc>} {
    %c0 = arith.constant 0 : index
    %c0_0 = arith.constant 0 : index
    %0 = vector.load %arg0[%c0, %c0_0] : memref<2x1024xf32, #tpu.memory_space<vmem>>, vector<2x1024xf32>
    %1 = arith.truncf %0 : vector<2x1024xf32> to vector<2x1024xbf16>
    %c0_1 = arith.constant 0 : index
    %c0_2 = arith.constant 0 : index
    %2 = vector.load %arg1[%c0_1, %c0_2] : memref<1024x1024xbf16, #tpu.memory_space<vmem>>, vector<1024x1024xbf16>
    %cst = arith.constant dense<0.000000e+00> : vector<2x1024xf32>
    %3 = tpu.matmul %1, %2, %cst {dimension_numbers = #tpu.dot_dimension_numbers<[1], [0], [0], [1], [0, 0, 1, 1], [], []>} : vector<2x1024xbf16>, vector<1024x1024xbf16>, vector<2x1024xf32> -> vector<2x1024xf32>
    %c0_3 = arith.constant 0 : index
    %c0_4 = arith.constant 0 : index
    %4 = vector.load %arg2[%c0_3, %c0_4] : memref<1x1024xf32, #tpu.memory_space<vmem>>, vector<1x1024xf32>
    %5 = vector.broadcast %4 : vector<1x1024xf32> to vector<2x1024xf32>
    %6 = arith.addf %3, %5 : vector<2x1024xf32>
    %cst_5 = arith.constant 0.000000e+00 : f32
    %7 = vector.broadcast %cst_5 : f32 to vector<2x1024xf32>
    %8 = arith.maximumf %6, %7 : vector<2x1024xf32>
    %9 = arith.truncf %8 : vector<2x1024xf32> to vector<2x1024xbf16>
    %c0_6 = arith.constant 0 : index
    %c0_7 = arith.constant 0 : index
    %10 = vector.load %arg3[%c0_6, %c0_7] : memref<1024x512xbf16, #tpu.memory_space<vmem>>, vector<1024x512xbf16>
    %cst_8 = arith.constant dense<0.000000e+00> : vector<2x512xf32>
    %11 = tpu.matmul %9, %10, %cst_8 {dimension_numbers = #tpu.dot_dimension_numbers<[1], [0], [0], [1], [0, 0, 1, 1], [], []>} : vector<2x1024xbf16>, vector<1024x512xbf16>, vector<2x512xf32> -> vector<2x512xf32>
    %c0_9 = arith.constant 0 : index
    %c0_10 = arith.constant 0 : index
    %12 = vector.load %arg4[%c0_9, %c0_10] : memref<1x512xf32, #tpu.memory_space<vmem>>, vector<1x512xf32>
    %13 = vector.broadcast %12 : vector<1x512xf32> to vector<2x512xf32>
    %14 = arith.addf %11, %13 : vector<2x512xf32>
    %cst_11 = arith.constant 0.000000e+00 : f32
    %15 = vector.broadcast %cst_11 : f32 to vector<2x512xf32>
    %16 = arith.maximumf %14, %15 : vector<2x512xf32>
    %17 = arith.truncf %16 : vector<2x512xf32> to vector<2x512xbf16>
    %c0_12 = arith.constant 0 : index
    %c0_13 = arith.constant 0 : index
    %18 = vector.load %arg5[%c0_12, %c0_13] : memref<512x256xbf16, #tpu.memory_space<vmem>>, vector<512x256xbf16>
    %cst_14 = arith.constant dense<0.000000e+00> : vector<2x256xf32>
    %19 = tpu.matmul %17, %18, %cst_14 {dimension_numbers = #tpu.dot_dimension_numbers<[1], [0], [0], [1], [0, 0, 1, 1], [], []>} : vector<2x512xbf16>, vector<512x256xbf16>, vector<2x256xf32> -> vector<2x256xf32>
    %c0_15 = arith.constant 0 : index
    %c0_16 = arith.constant 0 : index
    %20 = vector.load %arg6[%c0_15, %c0_16] : memref<1x256xf32, #tpu.memory_space<vmem>>, vector<1x256xf32>
    %21 = vector.broadcast %20 : vector<1x256xf32> to vector<2x256xf32>
    %22 = arith.addf %19, %21 : vector<2x256xf32>
    %cst_17 = arith.constant 0.000000e+00 : f32
    %23 = vector.broadcast %cst_17 : f32 to vector<2x256xf32>
    %24 = arith.maximumf %22, %23 : vector<2x256xf32>
    %25 = arith.truncf %24 : vector<2x256xf32> to vector<2x256xbf16>
    %c0_18 = arith.constant 0 : index
    %c0_19 = arith.constant 0 : index
    %26 = vector.load %arg7[%c0_18, %c0_19] : memref<256x2048xbf16, #tpu.memory_space<vmem>>, vector<256x2048xbf16>
    %cst_20 = arith.constant dense<0.000000e+00> : vector<2x2048xf32>
    %27 = tpu.matmul %25, %26, %cst_20 {dimension_numbers = #tpu.dot_dimension_numbers<[1], [0], [0], [1], [0, 0, 1, 1], [], []>} : vector<2x256xbf16>, vector<256x2048xbf16>, vector<2x2048xf32> -> vector<2x2048xf32>
    %c0_21 = arith.constant 0 : index
    %c0_22 = arith.constant 0 : index
    %28 = vector.load %arg8[%c0_21, %c0_22] : memref<1x2048xf32, #tpu.memory_space<vmem>>, vector<1x2048xf32>
    %29 = vector.broadcast %28 : vector<1x2048xf32> to vector<2x2048xf32>
    %30 = arith.addf %27, %29 : vector<2x2048xf32>
    %c0_23 = arith.constant 0 : index
    %c0_24 = arith.constant 0 : index
    %31 = vector.load %arg14[%c0_23, %c0_24] : memref<2x2048xf32, #tpu.memory_space<vmem>>, vector<2x2048xf32>
    tpu.vector_store %arg14[%c0_23, %c0_24], %30 {strides = array<i32>} : memref<2x2048xf32, #tpu.memory_space<vmem>>, vector<2x2048xf32>,
    %32 = arith.truncf %24 : vector<2x256xf32> to vector<2x256xbf16>
    %c0_25 = arith.constant 0 : index
    %c0_26 = arith.constant 0 : index
    %33 = vector.load %arg9[%c0_25, %c0_26] : memref<256x32xbf16, #tpu.memory_space<vmem>>, vector<256x32xbf16>
    %cst_27 = arith.constant dense<0.000000e+00> : vector<2x32xf32>
    %34 = tpu.matmul %32, %33, %cst_27 {dimension_numbers = #tpu.dot_dimension_numbers<[1], [0], [0], [1], [0, 0, 1, 1], [], []>} : vector<2x256xbf16>, vector<256x32xbf16>, vector<2x32xf32> -> vector<2x32xf32>
    %c0_28 = arith.constant 0 : index
    %c0_29 = arith.constant 0 : index
    %35 = vector.load %arg10[%c0_28, %c0_29] : memref<1x32xf32, #tpu.memory_space<vmem>>, vector<1x32xf32>
    %36 = vector.broadcast %35 : vector<1x32xf32> to vector<2x32xf32>
    %37 = arith.addf %34, %36 : vector<2x32xf32>
    %cst_30 = arith.constant 0.000000e+00 : f32
    %38 = vector.broadcast %cst_30 : f32 to vector<2x32xf32>
    %39 = arith.maximumf %37, %38 : vector<2x32xf32>
    %40 = arith.truncf %39 : vector<2x32xf32> to vector<2x32xbf16>
    %c0_31 = arith.constant 0 : index
    %c0_32 = arith.constant 0 : index
    %41 = vector.load %arg11[%c0_31, %c0_32] : memref<32x8xbf16, #tpu.memory_space<vmem>>, vector<32x8xbf16>
    %cst_33 = arith.constant dense<0.000000e+00> : vector<2x8xf32>
    %42 = tpu.matmul %40, %41, %cst_33 {dimension_numbers = #tpu.dot_dimension_numbers<[1], [0], [0], [1], [0, 0, 1, 1], [], []>} : vector<2x32xbf16>, vector<32x8xbf16>, vector<2x8xf32> -> vector<2x8xf32>
    %c0_34 = arith.constant 0 : index
    %c0_35 = arith.constant 0 : index
    %43 = vector.load %arg12[%c0_34, %c0_35] : memref<1x8xf32, #tpu.memory_space<vmem>>, vector<1x8xf32>
    %44 = vector.broadcast %43 : vector<1x8xf32> to vector<2x8xf32>
    %45 = arith.addf %42, %44 : vector<2x8xf32>
    %c0_36 = arith.constant 0 : index
    %c0_37 = arith.constant 0 : index
    %46 = vector.load %arg13[%c0_36, %c0_37] : memref<2x8xf32, #tpu.memory_space<vmem>>, vector<2x8xf32>
    tpu.vector_store %arg13[%c0_36, %c0_37], %45 {strides = array<i32>} : memref<2x8xf32, #tpu.memory_space<vmem>>, vector<2x8xf32>,
    return
  }
}

</mosaic_0001>

<bundles_post_ra>
// kernel: concept_classifier_segmenter_forward.1
= control target key start
LH: loop header
LB: loop body
LE: loop exit
PB: predicated region body
PF: predicated region fallthrough
CT: control target
= control target key end

     0   :  { %20 = vsyncpa [#allocation3], 0  ;;  %s11256_s0 = inlined_call_operand.vmem [shape: f32[2,1024], index: 0, kind: input, shape index: {}]   ;;  %s11257_s1 = inlined_call_operand.hbm [shape: bf16[1024,1024], index: 1, kind: input, shape index: {}]   ;;  %s11258_s2 = inlined_call_operand.hbm [shape: f32[1,1024], index: 2, kind: input, shape index: {}]   ;;  %s11259_s3 = inlined_call_operand.hbm [shape: bf16[1024,512], index: 3, kind: input, shape index: {}]   ;;  %s11260_s4 = inlined_call_operand.hbm [shape: f32[1,512], index: 4, kind: input, shape index: {}]   ;;  %s11261_s5 = inlined_call_operand.hbm [shape: bf16[512,256], index: 5, kind: input, shape index: {}]   ;;  %s11262_s6 = inlined_call_operand.hbm [shape: f32[1,256], index: 6, kind: input, shape index: {}]   ;;  %s11263_s7 = inlined_call_operand.hbm [shape: bf16[256,2048], index: 7, kind: input, shape index: {}]   ;;  %s11264_s8 = inlined_call_operand.hbm [shape: f32[1,2048], index: 8, kind: input, shape index: {}]   ;;  %s11265_s9 = inlined_call_operand.vmem [shape: bf16[256,32], index: 9, kind: input, shape index: {}]   ;;  %s11266_s10 = inlined_call_operand.hbm [shape: f32[1,32], index: 10, kind: input, shape index: {}]   ;;  %s11267_s11 = inlined_call_operand.vmem [shape: bf16[32,8], index: 11, kind: input, shape index: {}]   ;;  %s11268_s12 = inlined_call_operand.hbm [shape: f32[1,8], index: 12, kind: input, shape index: {}]   ;;  %s11269_s13 = inlined_call_operand.hbm [shape: f32[2,8], index: 13, kind: output, shape index: {0}]   ;;  %s11270_s14 = inlined_call_operand.vmem [shape: f32[2,2048], index: 14, kind: output, shape index: {1}]  }
   0x1   :  { %21 = vsyncpa [#allocation6], 0 }
   0x2   :  { %22 = vsyncpa [#allocation9], 0 }
   0x3   :  { %23 = vsyncpa [#allocation12], 0 }
   0x4   :  { %24 = vsyncpa [#allocation15], 0 }
   0x5   :  { %25 = vsyncpa [#allocation18], 0 }
   0x6   :  { %26 = vsyncpa [#allocation4], 0  ;;  %s10709_s29 = smov [#allocation5]   ;;  %s10710_s15 = smov [#allocation8]  }
   0x7   :  { %s47_s30 = sshll.u32 %s10709_s29, 4  ;;  %s69_s16 = sshll.u32 %s10710_s15, 4  ;;  %s48_s30 = int_to_ptr.vmem [resolvable:$true] %s47_s30  ;;  %s70_s16 = int_to_ptr.vmem [resolvable:$true] %s69_s16 }
   0x8   :  { %s10453_s19 = scalar_lea.hbm %s11258_s2, 128 }
   0x9   :  { %p10454_p0 = scmp.ne.s32.totalorder %s11258_s2, %s10453_s19  ;;  %p10457_p1 = scmp.lt.u32.totalorder %s10453_s19, %s11258_s2 }
   0xb   :  { %p10459_p2 = pnand %p10457_p1, %p10454_p0 }
   0xd   :  { %10462 = shalt.err (!%p10459_p2)
}
   0xe   :  { %s10463_s24 = scalar_lea.vmem %s48_s30, 128  ;;  %p10468_p4 = scmp.lt.s32.totalorder %s48_s30, %s48_s30 }
   0xf   :  { %p10464_p3 = scmp.ne.s32.totalorder %s48_s30, %s10463_s24  ;;  %p10469_p5 = scmp.lt.s32.totalorder %s10463_s24, %s10463_s24 }
  0x11   :  { %p10470_p6 = por %p10469_p5, %p10468_p4 }
  0x13   :  { %p10471_p7 = pnand %p10470_p6, %p10464_p3 }
  0x15   :  { %10474 = shalt.err (!%p10471_p7)
}
  0x16   :  { %50 = dma.hbm_to_vmem [thread:$0]  %s11258_s2, 128, %s48_s30, [#allocation6]  }
  0x17   :  { %s10475_s29 = scalar_lea.hbm %s11260_s4, 64 }
  0x18   :  { %p10476_p8 = scmp.ne.s32.totalorder %s11260_s4, %s10475_s29  ;;  %p10479_p9 = scmp.lt.u32.totalorder %s10475_s29, %s11260_s4 }
  0x1a   :  { %p10481_p10 = pnand %p10479_p9, %p10476_p8 }
  0x1c   :  { %10484 = shalt.err (!%p10481_p10)
}
  0x1d   :  { %s10485_s20 = scalar_lea.vmem %s70_s16, 64  ;;  %p10490_p12 = scmp.lt.s32.totalorder %s70_s16, %s70_s16 }
  0x1e   :  { %p10486_p11 = scmp.ne.s32.totalorder %s70_s16, %s10485_s20  ;;  %p10491_p13 = scmp.lt.s32.totalorder %s10485_s20, %s10485_s20 }
  0x20   :  { %p10492_p0 = por %p10491_p13, %p10490_p12 }
  0x22   :  { %p10493_p1 = pnand %p10492_p0, %p10486_p11 }
  0x24   :  { %10496 = shalt.err (!%p10493_p1)
}
  0x25   :  { %72 = dma.hbm_to_vmem [thread:$0]  %s11260_s4, 64, %s70_s16, [#allocation9]  }
  0x26   :  { %s10711_s21 = smov [#allocation11]   ;;  %s10712_s23 = smov [#allocation14]  }
  0x27   :  { %s91_s22 = sshll.u32 %s10711_s21, 4  ;;  %s113_s24 = sshll.u32 %s10712_s23, 4  ;;  %s92_s22 = int_to_ptr.vmem [resolvable:$true] %s91_s22  ;;  %s114_s24 = int_to_ptr.vmem [resolvable:$true] %s113_s24 }
  0x28   :  { %s10497_s27 = scalar_lea.hbm %s11262_s6, 32 }
  0x29   :  { %p10498_p2 = scmp.ne.s32.totalorder %s11262_s6, %s10497_s27  ;;  %p10501_p3 = scmp.lt.u32.totalorder %s10497_s27, %s11262_s6 }
  0x2b   :  { %p10503_p4 = pnand %p10501_p3, %p10498_p2 }
  0x2d   :  { %10506 = shalt.err (!%p10503_p4)
}
  0x2e   :  { %s10507_s4 = scalar_lea.vmem %s92_s22, 32  ;;  %p10512_p6 = scmp.lt.s32.totalorder %s92_s22, %s92_s22 }
  0x2f   :  { %p10508_p5 = scmp.ne.s32.totalorder %s92_s22, %s10507_s4  ;;  %p10513_p7 = scmp.lt.s32.totalorder %s10507_s4, %s10507_s4 }
  0x31   :  { %p10514_p8 = por %p10513_p7, %p10512_p6 }
  0x33   :  { %p10515_p9 = pnand %p10514_p8, %p10508_p5 }
  0x35   :  { %10518 = shalt.err (!%p10515_p9)
}
  0x36   :  { %94 = dma.hbm_to_vmem [thread:$0]  %s11262_s6, 32, %s92_s22, [#allocation12]  }
  0x37   :  { %s10519_s2 = scalar_lea.hbm %s11264_s8, 256 }
  0x38   :  { %p10520_p10 = scmp.ne.s32.totalorder %s11264_s8, %s10519_s2  ;;  %p10523_p11 = scmp.lt.u32.totalorder %s10519_s2, %s11264_s8 }
  0x3a   :  { %p10525_p12 = pnand %p10523_p11, %p10520_p10 }
  0x3c   :  { %10528 = shalt.err (!%p10525_p12)
}
  0x3d   :  { %s10529_s26 = scalar_lea.vmem %s114_s24, 256  ;;  %p10534_p0 = scmp.lt.s32.totalorder %s114_s24, %s114_s24 }
  0x3e   :  { %p10530_p13 = scmp.ne.s32.totalorder %s114_s24, %s10529_s26  ;;  %p10535_p1 = scmp.lt.s32.totalorder %s10529_s26, %s10529_s26 }
  0x40   :  { %p10536_p2 = por %p10535_p1, %p10534_p0 }
  0x42   :  { %p10537_p3 = pnand %p10536_p2, %p10530_p13 }
  0x44   :  { %10540 = shalt.err (!%p10537_p3)
}
  0x45   :  { %116 = dma.hbm_to_vmem [thread:$0]  %s11264_s8, 256, %s114_s24, [#allocation15]  }
  0x46   :  { %s10713_s27 = smov [#allocation2]   ;;  %s10541_s17 = scalar_lea.hbm %s11257_s1, 65536 }
  0x47   :  { %s34_s28 = sshll.u32 %s10713_s27, 4  ;;  %p10542_p4 = scmp.ne.s32.totalorder %s11257_s1, %s10541_s17  ;;  %s35_s28 = int_to_ptr.vmem [resolvable:$true] %s34_s28 }
  0x48   :  { %p10545_p5 = scmp.lt.u32.totalorder %s10541_s17, %s11257_s1 }
  0x4a   :  { %p10547_p6 = pnand %p10545_p5, %p10542_p4 }
  0x4c   :  { %10550 = shalt.err (!%p10547_p6)
}
  0x4d   :  { %s10551_s20 = scalar_lea.vmem %s35_s28, 65536  ;;  %p10556_p8 = scmp.lt.s32.totalorder %s35_s28, %s35_s28 }
  0x4e   :  { %p10552_p7 = scmp.ne.s32.totalorder %s35_s28, %s10551_s20  ;;  %p10557_p9 = scmp.lt.s32.totalorder %s10551_s20, %s10551_s20 }
  0x50   :  { %p10558_p10 = por %p10557_p9, %p10556_p8 }
  0x52   :  { %p10559_p11 = pnand %p10558_p10, %p10552_p7 }
  0x54   :  { %10562 = shalt.err (!%p10559_p11)
}
  0x55   :  { %s10714_s8 = smov 512   ;;  %s10715_s24 = smov 32  }
  0x56   :  { %40 = dma.hbm_to_vmem [thread:$0]  %s11257_s1, 65536, %s35_s28, [#allocation3], %s10714_s8, %s10714_s8, %s10715_s24  }
  0x57   :  { %s10716_s21 = smov [#allocation7]   ;;  %s10563_s6 = scalar_lea.hbm %s11259_s3, 32768 }
  0x58   :  { %s56_s23 = sshll.u32 %s10716_s21, 4  ;;  %p10564_p12 = scmp.ne.s32.totalorder %s11259_s3, %s10563_s6  ;;  %s57_s23 = int_to_ptr.vmem [resolvable:$true] %s56_s23 }
  0x59   :  { %p10567_p13 = scmp.lt.u32.totalorder %s10563_s6, %s11259_s3 }
  0x5b   :  { %p10569_p0 = pnand %p10567_p13, %p10564_p12 }
  0x5d   :  { %10572 = shalt.err (!%p10569_p0)
}
  0x5e   :  { %s10573_s17 = scalar_lea.vmem %s57_s23, 32768  ;;  %p10578_p2 = scmp.lt.s32.totalorder %s57_s23, %s57_s23 }
  0x5f   :  { %p10574_p1 = scmp.ne.s32.totalorder %s57_s23, %s10573_s17  ;;  %p10579_p3 = scmp.lt.s32.totalorder %s10573_s17, %s10573_s17 }
  0x61   :  { %p10580_p4 = por %p10579_p3, %p10578_p2 }
  0x63   :  { %p10581_p5 = pnand %p10580_p4, %p10574_p1 }
  0x65   :  { %10584 = shalt.err (!%p10581_p5)
}
  0x66   :  { %s10717_s1 = smov 256   ;;  %s10718_s28 = smov 16  }
  0x67   :  { %62 = dma.hbm_to_vmem [thread:$0]  %s11259_s3, 32768, %s57_s23, [#allocation6], %s10717_s1, %s10717_s1, %s10718_s28  }
  0x68   :  { %s10719_s18 = smov [#allocation10]   ;;  %s10585_s24 = scalar_lea.hbm %s11261_s5, 8192 }
  0x69   :  { %s78_s19 = sshll.u32 %s10719_s18, 4  ;;  %p10586_p6 = scmp.ne.s32.totalorder %s11261_s5, %s10585_s24  ;;  %s79_s19 = int_to_ptr.vmem [resolvable:$true] %s78_s19 }
  0x6a   :  { %p10589_p7 = scmp.lt.u32.totalorder %s10585_s24, %s11261_s5 }
  0x6c   :  { %p10591_p8 = pnand %p10589_p7, %p10586_p6 }
  0x6e   :  { %10594 = shalt.err (!%p10591_p8)
}
  0x6f   :  { %s10595_s26 = scalar_lea.vmem %s79_s19, 8192  ;;  %p10600_p10 = scmp.lt.s32.totalorder %s79_s19, %s79_s19 }
  0x70   :  { %p10596_p9 = scmp.ne.s32.totalorder %s79_s19, %s10595_s26  ;;  %p10601_p11 = scmp.lt.s32.totalorder %s10595_s26, %s10595_s26 }
  0x72   :  { %p10602_p12 = por %p10601_p11, %p10600_p10 }
  0x74   :  { %p10603_p13 = pnand %p10602_p12, %p10596_p9 }
  0x76   :  { %10606 = shalt.err (!%p10603_p13)
}
  0x77   :  { %s10720_s3 = smov 128   ;;  %s10721_s23 = smov 8  }
  0x78   :  { %84 = dma.hbm_to_vmem [thread:$0]  %s11261_s5, 8192, %s79_s19, [#allocation9], %s10720_s3, %s10720_s3, %s10721_s23  }
  0x79   :  { %s10722_s27 = smov [#allocation13]   ;;  %s10607_s1 = scalar_lea.hbm %s11263_s7, 32768 }
  0x7a   :  { %s100_s29 = sshll.u32 %s10722_s27, 4  ;;  %p10608_p0 = scmp.ne.s32.totalorder %s11263_s7, %s10607_s1  ;;  %s101_s29 = int_to_ptr.vmem [resolvable:$true] %s100_s29 }
  0x7b   :  { %p10611_p1 = scmp.lt.u32.totalorder %s10607_s1, %s11263_s7 }
  0x7d   :  { %p10613_p2 = pnand %p10611_p1, %p10608_p0 }
  0x7f   :  { %10616 = shalt.err (!%p10613_p2)
}
  0x80   :  { %s10617_s20 = scalar_lea.vmem %s101_s29, 32768  ;;  %p10622_p4 = scmp.lt.s32.totalorder %s101_s29, %s101_s29 }
  0x81   :  { %p10618_p3 = scmp.ne.s32.totalorder %s101_s29, %s10617_s20  ;;  %p10623_p5 = scmp.lt.s32.totalorder %s10617_s20, %s10617_s20 }
  0x83   :  { %p10624_p6 = por %p10623_p5, %p10622_p4 }
  0x85   :  { %p10625_p7 = pnand %p10624_p6, %p10618_p3 }
  0x87   :  { %10628 = shalt.err (!%p10625_p7)
}
  0x88   :  { %s10723_s5 = smov 1024   ;;  %s10724_s19 = smov 64  }
  0x89   :  { %106 = dma.hbm_to_vmem [thread:$0]  %s11263_s7, 32768, %s101_s29, [#allocation12], %s10723_s5, %s10723_s5, %s10724_s19  }
  0x8a   :  { %s10725_s2 = smov [#allocation16]   ;;  %s10726_s21 = smov [#allocation17]  }
  0x8b   :  { %s125_s30 = sshll.u32 %s10725_s2, 4  ;;  %s137_s25 = sshll.u32 %s10726_s21, 4  ;;  %s126_s30 = int_to_ptr.vmem [resolvable:$true] %s125_s30  ;;  %s138_s25 = int_to_ptr.vmem [resolvable:$true] %s137_s25 }
  0x8c   :  { %s10629_s23 = scalar_lea.hbm %s11266_s10, 16 }
  0x8d   :  { %p10630_p8 = scmp.ne.s32.totalorder %s11266_s10, %s10629_s23  ;;  %p10633_p9 = scmp.lt.u32.totalorder %s10629_s23, %s11266_s10 }
  0x8f   :  { %p10635_p10 = pnand %p10633_p9, %p10630_p8 }
  0x91   :  { %10638 = shalt.err (!%p10635_p10)
}
  0x92   :  { %s10639_s7 = scalar_lea.vmem %s126_s30, 16  ;;  %s10643_s29 = scalar_lea.vmem %s126_s30, 32 }
  0x93   :  { %p10640_p11 = scmp.ne.s32.totalorder %s126_s30, %s10639_s7  ;;  %p10644_p12 = scmp.lt.s32.totalorder %s126_s30, %s126_s30 }
  0x94   :  { %p10645_p13 = scmp.lt.s32.totalorder %s10643_s29, %s10639_s7 }
  0x96   :  { %p10646_p0 = por %p10645_p13, %p10644_p12 }
  0x98   :  { %p10647_p1 = pnand %p10646_p0, %p10640_p11 }
  0x9a   :  { %10650 = shalt.err (!%p10647_p1)
}
  0x9b   :  { %128 = dma.hbm_to_vmem [thread:$0]  %s11266_s10, 16, %s126_s30, [#allocation15]  }
  0x9c   :  { %s10651_s16 = scalar_lea.hbm %s11268_s12, 16 }
  0x9d   :  { %p10652_p2 = scmp.ne.s32.totalorder %s11268_s12, %s10651_s16  ;;  %p10655_p3 = scmp.lt.u32.totalorder %s10651_s16, %s11268_s12 }
  0x9f   :  { %p10657_p4 = pnand %p10655_p3, %p10652_p2 }
  0xa1   :  { %10660 = shalt.err (!%p10657_p4)
}
  0xa2   :  { %s10661_s8 = scalar_lea.vmem %s138_s25, 16  ;;  %s10665_s24 = scalar_lea.vmem %s138_s25, 32 }
  0xa3   :  { %p10662_p5 = scmp.ne.s32.totalorder %s138_s25, %s10661_s8  ;;  %p10666_p6 = scmp.lt.s32.totalorder %s138_s25, %s138_s25 }
  0xa4   :  { %p10667_p7 = scmp.lt.s32.totalorder %s10665_s24, %s10661_s8 }
  0xa6   :  { %p10668_p8 = por %p10667_p7, %p10666_p6 }
  0xa8   :  { %p10669_p9 = pnand %p10668_p8, %p10662_p5 }
  0xaa   :  { %10672 = shalt.err (!%p10669_p9)
}
  0xab   :  { %140 = dma.hbm_to_vmem [thread:$0]  %s11268_s12, 16, %s138_s25, [#allocation18]  }
  0xac   :  { %10695 = dma.done.wait [#allocation3], 65536  }
  0xad   :  { %10696 = vsyncadd [#allocation3], 4294901760 }
  0xae   :  { %10697 = dma.done.wait [#allocation6], 32896  }
  0xaf   :  { %10698 = vsyncadd [#allocation6], 4294934400 }
  0xb0   :  { %10699 = dma.done.wait [#allocation9], 8256  }
  0xb1   :  { %10700 = vsyncadd [#allocation9], 4294959040 }
  0xb2   :  { %10701 = dma.done.wait [#allocation12], 32800  }
  0xb3   :  { %10702 = vsyncadd [#allocation12], 4294934496 }
  0xb4   :  { %10703 = dma.done.wait [#allocation15], 272  }
  0xb5   :  { %10704 = vsyncadd [#allocation15], 4294967024 }
  0xb6   :  { %10705 = dma.done.wait [#allocation18], 16  }
  0xb7   :  { %10706 = vsyncadd [#allocation18], 4294967280  ;;  %v226_v0 = vld [vmem:[#allocation2] sm:$0xff]  ;;  %v227_v2 = vld [vmem:[#allocation2 + $0x8] sm:$0xff]  ;;  %v10727_v32 = vmov 1983009808   ;;  %v180_v34 = vlaneseq }
  0xb8   :  { %v230_v1 = vld [vmem:[#allocation2 + $0x20] sm:$0xff]  ;;  %v231_v4 = vld [vmem:[#allocation2 + $0x28] sm:$0xff]  ;;  %v178_v33 = vunpack.c.l.s4 %v10727_v32  ;;  %vm10729_vm0 = vmmov 0   ;;  %vm8628_vm1 = vcmask 261120   ;;  %s10730_s18 = smov [#allocation19]   ;;  %vm8672_vm2 = vcmask 58368  }
  0xb9   :  { %v8699_v3 = vcombine.high %v226_v0, %v230_v1  ;;  %v8698_v5 = vcombine.low %v226_v0, %v230_v1  ;;  %v234_v6 = vld [vmem:[#allocation2 + $0x40] sm:$0xff]  ;;  %v8701_v8 = vcombine.high %v227_v2, %v231_v4  ;;  %v8700_v9 = vcombine.low %v227_v2, %v231_v4  ;;  %v235_v11 = vld [vmem:[#allocation2 + $0x48] sm:$0xff]  ;;  %s8680_s20 = sshll.u32 %s10730_s18, 4  ;;  %s8681_s20 = int_to_ptr.vmem [resolvable:$true] %s8680_s20 }
  0xba   :  { %v238_v7 = vld [vmem:[#allocation2 + $0x60] sm:$0xff]  ;;  %v239_v12 = vld [vmem:[#allocation2 + $0x68] sm:$0xff]  ;;  %v179_v43 = vunpack.c.0.s8 %v178_v33  ;;  %v10926_v44 = vshrl.u32 %v180_v34, 7  ;;  %s10673_s5 = scalar_lea.vmem %s8681_s20, 32  ;;  %p10678_p11 = scmp.lt.s32.totalorder %s8681_s20, %s8681_s20 }
  0xbb   :  { %v8707_v10 = vcombine.high %v234_v6, %v238_v7  ;;  %v242_v13 = vld [vmem:[#allocation2 + $0x80] sm:$0xff]  ;;  %3340 = vmatprep.subr.bf16.mxu0 %v8699_v3  ;;  %v8709_v14 = vcombine.high %v235_v11, %v239_v12  ;;  %v243_v16 = vld [vmem:[#allocation2 + $0x88] sm:$0xff]  ;;  %3504 = vmatprep.subr.bf16.mxu1 %v8701_v8  ;;  %v8706_v18 = vcombine.low %v234_v6, %v238_v7  ;;  %p10674_p10 = scmp.ne.s32.totalorder %s8681_s20, %s10673_s5  ;;  %p10679_p12 = scmp.lt.s32.totalorder %s10673_s5, %s10673_s5 }
  0xbc   :  { %v246_v15 = vld [vmem:[#allocation2 + $0xa0] sm:$0xff]  ;;  %v247_v17 = vld [vmem:[#allocation2 + $0xa8] sm:$0xff]  ;;  %3341 = vmatpush1.bf16.msra.mxu0 %v8698_v5  ;;  %3505 = vmatpush1.bf16.msra.mxu1 %v8700_v9  ;;  %v8708_v19 = vcombine.low %v235_v11, %v239_v12  ;;  %v10929_v53 = vsub.s32 %v179_v43, %v10926_v44 }
  0xbd   :  { %3342 = vmatprep.subr.bf16.mxu0 %v8707_v10  ;;  %v8715_v20 = vcombine.high %v242_v13, %v246_v15  ;;  %3506 = vmatprep.subr.bf16.mxu1 %v8709_v14  ;;  %v8717_v21 = vcombine.high %v243_v16, %v247_v17  ;;  %v250_v22 = vld [vmem:[#allocation2 + $0xc0] sm:$0xff]  ;;  %v251_v24 = vld [vmem:[#allocation2 + $0xc8] sm:$0xff]  ;;  %v8714_v26 = vcombine.low %v242_v13, %v246_v15  ;;  %p10680_p13 = por %p10679_p12, %p10678_p11 }
  0xbe   :  { %v254_v23 = vld [vmem:[#allocation2 + $0xe0] sm:$0xff]  ;;  %v255_v25 = vld [vmem:[#allocation2 + $0xe8] sm:$0xff]  ;;  %v8716_v27 = vcombine.low %v243_v16, %v247_v17 }
  0xbf   :  { %v8723_v28 = vcombine.high %v250_v22, %v254_v23  ;;  %v8725_v29 = vcombine.high %v251_v24, %v255_v25  ;;  %v258_v30 = vld [vmem:[#allocation2 + $0x100] sm:$0xff]  ;;  %v259_v35 = vld [vmem:[#allocation2 + $0x108] sm:$0xff]  ;;  %v8722_v37 = vcombine.low %v250_v22, %v254_v23  ;;  %v8724_v38 = vcombine.low %v251_v24, %v255_v25  ;;  %p10681_p0 = pnand %p10680_p13, %p10674_p10 }
  0xc0   :  { %3343 = vmatpush1.bf16.msra.mxu0 %v8706_v18  ;;  %3507 = vmatpush1.bf16.msra.mxu1 %v8708_v19  ;;  %v262_v31 = vld [vmem:[#allocation2 + $0x120] sm:$0xff]  ;;  %v263_v36 = vld [vmem:[#allocation2 + $0x128] sm:$0xff] }
  0xc1   :  { %3344 = vmatprep.subr.bf16.mxu0 %v8715_v20  ;;  %3508 = vmatprep.subr.bf16.mxu1 %v8717_v21  ;;  %v8731_v39 = vcombine.high %v258_v30, %v262_v31  ;;  %v8733_v40 = vcombine.high %v259_v35, %v263_v36  ;;  %v266_v41 = vld [vmem:[#allocation2 + $0x140] sm:$0xff]  ;;  %v267_v45 = vld [vmem:[#allocation2 + $0x148] sm:$0xff]  ;;  %v8730_v47 = vcombine.low %v258_v30, %v262_v31 }
  0xc2   :  { %v270_v42 = vld [vmem:[#allocation2 + $0x160] sm:$0xff]  ;;  %v271_v46 = vld [vmem:[#allocation2 + $0x168] sm:$0xff]  ;;  %v8732_v48 = vcombine.low %v259_v35, %v263_v36 }
  0xc3   :  { %v8739_v49 = vcombine.high %v266_v41, %v270_v42  ;;  %v8741_v50 = vcombine.high %v267_v45, %v271_v46  ;;  %v274_v51 = vld [vmem:[#allocation2 + $0x180] sm:$0xff]  ;;  %v275_v54 = vld [vmem:[#allocation2 + $0x188] sm:$0xff]  ;;  %v8738_v56 = vcombine.low %v266_v41, %v270_v42  ;;  %v8740_v57 = vcombine.low %v267_v45, %v271_v46 }
  0xc4   :  { %3345 = vmatpush1.bf16.msra.mxu0 %v8714_v26  ;;  %3509 = vmatpush1.bf16.msra.mxu1 %v8716_v27  ;;  %v278_v52 = vld [vmem:[#allocation2 + $0x1a0] sm:$0xff]  ;;  %v279_v55 = vld [vmem:[#allocation2 + $0x1a8] sm:$0xff] }
  0xc5   :  { %3346 = vmatprep.subr.bf16.mxu0 %v8723_v28  ;;  %3510 = vmatprep.subr.bf16.mxu1 %v8725_v29  ;;  %v8747_v58 = vcombine.high %v274_v51, %v278_v52  ;;  %v10934_v59 = vld [vmem:[%s11256_s0] sm:$0xff]  ;;  %v8749_v60 = vcombine.high %v275_v54, %v279_v55  ;;  %v283_v0 = vld [vmem:[#allocation2 + $0x1c8] sm:$0xff]  ;;  %v8746_v2 = vcombine.low %v274_v51, %v278_v52 }
  0xc6   :  { %v282_v61 = vld [vmem:[#allocation2 + $0x1c0] sm:$0xff]  ;;  %v10938_v63 = vrot.slane %v10934_v59, %v10929_v53  ;;  %v287_v1 = vld [vmem:[#allocation2 + $0x1e8] sm:$0xff]  ;;  %v8748_v4 = vcombine.low %v275_v54, %v279_v55 }
  0xc7   :  { %v286_v62 = vld [vmem:[#allocation2 + $0x1e0] sm:$0xff]  ;;  %v8757_v6 = vcombine.high %v283_v0, %v287_v1  ;;  %v291_v10 = vld [vmem:[#allocation2 + $0x208] sm:$0xff]  ;;  %v8756_v13 = vcombine.low %v283_v0, %v287_v1 }
  0xc8   :  { %3347 = vmatpush1.bf16.msra.mxu0 %v8722_v37  ;;  %3511 = vmatpush1.bf16.msra.mxu1 %v8724_v38  ;;  %v191_v3 = vcombine.high %v10938_v63, %v10938_v63  ;;  %v8755_v5 = vcombine.high %v282_v61, %v286_v62  ;;  %v290_v7 = vld [vmem:[#allocation2 + $0x200] sm:$0xff]  ;;  %v295_v11 = vld [vmem:[#allocation2 + $0x228] sm:$0xff]  ;;  %v8754_v12 = vcombine.low %v282_v61, %v286_v62 }
  0xc9   :  { %3348 = vmatprep.subr.bf16.mxu0 %v8731_v39  ;;  %3512 = vmatprep.subr.bf16.mxu1 %v8733_v40  ;;  %v294_v8 = vld [vmem:[#allocation2 + $0x220] sm:$0xff]  ;;  %v8765_v15 = vcombine.high %v291_v10, %v295_v11  ;;  %v299_v18 = vld [vmem:[#allocation2 + $0x248] sm:$0xff]  ;;  %v8764_v21 = vcombine.low %v291_v10, %v295_v11 }
  0xca   :  { %v10942_v9 = vpack.c.bf16 %v191_v3, %v191_v3  ;;  %v8763_v14 = vcombine.high %v290_v7, %v294_v8  ;;  %v298_v16 = vld [vmem:[#allocation2 + $0x240] sm:$0xff]  ;;  %v303_v19 = vld [vmem:[#allocation2 + $0x268] sm:$0xff]  ;;  %v8762_v20 = vcombine.low %v290_v7, %v294_v8 }
  0xcb   :  { %v302_v17 = vld [vmem:[#allocation2 + $0x260] sm:$0xff]  ;;  %v8773_v23 = vcombine.high %v299_v18, %v303_v19  ;;  %v307_v26 = vld [vmem:[#allocation2 + $0x288] sm:$0xff]  ;;  %v8772_v29 = vcombine.low %v299_v18, %v303_v19 }
  0xcc   :  { %3349 = vmatpush1.bf16.msra.mxu0 %v8730_v47  ;;  %3513 = vmatpush1.bf16.msra.mxu1 %v8732_v48  ;;  %v8771_v22 = vcombine.high %v298_v16, %v302_v17  ;;  %v306_v24 = vld [vmem:[#allocation2 + $0x280] sm:$0xff]  ;;  %v311_v27 = vld [vmem:[#allocation2 + $0x2a8] sm:$0xff]  ;;  %v8770_v28 = vcombine.low %v298_v16, %v302_v17 }
  0xcd   :  { %3350 = vmatprep.subr.bf16.mxu0 %v8739_v49  ;;  %3514 = vmatprep.subr.bf16.mxu1 %v8741_v50  ;;  %v310_v25 = vld [vmem:[#allocation2 + $0x2a0] sm:$0xff]  ;;  %v8781_v31 = vcombine.high %v307_v26, %v311_v27  ;;  %v315_v34 = vld [vmem:[#allocation2 + $0x2c8] sm:$0xff]  ;;  %v8780_v37 = vcombine.low %v307_v26, %v311_v27 }
  0xce   :  { %3372 = vmatprep.mubr.bf16.mxu0 %v10942_v9  ;;  %3536 = vmatprep.mubr.bf16.mxu1 %v10942_v9  ;;  %v8779_v30 = vcombine.high %v306_v24, %v310_v25  ;;  %v314_v32 = vld [vmem:[#allocation2 + $0x2c0] sm:$0xff]  ;;  %v319_v35 = vld [vmem:[#allocation2 + $0x2e8] sm:$0xff]  ;;  %v8778_v36 = vcombine.low %v306_v24, %v310_v25  ;;  %v10955_v25 = vpack.c.bf16 %v10938_v63, %v10938_v63 }
  0xcf   :  { %v318_v33 = vld [vmem:[#allocation2 + $0x2e0] sm:$0xff]  ;;  %v8789_v39 = vcombine.high %v315_v34, %v319_v35  ;;  %v323_v42 = vld [vmem:[#allocation2 + $0x308] sm:$0xff]  ;;  %v8788_v46 = vcombine.low %v315_v34, %v319_v35 }
  0xd0   :  { %3351 = vmatpush1.bf16.msra.mxu0 %v8738_v56  ;;  %3515 = vmatpush1.bf16.msra.mxu1 %v8740_v57  ;;  %v8787_v38 = vcombine.high %v314_v32, %v318_v33  ;;  %v322_v40 = vld [vmem:[#allocation2 + $0x300] sm:$0xff]  ;;  %v327_v43 = vld [vmem:[#allocation2 + $0x328] sm:$0xff]  ;;  %v8786_v45 = vcombine.low %v314_v32, %v318_v33 }
  0xd1   :  { %3352 = vmatprep.subr.bf16.mxu0 %v8747_v58  ;;  %3516 = vmatprep.subr.bf16.mxu1 %v8749_v60  ;;  %v326_v41 = vld [vmem:[#allocation2 + $0x320] sm:$0xff]  ;;  %v8797_v48 = vcombine.high %v323_v42, %v327_v43  ;;  %v331_v51 = vld [vmem:[#allocation2 + $0x348] sm:$0xff]  ;;  %v8796_v55 = vcombine.low %v323_v42, %v327_v43 }
  0xd2   :  { %v8795_v47 = vcombine.high %v322_v40, %v326_v41  ;;  %v330_v49 = vld [vmem:[#allocation2 + $0x340] sm:$0xff]  ;;  %v335_v52 = vld [vmem:[#allocation2 + $0x368] sm:$0xff]  ;;  %v8794_v54 = vcombine.low %v322_v40, %v326_v41 }
  0xd3   :  { %v334_v50 = vld [vmem:[#allocation2 + $0x360] sm:$0xff]  ;;  %v8805_v57 = vcombine.high %v331_v51, %v335_v52  ;;  %v339_v61 = vld [vmem:[#allocation2 + $0x388] sm:$0xff]  ;;  %v8804_v1 = vcombine.low %v331_v51, %v335_v52 }
  0xd4   :  { %3353 = vmatpush1.bf16.msra.mxu0 %v8746_v2  ;;  %3517 = vmatpush1.bf16.msra.mxu1 %v8748_v4  ;;  %v8803_v56 = vcombine.high %v330_v49, %v334_v50  ;;  %v338_v58 = vld [vmem:[#allocation2 + $0x380] sm:$0xff]  ;;  %v343_v62 = vld [vmem:[#allocation2 + $0x3a8] sm:$0xff]  ;;  %v8802_v0 = vcombine.low %v330_v49, %v334_v50 }
  0xd5   :  { %3354 = vmatprep.subr.bf16.mxu0 %v8755_v5  ;;  %3518 = vmatprep.subr.bf16.mxu1 %v8757_v6  ;;  %v342_v60 = vld [vmem:[#allocation2 + $0x3a0] sm:$0xff]  ;;  %v8813_v3 = vcombine.high %v339_v61, %v343_v62  ;;  %v176_v6 = vcombine.high %v10934_v59, %v10934_v59  ;;  %v347_v7 = vld [vmem:[#allocation2 + $0x3c8] sm:$0xff]  ;;  %v8812_v11 = vcombine.low %v339_v61, %v343_v62 }
  0xd6   :  { %v8811_v2 = vcombine.high %v338_v58, %v342_v60  ;;  %v346_v4 = vld [vmem:[#allocation2 + $0x3c0] sm:$0xff]  ;;  %v351_v8 = vld [vmem:[#allocation2 + $0x3e8] sm:$0xff]  ;;  %v8810_v10 = vcombine.low %v338_v58, %v342_v60 }
  0xd7   :  { %v350_v5 = vld [vmem:[#allocation2 + $0x3e0] sm:$0xff]  ;;  %v10949_v16 = vrot.slane %v176_v6, %v10929_v53  ;;  %v355_v17 = vld [vmem:[#allocation2 + $0x408] sm:$0xff]  ;;  %v8820_v59 = vcombine.low %v347_v7, %v351_v8 }
  0xd8   :  { %3355 = vmatpush1.bf16.msra.mxu0 %v8754_v12  ;;  %3519 = vmatpush1.bf16.msra.mxu1 %v8756_v13  ;;  %v8819_v12 = vcombine.high %v346_v4, %v350_v5  ;;  %v8821_v13 = vcombine.high %v347_v7, %v351_v8  ;;  %v359_v18 = vld [vmem:[#allocation2 + $0x428] sm:$0xff]  ;;  %v8818_v19 = vcombine.low %v346_v4, %v350_v5  ;;  %v374_v32 = vld [vmem:[#allocation2 + $0x4a0] sm:$0xff] }
  0xd9   :  { %3356 = vmatprep.subr.bf16.mxu0 %v8763_v14  ;;  %3520 = vmatprep.subr.bf16.mxu1 %v8765_v15  ;;  %v354_v14 = vld [vmem:[#allocation2 + $0x400] sm:$0xff]  ;;  %v192_v24 = vcombine.high %v10949_v16, %v10949_v16  ;;  %v363_v26 = vld [vmem:[#allocation2 + $0x448] sm:$0xff] }
  0xda   :  { %v358_v15 = vld [vmem:[#allocation2 + $0x420] sm:$0xff]  ;;  %v367_v27 = vld [vmem:[#allocation2 + $0x468] sm:$0xff] }
  0xdb   :  { %v371_v33 = vld [vmem:[#allocation2 + $0x488] sm:$0xff]  ;;  %v8837_v34 = vcombine.high %v363_v26, %v367_v27  ;;  %v382_v40 = vld [vmem:[#allocation2 + $0x4e0] sm:$0xff] }
  0xdc   :  { %3357 = vmatpush1.bf16.msra.mxu0 %v8762_v20  ;;  %3521 = vmatpush1.bf16.msra.mxu1 %v8764_v21  ;;  %v8827_v20 = vcombine.high %v354_v14, %v358_v15  ;;  %v8829_v21 = vcombine.high %v355_v17, %v359_v18  ;;  %v375_v35 = vld [vmem:[#allocation2 + $0x4a8] sm:$0xff]  ;;  %v390_v49 = vld [vmem:[#allocation2 + $0x520] sm:$0xff] }
  0xdd   :  { %3358 = vmatprep.subr.bf16.mxu0 %v8771_v22  ;;  %3522 = vmatprep.subr.bf16.mxu1 %v8773_v23  ;;  %v362_v22 = vld [vmem:[#allocation2 + $0x440] sm:$0xff]  ;;  %v379_v41 = vld [vmem:[#allocation2 + $0x4c8] sm:$0xff]  ;;  %v8845_v42 = vcombine.high %v371_v33, %v375_v35 }
  0xde   :  { %v366_v23 = vld [vmem:[#allocation2 + $0x460] sm:$0xff]  ;;  %v383_v43 = vld [vmem:[#allocation2 + $0x4e8] sm:$0xff] }
  0xdf   :  { %v8834_v63 = vcombine.low %v362_v22, %v366_v23  ;;  %v387_v50 = vld [vmem:[#allocation2 + $0x508] sm:$0xff]  ;;  %v8853_v51 = vcombine.high %v379_v41, %v383_v43  ;;  %v398_v58 = vld [vmem:[#allocation2 + $0x560] sm:$0xff] }
  0xe0   :  { %3359 = vmatpush1.bf16.msra.mxu0 %v8770_v28  ;;  %3523 = vmatpush1.bf16.msra.mxu1 %v8772_v29  ;;  %v8826_v28 = vcombine.low %v354_v14, %v358_v15  ;;  %v8828_v29 = vcombine.low %v355_v17, %v359_v18  ;;  %v391_v52 = vld [vmem:[#allocation2 + $0x528] sm:$0xff]  ;;  %v406_v4 = vld [vmem:[#allocation2 + $0x5a0] sm:$0xff] }
  0xe1   :  { %3360 = vmatprep.subr.bf16.mxu0 %v8779_v30  ;;  %3524 = vmatprep.subr.bf16.mxu1 %v8781_v31  ;;  %v8835_v30 = vcombine.high %v362_v22, %v366_v23  ;;  %v370_v31 = vld [vmem:[#allocation2 + $0x480] sm:$0xff]  ;;  %v395_v60 = vld [vmem:[#allocation2 + $0x548] sm:$0xff]  ;;  %v8861_v61 = vcombine.high %v387_v50, %v391_v52 }
  0xe2   :  { %v399_v62 = vld [vmem:[#allocation2 + $0x568] sm:$0xff] }
  0xe3   :  { %v403_v5 = vld [vmem:[#allocation2 + $0x588] sm:$0xff]  ;;  %v8869_v6 = vcombine.high %v395_v60, %v399_v62 }
  0xe4   :  { %3361 = vmatpush1.bf16.msra.mxu0 %v8778_v36  ;;  %3525 = vmatpush1.bf16.msra.mxu1 %v8780_v37  ;;  %v10957_v36 = vpack.c.bf16 %v192_v24, %v192_v24  ;;  %v8836_v37 = vcombine.low %v363_v26, %v367_v27  ;;  %v407_v7 = vld [vmem:[#allocation2 + $0x5a8] sm:$0xff] }
  0xe5   :  { %3362 = vmatprep.subr.bf16.mxu0 %v8787_v38  ;;  %3526 = vmatprep.subr.bf16.mxu1 %v8789_v39  ;;  %v8843_v38 = vcombine.high %v370_v31, %v374_v32  ;;  %v378_v39 = vld [vmem:[#allocation2 + $0x4c0] sm:$0xff]  ;;  %v411_v14 = vld [vmem:[#allocation2 + $0x5c8] sm:$0xff]  ;;  %v8877_v15 = vcombine.high %v403_v5, %v407_v7 }
  0xe6   :  { %v415_v17 = vld [vmem:[#allocation2 + $0x5e8] sm:$0xff] }
  0xe7   :  { %v419_v22 = vld [vmem:[#allocation2 + $0x608] sm:$0xff]  ;;  %v8885_v23 = vcombine.high %v411_v14, %v415_v17  ;;  %v8884_v27 = vcombine.low %v411_v14, %v415_v17  ;;  %v474_v17 = vld [vmem:[#allocation2 + $0x7c0] sm:$0xff] }
  0xe8   :  { %3363 = vmatpush1.bf16.msra.mxu0 %v8786_v45  ;;  %3527 = vmatpush1.bf16.msra.mxu1 %v8788_v46  ;;  %v8842_v45 = vcombine.low %v370_v31, %v374_v32  ;;  %v8844_v46 = vcombine.low %v371_v33, %v375_v35  ;;  %v423_v24 = vld [vmem:[#allocation2 + $0x628] sm:$0xff] }
  0xe9   :  { %3364 = vmatprep.subr.bf16.mxu0 %v8795_v47  ;;  %3528 = vmatprep.subr.bf16.mxu1 %v8797_v48  ;;  %v8851_v47 = vcombine.high %v378_v39, %v382_v40  ;;  %v386_v48 = vld [vmem:[#allocation2 + $0x500] sm:$0xff]  ;;  %v427_v31 = vld [vmem:[#allocation2 + $0x648] sm:$0xff]  ;;  %v8893_v32 = vcombine.high %v419_v22, %v423_v24  ;;  %v8892_v35 = vcombine.low %v419_v22, %v423_v24 }
  0xea   :  { %v431_v33 = vld [vmem:[#allocation2 + $0x668] sm:$0xff] }
  0xeb   :  { %v471_v14 = vld [vmem:[#allocation2 + $0x7a8] sm:$0xff] }
  0xec   :  { %3365 = vmatpush1.bf16.msra.mxu0 %v8794_v54  ;;  %3529 = vmatpush1.bf16.msra.mxu1 %v8796_v55  ;;  %v8850_v54 = vcombine.low %v378_v39, %v382_v40  ;;  %v8852_v55 = vcombine.low %v379_v41, %v383_v43  ;;  %v435_v39 = vld [vmem:[#allocation2 + $0x688] sm:$0xff]  ;;  %v8901_v40 = vcombine.high %v427_v31, %v431_v33 }
  0xed   :  { %3366 = vmatprep.subr.bf16.mxu0 %v8803_v56  ;;  %3530 = vmatprep.subr.bf16.mxu1 %v8805_v57  ;;  %v8859_v56 = vcombine.high %v386_v48, %v390_v49  ;;  %v394_v57 = vld [vmem:[#allocation2 + $0x540] sm:$0xff]  ;;  %v439_v41 = vld [vmem:[#allocation2 + $0x6a8] sm:$0xff]  ;;  %v8900_v43 = vcombine.low %v427_v31, %v431_v33 }
  0xee   :  { %v8866_v8 = vcombine.low %v394_v57, %v398_v58 }
  0xf0   :  { %3367 = vmatpush1.bf16.msra.mxu0 %v8802_v0  ;;  %3531 = vmatpush1.bf16.msra.mxu1 %v8804_v1  ;;  %v8858_v0 = vcombine.low %v386_v48, %v390_v49  ;;  %v8860_v1 = vcombine.low %v387_v50, %v391_v52  ;;  %v443_v48 = vld [vmem:[#allocation2 + $0x6c8] sm:$0xff]  ;;  %v8909_v49 = vcombine.high %v435_v39, %v439_v41 }
  0xf1   :  { %3368 = vmatprep.subr.bf16.mxu0 %v8811_v2  ;;  %3532 = vmatprep.subr.bf16.mxu1 %v8813_v3  ;;  %v8867_v2 = vcombine.high %v394_v57, %v398_v58  ;;  %v402_v3 = vld [vmem:[#allocation2 + $0x580] sm:$0xff]  ;;  %v447_v50 = vld [vmem:[#allocation2 + $0x6e8] sm:$0xff]  ;;  %v8908_v52 = vcombine.low %v435_v39, %v439_v41 }
  0xf2   :  { %v8874_v18 = vcombine.low %v402_v3, %v406_v4  ;;  %v451_v57 = vld [vmem:[#allocation2 + $0x708] sm:$0xff]  ;;  %v8917_v58 = vcombine.high %v443_v48, %v447_v50 }
  0xf3   :  { %v491_v39 = vld [vmem:[#allocation2 + $0x848] sm:$0xff] }
  0xf4   :  { %3369 = vmatpush1.bf16.msra.mxu0 %v8810_v10  ;;  %3533 = vmatpush1.bf16.msra.mxu1 %v8812_v11  ;;  %v8868_v10 = vcombine.low %v395_v60, %v399_v62  ;;  %v8875_v11 = vcombine.high %v402_v3, %v406_v4  ;;  %v455_v60 = vld [vmem:[#allocation2 + $0x728] sm:$0xff]  ;;  %v8916_v62 = vcombine.low %v443_v48, %v447_v50  ;;  %v498_v48 = vld [vmem:[#allocation2 + $0x880] sm:$0xff] }
  0xf5   :  { %3370 = vmatprep.subr.bf16.mxu0 %v8819_v12  ;;  %3534 = vmatprep.subr.bf16.mxu1 %v8821_v13  ;;  %v410_v12 = vld [vmem:[#allocation2 + $0x5c0] sm:$0xff]  ;;  %v459_v3 = vld [vmem:[#allocation2 + $0x748] sm:$0xff]  ;;  %v8925_v4 = vcombine.high %v451_v57, %v455_v60 }
  0xf6   :  { %v414_v13 = vld [vmem:[#allocation2 + $0x5e0] sm:$0xff]  ;;  %v495_v41 = vld [vmem:[#allocation2 + $0x868] sm:$0xff] }
  0xf7   :  { %v8882_v26 = vcombine.low %v410_v12, %v414_v13  ;;  %v499_v50 = vld [vmem:[#allocation2 + $0x888] sm:$0xff] }
  0xf8   :  { %3371 = vmatpush1.bf16.msra.mxu0 %v8818_v19  ;;  %3535 = vmatpush1.bf16.msra.mxu1 %v8820_v59  ;;  %v8876_v19 = vcombine.low %v403_v5, %v407_v7  ;;  %v8883_v59 = vcombine.high %v410_v12, %v414_v13  ;;  %v463_v5 = vld [vmem:[#allocation2 + $0x768] sm:$0xff]  ;;  %v8924_v7 = vcombine.low %v451_v57, %v455_v60  ;;  %v506_v57 = vld [vmem:[#allocation2 + $0x8c0] sm:$0xff] }
  0xf9   :  { %3381 = vmatprep.subr.bf16.mxu0 %v8827_v20  ;;  %3545 = vmatprep.subr.bf16.mxu1 %v8829_v21  ;;  %v418_v20 = vld [vmem:[#allocation2 + $0x600] sm:$0xff]  ;;  %v467_v12 = vld [vmem:[#allocation2 + $0x788] sm:$0xff]  ;;  %v8933_v13 = vcombine.high %v459_v3, %v463_v5 }
  0xfa   :  { %v422_v21 = vld [vmem:[#allocation2 + $0x620] sm:$0xff]  ;;  %v8941_v22 = vcombine.high %v467_v12, %v471_v14  ;;  %v507_v60 = vld [vmem:[#allocation2 + $0x8c8] sm:$0xff] }
  0xfb   :  { %3373 = vmatmul.mubr.bf16.vlgmr.msra.gmra.mrb[0].mxu0 %v10955_v25  ;;  %3537 = vmatmul.mubr.bf16.vlgmr.msra.gmra.mrb[0].mxu1 %v10955_v25 }
  0xfc   :  { %3382 = vmatpush1.bf16.msra.mxu0 %v8826_v28  ;;  %3546 = vmatpush1.bf16.msra.mxu1 %v8828_v29  ;;  %v8891_v28 = vcombine.high %v418_v20, %v422_v21  ;;  %v426_v29 = vld [vmem:[#allocation2 + $0x640] sm:$0xff] }
  0xfd   :  { %3383 = vmatprep.subr.bf16.mxu0 %v8835_v30  ;;  %3547 = vmatprep.subr.bf16.mxu1 %v8837_v34  ;;  %v430_v30 = vld [vmem:[#allocation2 + $0x660] sm:$0xff]  ;;  %v8890_v34 = vcombine.low %v418_v20, %v422_v21  ;;  %v475_v20 = vld [vmem:[#allocation2 + $0x7c8] sm:$0xff] }
  0xfe   :  { %3413 = vmatprep.mubr.bf16.mxu0 %v10957_v36  ;;  %3577 = vmatprep.mubr.bf16.mxu1 %v10957_v36  ;;  %v479_v21 = vld [vmem:[#allocation2 + $0x7e8] sm:$0xff] }
  0xff   :  { %v8949_v31 = vcombine.high %v475_v20, %v479_v21 }
 0x100   :  { %3384 = vmatpush1.bf16.msra.mxu0 %v8834_v63  ;;  %3548 = vmatpush1.bf16.msra.mxu1 %v8836_v37  ;;  %v8899_v63 = vcombine.high %v426_v29, %v430_v30  ;;  %v434_v37 = vld [vmem:[#allocation2 + $0x680] sm:$0xff] }
 0x101   :  { %3385 = vmatprep.subr.bf16.mxu0 %v8843_v38  ;;  %3549 = vmatprep.subr.bf16.mxu1 %v8845_v42  ;;  %v438_v38 = vld [vmem:[#allocation2 + $0x6a0] sm:$0xff]  ;;  %v8898_v42 = vcombine.low %v426_v29, %v430_v30  ;;  %v483_v30 = vld [vmem:[#allocation2 + $0x808] sm:$0xff] }
 0x102   :  { %v486_v29 = vld [vmem:[#allocation2 + $0x820] sm:$0xff] }
 0x104   :  { %3386 = vmatpush1.bf16.msra.mxu0 %v8842_v45  ;;  %3550 = vmatpush1.bf16.msra.mxu1 %v8844_v46  ;;  %v8907_v45 = vcombine.high %v434_v37, %v438_v38  ;;  %v442_v46 = vld [vmem:[#allocation2 + $0x6c0] sm:$0xff] }
 0x105   :  { %3387 = vmatprep.subr.bf16.mxu0 %v8851_v47  ;;  %3551 = vmatprep.subr.bf16.mxu1 %v8853_v51  ;;  %v446_v47 = vld [vmem:[#allocation2 + $0x6e0] sm:$0xff]  ;;  %v8906_v51 = vcombine.low %v434_v37, %v438_v38 }
 0x106   :  { %v490_v37 = vld [vmem:[#allocation2 + $0x840] sm:$0xff] }
 0x107   :  { %v494_v38 = vld [vmem:[#allocation2 + $0x860] sm:$0xff] }
 0x108   :  { %3388 = vmatpush1.bf16.msra.mxu0 %v8850_v54  ;;  %3552 = vmatpush1.bf16.msra.mxu1 %v8852_v55  ;;  %v8915_v54 = vcombine.high %v442_v46, %v446_v47  ;;  %v450_v55 = vld [vmem:[#allocation2 + $0x700] sm:$0xff] }
 0x109   :  { %3389 = vmatprep.subr.bf16.mxu0 %v8859_v56  ;;  %3553 = vmatprep.subr.bf16.mxu1 %v8861_v61  ;;  %v454_v56 = vld [vmem:[#allocation2 + $0x720] sm:$0xff]  ;;  %v8914_v61 = vcombine.low %v442_v46, %v446_v47  ;;  %v8963_v47 = vcombine.high %v490_v37, %v494_v38 }
 0x10c   :  { %3390 = vmatpush1.bf16.msra.mxu0 %v8858_v0  ;;  %3554 = vmatpush1.bf16.msra.mxu1 %v8860_v1  ;;  %v8923_v0 = vcombine.high %v450_v55, %v454_v56  ;;  %v458_v1 = vld [vmem:[#allocation2 + $0x740] sm:$0xff] }
 0x10d   :  { %3391 = vmatprep.subr.bf16.mxu0 %v8867_v2  ;;  %3555 = vmatprep.subr.bf16.mxu1 %v8869_v6  ;;  %v462_v2 = vld [vmem:[#allocation2 + $0x760] sm:$0xff]  ;;  %v8922_v6 = vcombine.low %v450_v55, %v454_v56  ;;  %v8964_v55 = vcombine.low %v491_v39, %v495_v41 }
 0x110   :  { %3392 = vmatpush1.bf16.msra.mxu0 %v8866_v8  ;;  %3556 = vmatpush1.bf16.msra.mxu1 %v8868_v10  ;;  %v8931_v8 = vcombine.high %v458_v1, %v462_v2  ;;  %v466_v10 = vld [vmem:[#allocation2 + $0x780] sm:$0xff] }
 0x111   :  { %3393 = vmatprep.subr.bf16.mxu0 %v8875_v11  ;;  %3557 = vmatprep.subr.bf16.mxu1 %v8877_v15  ;;  %v470_v11 = vld [vmem:[#allocation2 + $0x7a0] sm:$0xff]  ;;  %v8930_v15 = vcombine.low %v458_v1, %v462_v2 }
 0x112   :  { %v8938_v24 = vcombine.low %v466_v10, %v470_v11 }
 0x114   :  { %3394 = vmatpush1.bf16.msra.mxu0 %v8874_v18  ;;  %3558 = vmatpush1.bf16.msra.mxu1 %v8876_v19  ;;  %v8932_v18 = vcombine.low %v459_v3, %v463_v5  ;;  %v8939_v19 = vcombine.high %v466_v10, %v470_v11  ;;  %v514_v3 = vld [vmem:[#allocation2 + $0x900] sm:$0xff]  ;;  %v515_v5 = vld [vmem:[#allocation2 + $0x908] sm:$0xff] }
 0x115   :  { %3395 = vmatprep.subr.bf16.mxu0 %v8883_v59  ;;  %3559 = vmatprep.subr.bf16.mxu1 %v8885_v23  ;;  %v478_v59 = vld [vmem:[#allocation2 + $0x7e0] sm:$0xff]  ;;  %v10966_v23 = vld [vmem:[%s11256_s0 + $0x8] sm:$0xff] }
 0x116   :  { %v10970_v33 = vrot.slane %v10966_v23, %v10929_v53 }
 0x118   :  { %3396 = vmatpush1.bf16.msra.mxu0 %v8882_v26  ;;  %3560 = vmatpush1.bf16.msra.mxu1 %v8884_v27  ;;  %v8940_v26 = vcombine.low %v467_v12, %v471_v14  ;;  %v8947_v27 = vcombine.high %v474_v17, %v478_v59  ;;  %v522_v12 = vld [vmem:[#allocation2 + $0x940] sm:$0xff]  ;;  %v523_v14 = vld [vmem:[#allocation2 + $0x948] sm:$0xff] }
 0x119   :  { %3397 = vmatprep.subr.bf16.mxu0 %v8891_v28  ;;  %3561 = vmatprep.subr.bf16.mxu1 %v8893_v32  ;;  %v482_v28 = vld [vmem:[#allocation2 + $0x800] sm:$0xff]  ;;  %v487_v32 = vld [vmem:[#allocation2 + $0x828] sm:$0xff] }
 0x11a   :  { %v8956_v46 = vcombine.low %v483_v30, %v487_v32 }
 0x11c   :  { %3398 = vmatpush1.bf16.msra.mxu0 %v8890_v34  ;;  %3562 = vmatpush1.bf16.msra.mxu1 %v8892_v35  ;;  %v8946_v34 = vcombine.low %v474_v17, %v478_v59  ;;  %v8948_v35 = vcombine.low %v475_v20, %v479_v21  ;;  %v527_v17 = vld [vmem:[#allocation2 + $0x968] sm:$0xff]  ;;  %v530_v20 = vld [vmem:[#allocation2 + $0x980] sm:$0xff] }
 0x11d   :  { %3399 = vmatprep.subr.bf16.mxu0 %v8899_v63  ;;  %3563 = vmatprep.subr.bf16.mxu1 %v8901_v40  ;;  %v8955_v63 = vcombine.high %v482_v28, %v486_v29  ;;  %v8957_v40 = vcombine.high %v483_v30, %v487_v32  ;;  %v534_v21 = vld [vmem:[#allocation2 + $0x9a0] sm:$0xff]  ;;  %v539_v32 = vld [vmem:[#allocation2 + $0x9c8] sm:$0xff] }
 0x11e   :  { %v538_v30 = vld [vmem:[#allocation2 + $0x9c0] sm:$0xff] }
 0x120   :  { %3400 = vmatpush1.bf16.msra.mxu0 %v8898_v42  ;;  %3564 = vmatpush1.bf16.msra.mxu1 %v8900_v43  ;;  %v208_v42 = vcombine.high %v10970_v33, %v10970_v33  ;;  %v10976_v43 = vpack.c.bf16 %v10949_v16, %v10949_v16  ;;  %v8962_v16 = vcombine.low %v490_v37, %v494_v38 }
 0x121   :  { %3401 = vmatprep.subr.bf16.mxu0 %v8907_v45  ;;  %3565 = vmatprep.subr.bf16.mxu1 %v8909_v49  ;;  %v8954_v45 = vcombine.low %v482_v28, %v486_v29  ;;  %v502_v49 = vld [vmem:[#allocation2 + $0x8a0] sm:$0xff]  ;;  %v8996_v28 = vcombine.low %v523_v14, %v527_v17  ;;  %v9003_v29 = vcombine.high %v530_v20, %v534_v21 }
 0x122   :  { %v8971_v56 = vcombine.high %v498_v48, %v502_v49 }
 0x124   :  { %3402 = vmatpush1.bf16.msra.mxu0 %v8906_v51  ;;  %3566 = vmatpush1.bf16.msra.mxu1 %v8908_v52  ;;  %v8965_v51 = vcombine.high %v491_v39, %v495_v41  ;;  %v503_v52 = vld [vmem:[#allocation2 + $0x8a8] sm:$0xff]  ;;  %v546_v39 = vld [vmem:[#allocation2 + $0xa00] sm:$0xff] }
 0x125   :  { %3403 = vmatprep.subr.bf16.mxu0 %v8915_v54  ;;  %3567 = vmatprep.subr.bf16.mxu1 %v8917_v58  ;;  %v10978_v54 = vpack.c.bf16 %v208_v42, %v208_v42  ;;  %v510_v58 = vld [vmem:[#allocation2 + $0x8e0] sm:$0xff]  ;;  %v8972_v1 = vcombine.low %v499_v50, %v503_v52  ;;  %v547_v41 = vld [vmem:[#allocation2 + $0xa08] sm:$0xff] }
 0x126   :  { %v8979_v2 = vcombine.high %v506_v57, %v510_v58 }
 0x128   :  { %3404 = vmatpush1.bf16.msra.mxu0 %v8914_v61  ;;  %3568 = vmatpush1.bf16.msra.mxu1 %v8916_v62  ;;  %v8973_v61 = vcombine.high %v499_v50, %v503_v52  ;;  %v511_v62 = vld [vmem:[#allocation2 + $0x8e8] sm:$0xff]  ;;  %v558_v50 = vld [vmem:[#allocation2 + $0xa60] sm:$0xff] }
 0x129   :  { %3405 = vmatprep.subr.bf16.mxu0 %v8923_v0  ;;  %3569 = vmatprep.subr.bf16.mxu1 %v8925_v4  ;;  %v8970_v0 = vcombine.low %v498_v48, %v502_v49  ;;  %v518_v4 = vld [vmem:[#allocation2 + $0x920] sm:$0xff]  ;;  %v8980_v10 = vcombine.low %v507_v60, %v511_v62 }
 0x12a   :  { %v8987_v11 = vcombine.high %v514_v3, %v518_v4  ;;  %v554_v49 = vld [vmem:[#allocation2 + $0xa40] sm:$0xff] }
 0x12c   :  { %3406 = vmatpush1.bf16.msra.mxu0 %v8922_v6  ;;  %3570 = vmatpush1.bf16.msra.mxu1 %v8924_v7  ;;  %v8981_v6 = vcombine.high %v507_v60, %v511_v62  ;;  %v519_v7 = vld [vmem:[#allocation2 + $0x928] sm:$0xff]  ;;  %v566_v60 = vld [vmem:[#allocation2 + $0xaa0] sm:$0xff] }
 0x12d   :  { %3407 = vmatprep.subr.bf16.mxu0 %v8931_v8  ;;  %3571 = vmatprep.subr.bf16.mxu1 %v8933_v13  ;;  %v8978_v8 = vcombine.low %v506_v57, %v510_v58  ;;  %v526_v13 = vld [vmem:[#allocation2 + $0x960] sm:$0xff]  ;;  %v9027_v57 = vcombine.high %v554_v49, %v558_v50 }
 0x12e   :  { %v8995_v59 = vcombine.high %v522_v12, %v526_v13  ;;  %v562_v58 = vld [vmem:[#allocation2 + $0xa80] sm:$0xff] }
 0x130   :  { %3408 = vmatpush1.bf16.msra.mxu0 %v8930_v15  ;;  %3572 = vmatpush1.bf16.msra.mxu1 %v8932_v18  ;;  %v8989_v15 = vcombine.high %v515_v5, %v519_v7  ;;  %v8986_v18 = vcombine.low %v514_v3, %v518_v4  ;;  %v9035_v3 = vcombine.high %v562_v58, %v566_v60  ;;  %v570_v4 = vld [vmem:[#allocation2 + $0xac0] sm:$0xff] }
 0x131   :  { %3409 = vmatprep.subr.bf16.mxu0 %v8939_v19  ;;  %3573 = vmatprep.subr.bf16.mxu1 %v8941_v22  ;;  %v8988_v19 = vcombine.low %v515_v5, %v519_v7  ;;  %v531_v22 = vld [vmem:[#allocation2 + $0x988] sm:$0xff]  ;;  %v574_v5 = vld [vmem:[#allocation2 + $0xae0] sm:$0xff] }
 0x134   :  { %3410 = vmatpush1.bf16.msra.mxu0 %v8938_v24  ;;  %3574 = vmatpush1.bf16.msra.mxu1 %v8940_v26  ;;  %v8997_v24 = vcombine.high %v523_v14, %v527_v17  ;;  %v535_v26 = vld [vmem:[#allocation2 + $0x9a8] sm:$0xff]  ;;  %v582_v14 = vld [vmem:[#allocation2 + $0xb20] sm:$0xff] }
 0x135   :  { %3411 = vmatprep.subr.bf16.mxu0 %v8947_v27  ;;  %3575 = vmatprep.subr.bf16.mxu1 %v8949_v31  ;;  %v8994_v27 = vcombine.low %v522_v12, %v526_v13  ;;  %v542_v31 = vld [vmem:[#allocation2 + $0x9e0] sm:$0xff]  ;;  %v9004_v37 = vcombine.low %v531_v22, %v535_v26  ;;  %v9043_v12 = vcombine.high %v570_v4, %v574_v5 }
 0x136   :  { %v9011_v38 = vcombine.high %v538_v30, %v542_v31  ;;  %v578_v13 = vld [vmem:[#allocation2 + $0xb00] sm:$0xff] }
 0x138   :  { %3412 = vmatpush1.bf16.msra.mxu0 %v8946_v34  ;;  %3576 = vmatpush1.bf16.msra.mxu1 %v8948_v35  ;;  %v9005_v34 = vcombine.high %v531_v22, %v535_v26  ;;  %v543_v35 = vld [vmem:[#allocation2 + $0x9e8] sm:$0xff]  ;;  %v590_v22 = vld [vmem:[#allocation2 + $0xb60] sm:$0xff] }
 0x139   :  { %3422 = vmatprep.subr.bf16.mxu0 %v8955_v63  ;;  %3586 = vmatprep.subr.bf16.mxu1 %v8957_v40  ;;  %v9002_v63 = vcombine.low %v530_v20, %v534_v21  ;;  %v550_v40 = vld [vmem:[#allocation2 + $0xa20] sm:$0xff]  ;;  %v9013_v42 = vcombine.high %v539_v32, %v543_v35  ;;  %v9051_v20 = vcombine.high %v578_v13, %v582_v14 }
 0x13a   :  { %v9019_v48 = vcombine.high %v546_v39, %v550_v40  ;;  %v586_v21 = vld [vmem:[#allocation2 + $0xb40] sm:$0xff] }
 0x13b   :  { %3414 = vmatmul.mubr.bf16.vlgmr.msra.gmra.mrb[0].mxu0 %v10976_v43  ;;  %3578 = vmatmul.mubr.bf16.vlgmr.msra.gmra.mrb[0].mxu1 %v10976_v43 }
 0x13c   :  { %3423 = vmatpush1.bf16.msra.mxu0 %v8954_v45  ;;  %3587 = vmatpush1.bf16.msra.mxu1 %v8956_v46  ;;  %v551_v45 = vld [vmem:[#allocation2 + $0xa28] sm:$0xff]  ;;  %v9010_v46 = vcombine.low %v538_v30, %v542_v31  ;;  %v9059_v30 = vcombine.high %v586_v21, %v590_v22  ;;  %v594_v31 = vld [vmem:[#allocation2 + $0xb80] sm:$0xff] }
 0x13d   :  { %3424 = vmatprep.subr.bf16.mxu0 %v8963_v47  ;;  %3588 = vmatprep.subr.bf16.mxu1 %v8965_v51  ;;  %v9012_v47 = vcombine.low %v539_v32, %v543_v35  ;;  %v555_v51 = vld [vmem:[#allocation2 + $0xa48] sm:$0xff]  ;;  %v9021_v52 = vcombine.high %v547_v41, %v551_v45  ;;  %v598_v32 = vld [vmem:[#allocation2 + $0xba0] sm:$0xff] }
 0x13e   :  { %3454 = vmatprep.mubr.bf16.mxu0 %v10978_v54  ;;  %3618 = vmatprep.mubr.bf16.mxu1 %v10978_v54 }
 0x140   :  { %3425 = vmatpush1.bf16.msra.mxu0 %v8962_v16  ;;  %3589 = vmatpush1.bf16.msra.mxu1 %v8964_v55  ;;  %v559_v16 = vld [vmem:[#allocation2 + $0xa68] sm:$0xff]  ;;  %v9018_v55 = vcombine.low %v546_v39, %v550_v40  ;;  %v9067_v39 = vcombine.high %v594_v31, %v598_v32  ;;  %v602_v40 = vld [vmem:[#allocation2 + $0xbc0] sm:$0xff] }
 0x141   :  { %3426 = vmatprep.subr.bf16.mxu0 %v8971_v56  ;;  %3590 = vmatprep.subr.bf16.mxu1 %v8973_v61  ;;  %v9020_v56 = vcombine.low %v547_v41, %v551_v45  ;;  %v563_v61 = vld [vmem:[#allocation2 + $0xa88] sm:$0xff]  ;;  %v9029_v62 = vcombine.high %v555_v51, %v559_v16  ;;  %v606_v41 = vld [vmem:[#allocation2 + $0xbe0] sm:$0xff] }
 0x144   :  { %3427 = vmatpush1.bf16.msra.mxu0 %v8970_v0  ;;  %3591 = vmatpush1.bf16.msra.mxu1 %v8972_v1  ;;  %v567_v0 = vld [vmem:[#allocation2 + $0xaa8] sm:$0xff]  ;;  %v9026_v1 = vcombine.low %v554_v49, %v558_v50  ;;  %v9075_v50 = vcombine.high %v602_v40, %v606_v41 }
 0x145   :  { %3428 = vmatprep.subr.bf16.mxu0 %v8979_v2  ;;  %3592 = vmatprep.subr.bf16.mxu1 %v8981_v6  ;;  %v9028_v2 = vcombine.low %v555_v51, %v559_v16  ;;  %v571_v6 = vld [vmem:[#allocation2 + $0xac8] sm:$0xff]  ;;  %v9037_v7 = vcombine.high %v563_v61, %v567_v0  ;;  %v610_v51 = vld [vmem:[#allocation2 + $0xc00] sm:$0xff] }
 0x146   :  { %v611_v16 = vld [vmem:[#allocation2 + $0xc08] sm:$0xff] }
 0x148   :  { %3429 = vmatpush1.bf16.msra.mxu0 %v8978_v8  ;;  %3593 = vmatpush1.bf16.msra.mxu1 %v8980_v10  ;;  %v575_v8 = vld [vmem:[#allocation2 + $0xae8] sm:$0xff]  ;;  %v9034_v10 = vcombine.low %v562_v58, %v566_v60  ;;  %v9074_v58 = vcombine.low %v602_v40, %v606_v41 }
 0x149   :  { %3430 = vmatprep.subr.bf16.mxu0 %v8987_v11  ;;  %3594 = vmatprep.subr.bf16.mxu1 %v8989_v15  ;;  %v9036_v11 = vcombine.low %v563_v61, %v567_v0  ;;  %v579_v15 = vld [vmem:[#allocation2 + $0xb08] sm:$0xff]  ;;  %v9045_v17 = vcombine.high %v571_v6, %v575_v8  ;;  %v618_v61 = vld [vmem:[#allocation2 + $0xc40] sm:$0xff] }
 0x14a   :  { %v619_v0 = vld [vmem:[#allocation2 + $0xc48] sm:$0xff] }
 0x14b   :  { %v655_v40 = vld [vmem:[#allocation2 + $0xd68] sm:$0xff] }
 0x14c   :  { %3431 = vmatpush1.bf16.msra.mxu0 %v8986_v18  ;;  %3595 = vmatpush1.bf16.msra.mxu1 %v8988_v19  ;;  %v583_v18 = vld [vmem:[#allocation2 + $0xb28] sm:$0xff]  ;;  %v9042_v19 = vcombine.low %v570_v4, %v574_v5  ;;  %v10993_v4 = vpack.c.bf16 %v10970_v33, %v10970_v33 }
 0x14d   :  { %3432 = vmatprep.subr.bf16.mxu0 %v8995_v59  ;;  %3596 = vmatprep.subr.bf16.mxu1 %v8997_v24  ;;  %v9044_v59 = vcombine.low %v571_v6, %v575_v8  ;;  %v587_v24 = vld [vmem:[#allocation2 + $0xb48] sm:$0xff]  ;;  %v9053_v26 = vcombine.high %v579_v15, %v583_v18  ;;  %v626_v8 = vld [vmem:[#allocation2 + $0xc80] sm:$0xff] }
 0x150   :  { %3433 = vmatpush1.bf16.msra.mxu0 %v8994_v27  ;;  %3597 = vmatpush1.bf16.msra.mxu1 %v8996_v28  ;;  %v591_v27 = vld [vmem:[#allocation2 + $0xb68] sm:$0xff]  ;;  %v9050_v28 = vcombine.low %v578_v13, %v582_v14 }
 0x151   :  { %3434 = vmatprep.subr.bf16.mxu0 %v9003_v29  ;;  %3598 = vmatprep.subr.bf16.mxu1 %v9005_v34  ;;  %v9052_v29 = vcombine.low %v579_v15, %v583_v18  ;;  %v595_v34 = vld [vmem:[#allocation2 + $0xb88] sm:$0xff]  ;;  %v9061_v35 = vcombine.high %v587_v24, %v591_v27  ;;  %v634_v18 = vld [vmem:[#allocation2 + $0xcc0] sm:$0xff] }
 0x152   :  { %v631_v13 = vld [vmem:[#allocation2 + $0xca8] sm:$0xff] }
 0x154   :  { %3435 = vmatpush1.bf16.msra.mxu0 %v9002_v63  ;;  %3599 = vmatpush1.bf16.msra.mxu1 %v9004_v37  ;;  %v599_v63 = vld [vmem:[#allocation2 + $0xba8] sm:$0xff]  ;;  %v9058_v37 = vcombine.low %v586_v21, %v590_v22 }
 0x155   :  { %3436 = vmatprep.subr.bf16.mxu0 %v9011_v38  ;;  %3600 = vmatprep.subr.bf16.mxu1 %v9013_v42  ;;  %v9060_v38 = vcombine.low %v587_v24, %v591_v27  ;;  %v603_v42 = vld [vmem:[#allocation2 + $0xbc8] sm:$0xff]  ;;  %v9069_v45 = vcombine.high %v595_v34, %v599_v63  ;;  %v9068_v49 = vcombine.low %v595_v34, %v599_v63  ;;  %v642_v27 = vld [vmem:[#allocation2 + $0xd00] sm:$0xff] }
 0x156   :  { %v639_v21 = vld [vmem:[#allocation2 + $0xce8] sm:$0xff]  ;;  %v650_v63 = vld [vmem:[#allocation2 + $0xd40] sm:$0xff] }
 0x158   :  { %3437 = vmatpush1.bf16.msra.mxu0 %v9010_v46  ;;  %3601 = vmatpush1.bf16.msra.mxu1 %v9012_v47  ;;  %v607_v46 = vld [vmem:[#allocation2 + $0xbe8] sm:$0xff]  ;;  %v193_v47 = vcombine.high %v10966_v23, %v10966_v23 }
 0x159   :  { %3438 = vmatprep.subr.bf16.mxu0 %v9019_v48  ;;  %3602 = vmatprep.subr.bf16.mxu1 %v9021_v52  ;;  %v9066_v48 = vcombine.low %v594_v31, %v598_v32  ;;  %v614_v52 = vld [vmem:[#allocation2 + $0xc20] sm:$0xff]  ;;  %v9076_v23 = vcombine.low %v603_v42, %v607_v46  ;;  %v647_v31 = vld [vmem:[#allocation2 + $0xd28] sm:$0xff] }
 0x15a   :  { %v9083_v60 = vcombine.high %v610_v51, %v614_v52  ;;  %v9082_v5 = vcombine.low %v610_v51, %v614_v52 }
 0x15c   :  { %3439 = vmatpush1.bf16.msra.mxu0 %v9018_v55  ;;  %3603 = vmatpush1.bf16.msra.mxu1 %v9020_v56  ;;  %v9077_v55 = vcombine.high %v603_v42, %v607_v46  ;;  %v615_v56 = vld [vmem:[#allocation2 + $0xc28] sm:$0xff]  ;;  %v658_v46 = vld [vmem:[#allocation2 + $0xd80] sm:$0xff] }
 0x15d   :  { %3440 = vmatprep.subr.bf16.mxu0 %v9027_v57  ;;  %3604 = vmatprep.subr.bf16.mxu1 %v9029_v62  ;;  %v10987_v57 = vrot.slane %v193_v47, %v10929_v53  ;;  %v622_v62 = vld [vmem:[#allocation2 + $0xc60] sm:$0xff]  ;;  %v9084_v6 = vcombine.low %v611_v16, %v615_v56 }
 0x15e   :  { %v9090_v33 = vcombine.low %v618_v61, %v622_v62  ;;  %v662_v47 = vld [vmem:[#allocation2 + $0xda0] sm:$0xff] }
 0x160   :  { %3441 = vmatpush1.bf16.msra.mxu0 %v9026_v1  ;;  %3605 = vmatpush1.bf16.msra.mxu1 %v9028_v2  ;;  %v9085_v1 = vcombine.high %v611_v16, %v615_v56  ;;  %v623_v2 = vld [vmem:[#allocation2 + $0xc68] sm:$0xff]  ;;  %v9131_v16 = vcombine.high %v658_v46, %v662_v47  ;;  %v670_v56 = vld [vmem:[#allocation2 + $0xde0] sm:$0xff] }
 0x161   :  { %3442 = vmatprep.subr.bf16.mxu0 %v9035_v3  ;;  %3606 = vmatprep.subr.bf16.mxu1 %v9037_v7  ;;  %v209_v3 = vcombine.high %v10987_v57, %v10987_v57  ;;  %v9091_v7 = vcombine.high %v618_v61, %v622_v62  ;;  %v9092_v15 = vcombine.low %v619_v0, %v623_v2 }
 0x162   :  { %v9130_v61 = vcombine.low %v658_v46, %v662_v47 }
 0x163   :  { %v10995_v14 = vpack.c.bf16 %v209_v3, %v209_v3  ;;  %v675_v3 = vld [vmem:[#allocation2 + $0xe08] sm:$0xff] }
 0x164   :  { %3443 = vmatpush1.bf16.msra.mxu0 %v9034_v10  ;;  %3607 = vmatpush1.bf16.msra.mxu1 %v9036_v11  ;;  %v630_v10 = vld [vmem:[#allocation2 + $0xca0] sm:$0xff]  ;;  %v627_v11 = vld [vmem:[#allocation2 + $0xc88] sm:$0xff] }
 0x165   :  { %3444 = vmatprep.subr.bf16.mxu0 %v9043_v12  ;;  %3608 = vmatprep.subr.bf16.mxu1 %v9045_v17  ;;  %v9093_v12 = vcombine.high %v619_v0, %v623_v2  ;;  %v9099_v17 = vcombine.high %v626_v8, %v630_v10  ;;  %v9098_v22 = vcombine.low %v626_v8, %v630_v10  ;;  %v678_v2 = vld [vmem:[#allocation2 + $0xe20] sm:$0xff] }
 0x166   :  { %v9100_v24 = vcombine.low %v627_v11, %v631_v13 }
 0x168   :  { %3445 = vmatpush1.bf16.msra.mxu0 %v9042_v19  ;;  %3609 = vmatpush1.bf16.msra.mxu1 %v9044_v59  ;;  %v638_v19 = vld [vmem:[#allocation2 + $0xce0] sm:$0xff]  ;;  %v635_v59 = vld [vmem:[#allocation2 + $0xcc8] sm:$0xff] }
 0x169   :  { %3446 = vmatprep.subr.bf16.mxu0 %v9051_v20  ;;  %3610 = vmatprep.subr.bf16.mxu1 %v9053_v26  ;;  %v9101_v20 = vcombine.high %v627_v11, %v631_v13  ;;  %v9107_v26 = vcombine.high %v634_v18, %v638_v19  ;;  %v9106_v32 = vcombine.low %v634_v18, %v638_v19  ;;  %v682_v11 = vld [vmem:[#allocation2 + $0xe40] sm:$0xff]  ;;  %v683_v13 = vld [vmem:[#allocation2 + $0xe48] sm:$0xff] }
 0x16a   :  { %v9108_v34 = vcombine.low %v635_v59, %v639_v21 }
 0x16c   :  { %3447 = vmatpush1.bf16.msra.mxu0 %v9050_v28  ;;  %3611 = vmatpush1.bf16.msra.mxu1 %v9052_v29  ;;  %v646_v28 = vld [vmem:[#allocation2 + $0xd20] sm:$0xff]  ;;  %v643_v29 = vld [vmem:[#allocation2 + $0xd08] sm:$0xff] }
 0x16d   :  { %3448 = vmatprep.subr.bf16.mxu0 %v9059_v30  ;;  %3612 = vmatprep.subr.bf16.mxu1 %v9061_v35  ;;  %v9109_v30 = vcombine.high %v635_v59, %v639_v21  ;;  %v9115_v35 = vcombine.high %v642_v27, %v646_v28  ;;  %v9114_v41 = vcombine.low %v642_v27, %v646_v28  ;;  %v690_v59 = vld [vmem:[#allocation2 + $0xe80] sm:$0xff]  ;;  %v691_v21 = vld [vmem:[#allocation2 + $0xe88] sm:$0xff] }
 0x16e   :  { %v9116_v42 = vcombine.low %v643_v29, %v647_v31 }
 0x170   :  { %3449 = vmatpush1.bf16.msra.mxu0 %v9058_v37  ;;  %3613 = vmatpush1.bf16.msra.mxu1 %v9060_v38  ;;  %v654_v37 = vld [vmem:[#allocation2 + $0xd60] sm:$0xff]  ;;  %v651_v38 = vld [vmem:[#allocation2 + $0xd48] sm:$0xff] }
 0x171   :  { %3450 = vmatprep.subr.bf16.mxu0 %v9067_v39  ;;  %3614 = vmatprep.subr.bf16.mxu1 %v9069_v45  ;;  %v9117_v39 = vcombine.high %v643_v29, %v647_v31  ;;  %v9123_v45 = vcombine.high %v650_v63, %v654_v37  ;;  %v9122_v51 = vcombine.low %v650_v63, %v654_v37  ;;  %v698_v29 = vld [vmem:[#allocation2 + $0xec0] sm:$0xff]  ;;  %v699_v31 = vld [vmem:[#allocation2 + $0xec8] sm:$0xff] }
 0x172   :  { %v9124_v52 = vcombine.low %v651_v38, %v655_v40 }
 0x174   :  { %3451 = vmatpush1.bf16.msra.mxu0 %v9066_v48  ;;  %3615 = vmatpush1.bf16.msra.mxu1 %v9068_v49  ;;  %v659_v48 = vld [vmem:[#allocation2 + $0xd88] sm:$0xff]  ;;  %v9125_v49 = vcombine.high %v651_v38, %v655_v40  ;;  %v706_v38 = vld [vmem:[#allocation2 + $0xf00] sm:$0xff] }
 0x175   :  { %3452 = vmatprep.subr.bf16.mxu0 %v9075_v50  ;;  %3616 = vmatprep.subr.bf16.mxu1 %v9077_v55  ;;  %v663_v50 = vld [vmem:[#allocation2 + $0xda8] sm:$0xff]  ;;  %v666_v55 = vld [vmem:[#allocation2 + $0xdc0] sm:$0xff] }
 0x176   :  { %v9132_v62 = vcombine.low %v659_v48, %v663_v50  ;;  %v9139_v0 = vcombine.high %v666_v55, %v670_v56  ;;  %v707_v40 = vld [vmem:[#allocation2 + $0xf08] sm:$0xff] }
 0x178   :  { %3453 = vmatpush1.bf16.msra.mxu0 %v9074_v58  ;;  %3617 = vmatpush1.bf16.msra.mxu1 %v9076_v23  ;;  %v667_v58 = vld [vmem:[#allocation2 + $0xdc8] sm:$0xff]  ;;  %v9133_v23 = vcombine.high %v659_v48, %v663_v50  ;;  %v714_v48 = vld [vmem:[#allocation2 + $0xf40] sm:$0xff] }
 0x179   :  { %3463 = vmatprep.subr.bf16.mxu0 %v9083_v60  ;;  %3627 = vmatprep.subr.bf16.mxu1 %v9085_v1  ;;  %v671_v60 = vld [vmem:[#allocation2 + $0xde8] sm:$0xff]  ;;  %v674_v1 = vld [vmem:[#allocation2 + $0xe00] sm:$0xff] }
 0x17a   :  { %v9140_v8 = vcombine.low %v667_v58, %v671_v60  ;;  %v9147_v10 = vcombine.high %v674_v1, %v678_v2  ;;  %v715_v50 = vld [vmem:[#allocation2 + $0xf48] sm:$0xff] }
 0x17b   :  { %3455 = vmatmul.mubr.bf16.vlgmr.msra.gmra.mrb[0].mxu0 %v10993_v4  ;;  %3619 = vmatmul.mubr.bf16.vlgmr.msra.gmra.mrb[0].mxu1 %v10993_v4 }
 0x17c   :  { %3464 = vmatpush1.bf16.msra.mxu0 %v9082_v5  ;;  %3628 = vmatpush1.bf16.msra.mxu1 %v9084_v6  ;;  %v9141_v5 = vcombine.high %v667_v58, %v671_v60  ;;  %v679_v6 = vld [vmem:[#allocation2 + $0xe28] sm:$0xff]  ;;  %v722_v58 = vld [vmem:[#allocation2 + $0xf80] sm:$0xff] }
 0x17d   :  { %3465 = vmatprep.subr.bf16.mxu0 %v9091_v7  ;;  %3629 = vmatprep.subr.bf16.mxu1 %v9093_v12  ;;  %v9138_v7 = vcombine.low %v666_v55, %v670_v56  ;;  %v686_v12 = vld [vmem:[#allocation2 + $0xe60] sm:$0xff]  ;;  %v9148_v18 = vcombine.low %v675_v3, %v679_v6 }
 0x17e   :  { %3495 = vmatprep.mubr.bf16.mxu0 %v10995_v14  ;;  %3659 = vmatprep.mubr.bf16.mxu1 %v10995_v14  ;;  %v9155_v19 = vcombine.high %v682_v11, %v686_v12  ;;  %v726_v60 = vld [vmem:[#allocation2 + $0xfa0] sm:$0xff] }
 0x180   :  { %3466 = vmatpush1.bf16.msra.mxu0 %v9090_v33  ;;  %3630 = vmatpush1.bf16.msra.mxu1 %v9092_v15  ;;  %v9149_v33 = vcombine.high %v675_v3, %v679_v6  ;;  %v687_v15 = vld [vmem:[#allocation2 + $0xe68] sm:$0xff]  ;;  %v734_v6 = vld [vmem:[#allocation2 + $0xfe0] sm:$0xff] }
 0x181   :  { %3467 = vmatprep.subr.bf16.mxu0 %v9099_v17  ;;  %3631 = vmatprep.subr.bf16.mxu1 %v9101_v20  ;;  %v9146_v17 = vcombine.low %v674_v1, %v678_v2  ;;  %v694_v20 = vld [vmem:[#allocation2 + $0xea0] sm:$0xff]  ;;  %v9156_v27 = vcombine.low %v683_v13, %v687_v15  ;;  %v9195_v2 = vcombine.high %v722_v58, %v726_v60 }
 0x182   :  { %v9163_v28 = vcombine.high %v690_v59, %v694_v20 }
 0x184   :  { %3468 = vmatpush1.bf16.msra.mxu0 %v9098_v22  ;;  %3632 = vmatpush1.bf16.msra.mxu1 %v9100_v24  ;;  %v9157_v22 = vcombine.high %v683_v13, %v687_v15  ;;  %v695_v24 = vld [vmem:[#allocation2 + $0xea8] sm:$0xff]  ;;  %v232_v15 = vld [vmem:[#allocation2 + $0x30] sm:$0xff] }
 0x185   :  { %3469 = vmatprep.subr.bf16.mxu0 %v9107_v26  ;;  %3633 = vmatprep.subr.bf16.mxu1 %v9109_v30  ;;  %v9154_v26 = vcombine.low %v682_v11, %v686_v12  ;;  %v702_v30 = vld [vmem:[#allocation2 + $0xee0] sm:$0xff]  ;;  %v9164_v63 = vcombine.low %v691_v21, %v695_v24 }
 0x186   :  { %v9171_v37 = vcombine.high %v698_v29, %v702_v30 }
 0x188   :  { %3470 = vmatpush1.bf16.msra.mxu0 %v9106_v32  ;;  %3634 = vmatpush1.bf16.msra.mxu1 %v9108_v34  ;;  %v9165_v32 = vcombine.high %v691_v21, %v695_v24  ;;  %v703_v34 = vld [vmem:[#allocation2 + $0xee8] sm:$0xff]  ;;  %v240_v24 = vld [vmem:[#allocation2 + $0x70] sm:$0xff] }
 0x189   :  { %3471 = vmatprep.subr.bf16.mxu0 %v9115_v35  ;;  %3635 = vmatprep.subr.bf16.mxu1 %v9117_v39  ;;  %v9162_v35 = vcombine.low %v690_v59, %v694_v20  ;;  %v710_v39 = vld [vmem:[#allocation2 + $0xf20] sm:$0xff]  ;;  %v9172_v46 = vcombine.low %v699_v31, %v703_v34 }
 0x18a   :  { %v9179_v47 = vcombine.high %v706_v38, %v710_v39 }
 0x18c   :  { %3472 = vmatpush1.bf16.msra.mxu0 %v9114_v41  ;;  %3636 = vmatpush1.bf16.msra.mxu1 %v9116_v42  ;;  %v9173_v41 = vcombine.high %v699_v31, %v703_v34  ;;  %v711_v42 = vld [vmem:[#allocation2 + $0xf28] sm:$0xff]  ;;  %v244_v34 = vld [vmem:[#allocation2 + $0x90] sm:$0xff] }
 0x18d   :  { %3473 = vmatprep.subr.bf16.mxu0 %v9123_v45  ;;  %3637 = vmatprep.subr.bf16.mxu1 %v9125_v49  ;;  %v9170_v45 = vcombine.low %v698_v29, %v702_v30  ;;  %v718_v49 = vld [vmem:[#allocation2 + $0xf60] sm:$0xff]  ;;  %v9180_v55 = vcombine.low %v707_v40, %v711_v42 }
 0x18e   :  { %v9187_v56 = vcombine.high %v714_v48, %v718_v49 }
 0x190   :  { %3474 = vmatpush1.bf16.msra.mxu0 %v9122_v51  ;;  %3638 = vmatpush1.bf16.msra.mxu1 %v9124_v52  ;;  %v9181_v51 = vcombine.high %v707_v40, %v711_v42  ;;  %v719_v52 = vld [vmem:[#allocation2 + $0xf68] sm:$0xff]  ;;  %v256_v42 = vld [vmem:[#allocation2 + $0xf0] sm:$0xff] }
 0x191   :  { %3475 = vmatprep.subr.bf16.mxu0 %v9131_v16  ;;  %3639 = vmatprep.subr.bf16.mxu1 %v9133_v23  ;;  %v9178_v16 = vcombine.low %v706_v38, %v710_v39  ;;  %v9189_v23 = vcombine.high %v715_v50, %v719_v52  ;;  %v9188_v1 = vcombine.low %v715_v50, %v719_v52  ;;  %v264_v52 = vld [vmem:[#allocation2 + $0x130] sm:$0xff] }
 0x194   :  { %3476 = vmatpush1.bf16.msra.mxu0 %v9130_v61  ;;  %3640 = vmatpush1.bf16.msra.mxu1 %v9132_v62  ;;  %v723_v61 = vld [vmem:[#allocation2 + $0xf88] sm:$0xff] }
 0x195   :  { %3477 = vmatprep.subr.bf16.mxu0 %v9139_v0  ;;  %3641 = vmatprep.subr.bf16.mxu1 %v9141_v5  ;;  %v727_v62 = vld [vmem:[#allocation2 + $0xfa8] sm:$0xff]  ;;  %v9186_v0 = vcombine.low %v714_v48, %v718_v49  ;;  %v730_v5 = vld [vmem:[#allocation2 + $0xfc0] sm:$0xff] }
 0x196   :  { %v9197_v3 = vcombine.high %v723_v61, %v727_v62  ;;  %v9196_v11 = vcombine.low %v723_v61, %v727_v62  ;;  %v9203_v12 = vcombine.high %v730_v5, %v734_v6  ;;  %v272_v61 = vld [vmem:[#allocation2 + $0x170] sm:$0xff]  ;;  %v269_v62 = vld [vmem:[#allocation2 + $0x158] sm:$0xff] }
 0x198   :  { %3478 = vmatpush1.bf16.msra.mxu0 %v9138_v7  ;;  %3642 = vmatpush1.bf16.msra.mxu1 %v9140_v8  ;;  %v731_v7 = vld [vmem:[#allocation2 + $0xfc8] sm:$0xff] }
 0x199   :  { %3479 = vmatprep.subr.bf16.mxu0 %v9147_v10  ;;  %3643 = vmatprep.subr.bf16.mxu1 %v9149_v33  ;;  %v735_v8 = vld [vmem:[#allocation2 + $0xfe8] sm:$0xff]  ;;  %v9194_v10 = vcombine.low %v722_v58, %v726_v60  ;;  %v228_v33 = vld [vmem:[#allocation2 + $0x10] sm:$0xff] }
 0x19a   :  { %v9205_v13 = vcombine.high %v731_v7, %v735_v8  ;;  %v9204_v59 = vcombine.low %v731_v7, %v735_v8  ;;  %v8703_v20 = vcombine.high %v228_v33, %v232_v15  ;;  %v8702_v29 = vcombine.low %v228_v33, %v232_v15  ;;  %v268_v60 = vld [vmem:[#allocation2 + $0x150] sm:$0xff]  ;;  %v277_v8 = vld [vmem:[#allocation2 + $0x198] sm:$0xff] }
 0x19b   :  { %v280_v7 = vld [vmem:[#allocation2 + $0x1b0] sm:$0xff] }
 0x19c   :  { %3480 = vmatpush1.bf16.msra.mxu0 %v9146_v17  ;;  %3644 = vmatpush1.bf16.msra.mxu1 %v9148_v18  ;;  %v229_v17 = vld [vmem:[#allocation2 + $0x18] sm:$0xff]  ;;  %v284_v15 = vld [vmem:[#allocation2 + $0x1d0] sm:$0xff] }
 0x19d   :  { %3481 = vmatprep.subr.bf16.mxu0 %v9155_v19  ;;  %3645 = vmatprep.subr.bf16.mxu1 %v9157_v22  ;;  %v233_v18 = vld [vmem:[#allocation2 + $0x38] sm:$0xff]  ;;  %v9202_v19 = vcombine.low %v730_v5, %v734_v6  ;;  %v236_v22 = vld [vmem:[#allocation2 + $0x50] sm:$0xff] }
 0x19e   :  { %v8705_v21 = vcombine.high %v229_v17, %v233_v18  ;;  %v8704_v30 = vcombine.low %v229_v17, %v233_v18  ;;  %v8711_v31 = vcombine.high %v236_v22, %v240_v24  ;;  %v276_v6 = vld [vmem:[#allocation2 + $0x190] sm:$0xff]  ;;  %v285_v18 = vld [vmem:[#allocation2 + $0x1d8] sm:$0xff] }
 0x19f   :  { %v288_v17 = vld [vmem:[#allocation2 + $0x1f0] sm:$0xff] }
 0x1a0   :  { %3482 = vmatpush1.bf16.msra.mxu0 %v9154_v26  ;;  %3646 = vmatpush1.bf16.msra.mxu1 %v9156_v27  ;;  %v11003_v26 = vpack.c.bf16 %v10987_v57, %v10987_v57  ;;  %v237_v27 = vld [vmem:[#allocation2 + $0x58] sm:$0xff]  ;;  %v8710_v57 = vcombine.low %v236_v22, %v240_v24  ;;  %v292_v24 = vld [vmem:[#allocation2 + $0x210] sm:$0xff] }
 0x1a1   :  { %3483 = vmatprep.subr.bf16.mxu0 %v9163_v28  ;;  %3647 = vmatprep.subr.bf16.mxu1 %v9165_v32  ;;  %v241_v28 = vld [vmem:[#allocation2 + $0x78] sm:$0xff] }
 0x1a2   :  { %v8713_v32 = vcombine.high %v237_v27, %v241_v28  ;;  %v8712_v38 = vcombine.low %v237_v27, %v241_v28  ;;  %v296_v27 = vld [vmem:[#allocation2 + $0x230] sm:$0xff]  ;;  %v293_v28 = vld [vmem:[#allocation2 + $0x218] sm:$0xff] }
 0x1a4   :  { %3484 = vmatpush1.bf16.msra.mxu0 %v9162_v35  ;;  %3648 = vmatpush1.bf16.msra.mxu1 %v9164_v63  ;;  %v248_v35 = vld [vmem:[#allocation2 + $0xb0] sm:$0xff]  ;;  %v245_v63 = vld [vmem:[#allocation2 + $0x98] sm:$0xff] }
 0x1a5   :  { %3485 = vmatprep.subr.bf16.mxu0 %v9171_v37  ;;  %3649 = vmatprep.subr.bf16.mxu1 %v9173_v41  ;;  %v249_v37 = vld [vmem:[#allocation2 + $0xb8] sm:$0xff]  ;;  %v8719_v39 = vcombine.high %v244_v34, %v248_v35  ;;  %v252_v41 = vld [vmem:[#allocation2 + $0xd0] sm:$0xff] }
 0x1a6   :  { %v8721_v40 = vcombine.high %v245_v63, %v249_v37  ;;  %v8720_v48 = vcombine.low %v245_v63, %v249_v37  ;;  %v8727_v49 = vcombine.high %v252_v41, %v256_v42  ;;  %v304_v63 = vld [vmem:[#allocation2 + $0x270] sm:$0xff]  ;;  %v301_v37 = vld [vmem:[#allocation2 + $0x258] sm:$0xff] }
 0x1a8   :  { %3486 = vmatpush1.bf16.msra.mxu0 %v9170_v45  ;;  %3650 = vmatpush1.bf16.msra.mxu1 %v9172_v46  ;;  %v253_v45 = vld [vmem:[#allocation2 + $0xd8] sm:$0xff] }
 0x1a9   :  { %3487 = vmatprep.subr.bf16.mxu0 %v9179_v47  ;;  %3651 = vmatprep.subr.bf16.mxu1 %v9181_v51  ;;  %v257_v46 = vld [vmem:[#allocation2 + $0xf8] sm:$0xff]  ;;  %v8718_v47 = vcombine.low %v244_v34, %v248_v35  ;;  %v260_v51 = vld [vmem:[#allocation2 + $0x110] sm:$0xff] }
 0x1aa   :  { %v8729_v50 = vcombine.high %v253_v45, %v257_v46  ;;  %v8728_v58 = vcombine.low %v253_v45, %v257_v46  ;;  %v300_v35 = vld [vmem:[#allocation2 + $0x250] sm:$0xff]  ;;  %v309_v46 = vld [vmem:[#allocation2 + $0x298] sm:$0xff] }
 0x1ab   :  { %v312_v45 = vld [vmem:[#allocation2 + $0x2b0] sm:$0xff] }
 0x1ac   :  { %3488 = vmatpush1.bf16.msra.mxu0 %v9178_v16  ;;  %3652 = vmatpush1.bf16.msra.mxu1 %v9180_v55  ;;  %v261_v16 = vld [vmem:[#allocation2 + $0x118] sm:$0xff] }
 0x1ad   :  { %3489 = vmatprep.subr.bf16.mxu0 %v9187_v56  ;;  %3653 = vmatprep.subr.bf16.mxu1 %v9189_v23  ;;  %v265_v55 = vld [vmem:[#allocation2 + $0x138] sm:$0xff]  ;;  %v8726_v56 = vcombine.low %v252_v41, %v256_v42  ;;  %v8735_v23 = vcombine.high %v260_v51, %v264_v52  ;;  %v308_v42 = vld [vmem:[#allocation2 + $0x290] sm:$0xff] }
 0x1b0   :  { %3490 = vmatpush1.bf16.msra.mxu0 %v9186_v0  ;;  %3654 = vmatpush1.bf16.msra.mxu1 %v9188_v1  ;;  %v273_v0 = vld [vmem:[#allocation2 + $0x178] sm:$0xff]  ;;  %v8734_v1 = vcombine.low %v260_v51, %v264_v52  ;;  %v316_v52 = vld [vmem:[#allocation2 + $0x2d0] sm:$0xff] }
 0x1b1   :  { %3491 = vmatprep.subr.bf16.mxu0 %v9195_v2  ;;  %3655 = vmatprep.subr.bf16.mxu1 %v9197_v3  ;;  %v8736_v2 = vcombine.low %v261_v16, %v265_v55  ;;  %v8743_v3 = vcombine.high %v268_v60, %v272_v61  ;;  %v8745_v5 = vcombine.high %v269_v62, %v273_v0 }
 0x1b4   :  { %3492 = vmatpush1.bf16.msra.mxu0 %v9194_v10  ;;  %3656 = vmatpush1.bf16.msra.mxu1 %v9196_v11  ;;  %v281_v10 = vld [vmem:[#allocation2 + $0x1b8] sm:$0xff]  ;;  %v8742_v11 = vcombine.low %v268_v60, %v272_v61  ;;  %v324_v61 = vld [vmem:[#allocation2 + $0x310] sm:$0xff] }
 0x1b5   :  { %3493 = vmatprep.subr.bf16.mxu0 %v9203_v12  ;;  %3657 = vmatprep.subr.bf16.mxu1 %v9205_v13  ;;  %v8744_v12 = vcombine.low %v269_v62, %v273_v0  ;;  %v8751_v13 = vcombine.high %v276_v6, %v280_v7  ;;  %v8753_v33 = vcombine.high %v277_v8, %v281_v10  ;;  %v328_v62 = vld [vmem:[#allocation2 + $0x330] sm:$0xff]  ;;  %v325_v0 = vld [vmem:[#allocation2 + $0x318] sm:$0xff] }
 0x1b8   :  { %3494 = vmatpush1.bf16.msra.mxu0 %v9202_v19  ;;  %3658 = vmatpush1.bf16.msra.mxu1 %v9204_v59  ;;  %v289_v19 = vld [vmem:[#allocation2 + $0x1f8] sm:$0xff]  ;;  %v8750_v59 = vcombine.low %v276_v6, %v280_v7  ;;  %v332_v7 = vld [vmem:[#allocation2 + $0x350] sm:$0xff] }
 0x1b9   :  { %3668 = vmatprep.subr.bf16.mxu0 %v8703_v20  ;;  %3832 = vmatprep.subr.bf16.mxu1 %v8705_v21  ;;  %v8752_v20 = vcombine.low %v277_v8, %v281_v10  ;;  %v8759_v21 = vcombine.high %v284_v15, %v288_v17  ;;  %v8761_v22 = vcombine.high %v285_v18, %v289_v19  ;;  %v336_v8 = vld [vmem:[#allocation2 + $0x370] sm:$0xff]  ;;  %v333_v10 = vld [vmem:[#allocation2 + $0x358] sm:$0xff] }
 0x1bb   :  { %3496 = vmatmul.mubr.bf16.vlgmr.msra.gmra.mrb[0].mxu0 %v11003_v26  ;;  %3660 = vmatmul.mubr.bf16.vlgmr.msra.gmra.mrb[0].mxu1 %v11003_v26 }
 0x1bc   :  { %3669 = vmatpush1.bf16.msra.mxu0 %v8702_v29  ;;  %3833 = vmatpush1.bf16.msra.mxu1 %v8704_v30  ;;  %v297_v29 = vld [vmem:[#allocation2 + $0x238] sm:$0xff]  ;;  %v8758_v30 = vcombine.low %v284_v15, %v288_v17  ;;  %v340_v17 = vld [vmem:[#allocation2 + $0x390] sm:$0xff] }
 0x1bd   :  { %3670 = vmatprep.subr.bf16.mxu0 %v8711_v31  ;;  %3834 = vmatprep.subr.bf16.mxu1 %v8713_v32  ;;  %v8760_v31 = vcombine.low %v285_v18, %v289_v19  ;;  %v8767_v32 = vcombine.high %v292_v24, %v296_v27  ;;  %v8769_v34 = vcombine.high %v293_v28, %v297_v29  ;;  %v344_v18 = vld [vmem:[#allocation2 + $0x3b0] sm:$0xff]  ;;  %v341_v19 = vld [vmem:[#allocation2 + $0x398] sm:$0xff] }
 0x1be   :  { %3700 = vmatprep.mubr.bf16.mxu0 %v10942_v9  ;;  %3864 = vmatprep.mubr.bf16.mxu1 %v10942_v9  ;;  %v8737_v9 = vcombine.high %v261_v16, %v265_v55  ;;  %v320_v16 = vld [vmem:[#allocation2 + $0x2f0] sm:$0xff]  ;;  %v317_v55 = vld [vmem:[#allocation2 + $0x2d8] sm:$0xff] }
 0x1c0   :  { %3671 = vmatpush1.bf16.msra.mxu0 %v8710_v57  ;;  %3835 = vmatpush1.bf16.msra.mxu1 %v8712_v38  ;;  %v305_v57 = vld [vmem:[#allocation2 + $0x278] sm:$0xff]  ;;  %v8766_v38 = vcombine.low %v292_v24, %v296_v27  ;;  %v348_v27 = vld [vmem:[#allocation2 + $0x3d0] sm:$0xff] }
 0x1c1   :  { %3672 = vmatprep.subr.bf16.mxu0 %v8719_v39  ;;  %3836 = vmatprep.subr.bf16.mxu1 %v8721_v40  ;;  %v8768_v39 = vcombine.low %v293_v28, %v297_v29  ;;  %v8775_v40 = vcombine.high %v300_v35, %v304_v63  ;;  %v8777_v41 = vcombine.high %v301_v37, %v305_v57  ;;  %v352_v28 = vld [vmem:[#allocation2 + $0x3f0] sm:$0xff]  ;;  %v349_v29 = vld [vmem:[#allocation2 + $0x3d8] sm:$0xff] }
 0x1c4   :  { %3673 = vmatpush1.bf16.msra.mxu0 %v8718_v47  ;;  %3837 = vmatpush1.bf16.msra.mxu1 %v8720_v48  ;;  %v313_v47 = vld [vmem:[#allocation2 + $0x2b8] sm:$0xff]  ;;  %v8774_v48 = vcombine.low %v300_v35, %v304_v63  ;;  %v356_v63 = vld [vmem:[#allocation2 + $0x410] sm:$0xff] }
 0x1c5   :  { %3674 = vmatprep.subr.bf16.mxu0 %v8727_v49  ;;  %3838 = vmatprep.subr.bf16.mxu1 %v8729_v50  ;;  %v8776_v49 = vcombine.low %v301_v37, %v305_v57  ;;  %v8783_v50 = vcombine.high %v308_v42, %v312_v45  ;;  %v8785_v51 = vcombine.high %v309_v46, %v313_v47  ;;  %v360_v37 = vld [vmem:[#allocation2 + $0x430] sm:$0xff]  ;;  %v357_v57 = vld [vmem:[#allocation2 + $0x418] sm:$0xff] }
 0x1c8   :  { %3675 = vmatpush1.bf16.msra.mxu0 %v8726_v56  ;;  %3839 = vmatpush1.bf16.msra.mxu1 %v8728_v58  ;;  %v321_v56 = vld [vmem:[#allocation2 + $0x2f8] sm:$0xff]  ;;  %v8782_v58 = vcombine.low %v308_v42, %v312_v45  ;;  %v364_v45 = vld [vmem:[#allocation2 + $0x450] sm:$0xff] }
 0x1c9   :  { %3676 = vmatprep.subr.bf16.mxu0 %v8735_v23  ;;  %3840 = vmatprep.subr.bf16.mxu1 %v8737_v9  ;;  %v8784_v23 = vcombine.low %v309_v46, %v313_v47  ;;  %v8791_v9 = vcombine.high %v316_v52, %v320_v16  ;;  %v8793_v60 = vcombine.high %v317_v55, %v321_v56  ;;  %v368_v46 = vld [vmem:[#allocation2 + $0x470] sm:$0xff]  ;;  %v365_v47 = vld [vmem:[#allocation2 + $0x458] sm:$0xff] }
 0x1cc   :  { %3677 = vmatpush1.bf16.msra.mxu0 %v8734_v1  ;;  %3841 = vmatpush1.bf16.msra.mxu1 %v8736_v2  ;;  %v329_v1 = vld [vmem:[#allocation2 + $0x338] sm:$0xff]  ;;  %v8790_v2 = vcombine.low %v316_v52, %v320_v16  ;;  %v372_v16 = vld [vmem:[#allocation2 + $0x490] sm:$0xff] }
 0x1cd   :  { %3678 = vmatprep.subr.bf16.mxu0 %v8743_v3  ;;  %3842 = vmatprep.subr.bf16.mxu1 %v8745_v5  ;;  %v8792_v3 = vcombine.low %v317_v55, %v321_v56  ;;  %v8799_v5 = vcombine.high %v324_v61, %v328_v62  ;;  %v8801_v6 = vcombine.high %v325_v0, %v329_v1  ;;  %v376_v55 = vld [vmem:[#allocation2 + $0x4b0] sm:$0xff]  ;;  %v373_v56 = vld [vmem:[#allocation2 + $0x498] sm:$0xff] }
 0x1d0   :  { %3679 = vmatpush1.bf16.msra.mxu0 %v8742_v11  ;;  %3843 = vmatpush1.bf16.msra.mxu1 %v8744_v12  ;;  %v337_v11 = vld [vmem:[#allocation2 + $0x378] sm:$0xff]  ;;  %v8798_v12 = vcombine.low %v324_v61, %v328_v62  ;;  %v380_v62 = vld [vmem:[#allocation2 + $0x4d0] sm:$0xff] }
 0x1d1   :  { %3680 = vmatprep.subr.bf16.mxu0 %v8751_v13  ;;  %3844 = vmatprep.subr.bf16.mxu1 %v8753_v33  ;;  %v8800_v13 = vcombine.low %v325_v0, %v329_v1  ;;  %v8807_v33 = vcombine.high %v332_v7, %v336_v8  ;;  %v8809_v15 = vcombine.high %v333_v10, %v337_v11  ;;  %v384_v0 = vld [vmem:[#allocation2 + $0x4f0] sm:$0xff]  ;;  %v381_v1 = vld [vmem:[#allocation2 + $0x4d8] sm:$0xff] }
 0x1d4   :  { %3681 = vmatpush1.bf16.msra.mxu0 %v8750_v59  ;;  %3845 = vmatpush1.bf16.msra.mxu1 %v8752_v20  ;;  %v345_v59 = vld [vmem:[#allocation2 + $0x3b8] sm:$0xff]  ;;  %v8806_v20 = vcombine.low %v332_v7, %v336_v8  ;;  %v388_v7 = vld [vmem:[#allocation2 + $0x510] sm:$0xff] }
 0x1d5   :  { %3682 = vmatprep.subr.bf16.mxu0 %v8759_v21  ;;  %3846 = vmatprep.subr.bf16.mxu1 %v8761_v22  ;;  %v8808_v21 = vcombine.low %v333_v10, %v337_v11  ;;  %v8815_v22 = vcombine.high %v340_v17, %v344_v18  ;;  %v8817_v24 = vcombine.high %v341_v19, %v345_v59  ;;  %v392_v8 = vld [vmem:[#allocation2 + $0x530] sm:$0xff]  ;;  %v389_v10 = vld [vmem:[#allocation2 + $0x518] sm:$0xff] }
 0x1d6   :  { %v393_v11 = vld [vmem:[#allocation2 + $0x538] sm:$0xff] }
 0x1d8   :  { %3683 = vmatpush1.bf16.msra.mxu0 %v8758_v30  ;;  %3847 = vmatpush1.bf16.msra.mxu1 %v8760_v31  ;;  %v353_v30 = vld [vmem:[#allocation2 + $0x3f8] sm:$0xff]  ;;  %v8814_v31 = vcombine.low %v340_v17, %v344_v18  ;;  %v400_v17 = vld [vmem:[#allocation2 + $0x570] sm:$0xff] }
 0x1d9   :  { %3684 = vmatprep.subr.bf16.mxu0 %v8767_v32  ;;  %3848 = vmatprep.subr.bf16.mxu1 %v8769_v34  ;;  %v8816_v32 = vcombine.low %v341_v19, %v345_v59  ;;  %v8823_v34 = vcombine.high %v348_v27, %v352_v28  ;;  %v8825_v35 = vcombine.high %v349_v29, %v353_v30  ;;  %v397_v18 = vld [vmem:[#allocation2 + $0x558] sm:$0xff] }
 0x1da   :  { %v401_v19 = vld [vmem:[#allocation2 + $0x578] sm:$0xff]  ;;  %v8862_v59 = vcombine.low %v388_v7, %v392_v8 }
 0x1dc   :  { %3685 = vmatpush1.bf16.msra.mxu0 %v8766_v38  ;;  %3849 = vmatpush1.bf16.msra.mxu1 %v8768_v39  ;;  %v361_v38 = vld [vmem:[#allocation2 + $0x438] sm:$0xff]  ;;  %v8822_v39 = vcombine.low %v348_v27, %v352_v28  ;;  %v408_v27 = vld [vmem:[#allocation2 + $0x5b0] sm:$0xff] }
 0x1dd   :  { %3686 = vmatprep.subr.bf16.mxu0 %v8775_v40  ;;  %3850 = vmatprep.subr.bf16.mxu1 %v8777_v41  ;;  %v8824_v40 = vcombine.low %v349_v29, %v353_v30  ;;  %v8831_v41 = vcombine.high %v356_v63, %v360_v37  ;;  %v8833_v42 = vcombine.high %v357_v57, %v361_v38  ;;  %v405_v28 = vld [vmem:[#allocation2 + $0x598] sm:$0xff] }
 0x1de   :  { %v409_v29 = vld [vmem:[#allocation2 + $0x5b8] sm:$0xff] }
 0x1e0   :  { %3687 = vmatpush1.bf16.msra.mxu0 %v8774_v48  ;;  %3851 = vmatpush1.bf16.msra.mxu1 %v8776_v49  ;;  %v369_v48 = vld [vmem:[#allocation2 + $0x478] sm:$0xff]  ;;  %v8830_v49 = vcombine.low %v356_v63, %v360_v37  ;;  %v416_v63 = vld [vmem:[#allocation2 + $0x5f0] sm:$0xff] }
 0x1e1   :  { %3688 = vmatprep.subr.bf16.mxu0 %v8783_v50  ;;  %3852 = vmatprep.subr.bf16.mxu1 %v8785_v51  ;;  %v8832_v50 = vcombine.low %v357_v57, %v361_v38  ;;  %v8839_v51 = vcombine.high %v364_v45, %v368_v46  ;;  %v8841_v52 = vcombine.high %v365_v47, %v369_v48  ;;  %v413_v37 = vld [vmem:[#allocation2 + $0x5d8] sm:$0xff] }
 0x1e2   :  { %v417_v57 = vld [vmem:[#allocation2 + $0x5f8] sm:$0xff] }
 0x1e4   :  { %3689 = vmatpush1.bf16.msra.mxu0 %v8782_v58  ;;  %3853 = vmatpush1.bf16.msra.mxu1 %v8784_v23  ;;  %v377_v58 = vld [vmem:[#allocation2 + $0x4b8] sm:$0xff]  ;;  %v8838_v23 = vcombine.low %v364_v45, %v368_v46  ;;  %v424_v45 = vld [vmem:[#allocation2 + $0x630] sm:$0xff] }
 0x1e5   :  { %3690 = vmatprep.subr.bf16.mxu0 %v8791_v9  ;;  %3854 = vmatprep.subr.bf16.mxu1 %v8793_v60  ;;  %v8840_v9 = vcombine.low %v365_v47, %v369_v48  ;;  %v8847_v60 = vcombine.high %v372_v16, %v376_v55  ;;  %v8849_v61 = vcombine.high %v373_v56, %v377_v58  ;;  %v421_v46 = vld [vmem:[#allocation2 + $0x618] sm:$0xff] }
 0x1e6   :  { %v425_v47 = vld [vmem:[#allocation2 + $0x638] sm:$0xff] }
 0x1e8   :  { %3691 = vmatpush1.bf16.msra.mxu0 %v8790_v2  ;;  %3855 = vmatpush1.bf16.msra.mxu1 %v8792_v3  ;;  %v385_v2 = vld [vmem:[#allocation2 + $0x4f8] sm:$0xff]  ;;  %v8846_v3 = vcombine.low %v372_v16, %v376_v55  ;;  %v432_v16 = vld [vmem:[#allocation2 + $0x670] sm:$0xff] }
 0x1e9   :  { %3692 = vmatprep.subr.bf16.mxu0 %v8799_v5  ;;  %3856 = vmatprep.subr.bf16.mxu1 %v8801_v6  ;;  %v8855_v5 = vcombine.high %v380_v62, %v384_v0  ;;  %v8857_v6 = vcombine.high %v381_v1, %v385_v2  ;;  %v429_v55 = vld [vmem:[#allocation2 + $0x658] sm:$0xff] }
 0x1ec   :  { %3693 = vmatpush1.bf16.msra.mxu0 %v8798_v12  ;;  %3857 = vmatpush1.bf16.msra.mxu1 %v8800_v13  ;;  %v8854_v12 = vcombine.low %v380_v62, %v384_v0  ;;  %v8856_v13 = vcombine.low %v381_v1, %v385_v2  ;;  %v440_v62 = vld [vmem:[#allocation2 + $0x6b0] sm:$0xff]  ;;  %v437_v0 = vld [vmem:[#allocation2 + $0x698] sm:$0xff] }
 0x1ed   :  { %3694 = vmatprep.subr.bf16.mxu0 %v8807_v33  ;;  %3858 = vmatprep.subr.bf16.mxu1 %v8809_v15  ;;  %v8863_v33 = vcombine.high %v388_v7, %v392_v8  ;;  %v396_v15 = vld [vmem:[#allocation2 + $0x550] sm:$0xff]  ;;  %v441_v1 = vld [vmem:[#allocation2 + $0x6b8] sm:$0xff] }
 0x1ee   :  { %v8870_v30 = vcombine.low %v396_v15, %v400_v17  ;;  %v448_v7 = vld [vmem:[#allocation2 + $0x6f0] sm:$0xff]  ;;  %v445_v8 = vld [vmem:[#allocation2 + $0x6d8] sm:$0xff] }
 0x1f0   :  { %3695 = vmatpush1.bf16.msra.mxu0 %v8806_v20  ;;  %3859 = vmatpush1.bf16.msra.mxu1 %v8808_v21  ;;  %v8864_v20 = vcombine.low %v389_v10, %v393_v11  ;;  %v8871_v21 = vcombine.high %v396_v15, %v400_v17  ;;  %v456_v15 = vld [vmem:[#allocation2 + $0x730] sm:$0xff]  ;;  %v453_v17 = vld [vmem:[#allocation2 + $0x718] sm:$0xff] }
 0x1f1   :  { %3696 = vmatprep.subr.bf16.mxu0 %v8815_v22  ;;  %3860 = vmatprep.subr.bf16.mxu1 %v8817_v24  ;;  %v8873_v22 = vcombine.high %v397_v18, %v401_v19  ;;  %v404_v24 = vld [vmem:[#allocation2 + $0x590] sm:$0xff] }
 0x1f2   :  { %v8878_v38 = vcombine.low %v404_v24, %v408_v27 }
 0x1f4   :  { %3697 = vmatpush1.bf16.msra.mxu0 %v8814_v31  ;;  %3861 = vmatpush1.bf16.msra.mxu1 %v8816_v32  ;;  %v8872_v31 = vcombine.low %v397_v18, %v401_v19  ;;  %v8879_v32 = vcombine.high %v404_v24, %v408_v27  ;;  %v457_v18 = vld [vmem:[#allocation2 + $0x738] sm:$0xff]  ;;  %v464_v24 = vld [vmem:[#allocation2 + $0x770] sm:$0xff] }
 0x1f5   :  { %3698 = vmatprep.subr.bf16.mxu0 %v8823_v34  ;;  %3862 = vmatprep.subr.bf16.mxu1 %v8825_v35  ;;  %v8881_v34 = vcombine.high %v405_v28, %v409_v29  ;;  %v412_v35 = vld [vmem:[#allocation2 + $0x5d0] sm:$0xff]  ;;  %v461_v27 = vld [vmem:[#allocation2 + $0x758] sm:$0xff] }
 0x1f6   :  { %v8886_v48 = vcombine.low %v412_v35, %v416_v63 }
 0x1f8   :  { %3699 = vmatpush1.bf16.msra.mxu0 %v8822_v39  ;;  %3863 = vmatpush1.bf16.msra.mxu1 %v8824_v40  ;;  %v8880_v39 = vcombine.low %v405_v28, %v409_v29  ;;  %v8887_v40 = vcombine.high %v412_v35, %v416_v63  ;;  %v465_v28 = vld [vmem:[#allocation2 + $0x778] sm:$0xff]  ;;  %v472_v35 = vld [vmem:[#allocation2 + $0x7b0] sm:$0xff] }
 0x1f9   :  { %3709 = vmatprep.subr.bf16.mxu0 %v8831_v41  ;;  %3873 = vmatprep.subr.bf16.mxu1 %v8833_v42  ;;  %v8889_v41 = vcombine.high %v413_v37, %v417_v57  ;;  %v420_v42 = vld [vmem:[#allocation2 + $0x610] sm:$0xff]  ;;  %v469_v63 = vld [vmem:[#allocation2 + $0x798] sm:$0xff] }
 0x1fb   :  { %3701 = vmatmul.mubr.bf16.vlgmr.msra.gmra.mrb[4].mxu0 %v10955_v25  ;;  %3865 = vmatmul.mubr.bf16.vlgmr.msra.gmra.mrb[4].mxu1 %v10955_v25  ;;  %v8848_v25 = vcombine.low %v373_v56, %v377_v58  ;;  %v433_v56 = vld [vmem:[#allocation2 + $0x678] sm:$0xff]  ;;  %v8894_v58 = vcombine.low %v420_v42, %v424_v45 }
 0x1fc   :  { %3710 = vmatpush1.bf16.msra.mxu0 %v8830_v49  ;;  %3874 = vmatpush1.bf16.msra.mxu1 %v8832_v50  ;;  %v8888_v49 = vcombine.low %v413_v37, %v417_v57  ;;  %v8895_v50 = vcombine.high %v420_v42, %v424_v45  ;;  %v473_v37 = vld [vmem:[#allocation2 + $0x7b8] sm:$0xff]  ;;  %v480_v42 = vld [vmem:[#allocation2 + $0x7f0] sm:$0xff] }
 0x1fd   :  { %3711 = vmatprep.subr.bf16.mxu0 %v8839_v51  ;;  %3875 = vmatprep.subr.bf16.mxu1 %v8841_v52  ;;  %v8897_v51 = vcombine.high %v421_v46, %v425_v47  ;;  %v428_v52 = vld [vmem:[#allocation2 + $0x650] sm:$0xff]  ;;  %v477_v45 = vld [vmem:[#allocation2 + $0x7d8] sm:$0xff] }
 0x1fe   :  { %3741 = vmatprep.mubr.bf16.mxu0 %v10957_v36  ;;  %3905 = vmatprep.mubr.bf16.mxu1 %v10957_v36  ;;  %v8865_v36 = vcombine.high %v389_v10, %v393_v11  ;;  %v8902_v2 = vcombine.low %v428_v52, %v432_v16  ;;  %v449_v10 = vld [vmem:[#allocation2 + $0x6f8] sm:$0xff] }
 0x200   :  { %3712 = vmatpush1.bf16.msra.mxu0 %v8838_v23  ;;  %3876 = vmatpush1.bf16.msra.mxu1 %v8840_v9  ;;  %v8896_v23 = vcombine.low %v421_v46, %v425_v47  ;;  %v8903_v9 = vcombine.high %v428_v52, %v432_v16  ;;  %v481_v46 = vld [vmem:[#allocation2 + $0x7f8] sm:$0xff]  ;;  %v488_v52 = vld [vmem:[#allocation2 + $0x830] sm:$0xff] }
 0x201   :  { %3713 = vmatprep.subr.bf16.mxu0 %v8847_v60  ;;  %3877 = vmatprep.subr.bf16.mxu1 %v8849_v61  ;;  %v8905_v60 = vcombine.high %v429_v55, %v433_v56  ;;  %v436_v61 = vld [vmem:[#allocation2 + $0x690] sm:$0xff]  ;;  %v485_v16 = vld [vmem:[#allocation2 + $0x818] sm:$0xff] }
 0x202   :  { %v8910_v11 = vcombine.low %v436_v61, %v440_v62 }
 0x204   :  { %3714 = vmatpush1.bf16.msra.mxu0 %v8846_v3  ;;  %3878 = vmatpush1.bf16.msra.mxu1 %v8848_v25  ;;  %v8904_v3 = vcombine.low %v429_v55, %v433_v56  ;;  %v8911_v25 = vcombine.high %v436_v61, %v440_v62  ;;  %v489_v55 = vld [vmem:[#allocation2 + $0x838] sm:$0xff]  ;;  %v496_v61 = vld [vmem:[#allocation2 + $0x870] sm:$0xff] }
 0x205   :  { %3715 = vmatprep.subr.bf16.mxu0 %v8855_v5  ;;  %3879 = vmatprep.subr.bf16.mxu1 %v8857_v6  ;;  %v8913_v5 = vcombine.high %v437_v0, %v441_v1  ;;  %v444_v6 = vld [vmem:[#allocation2 + $0x6d0] sm:$0xff]  ;;  %v493_v62 = vld [vmem:[#allocation2 + $0x858] sm:$0xff] }
 0x206   :  { %v8918_v19 = vcombine.low %v444_v6, %v448_v7 }
 0x208   :  { %3716 = vmatpush1.bf16.msra.mxu0 %v8854_v12  ;;  %3880 = vmatpush1.bf16.msra.mxu1 %v8856_v13  ;;  %v8912_v12 = vcombine.low %v437_v0, %v441_v1  ;;  %v8919_v13 = vcombine.high %v444_v6, %v448_v7  ;;  %v497_v0 = vld [vmem:[#allocation2 + $0x878] sm:$0xff]  ;;  %v504_v6 = vld [vmem:[#allocation2 + $0x8b0] sm:$0xff] }
 0x209   :  { %3717 = vmatprep.subr.bf16.mxu0 %v8863_v33  ;;  %3881 = vmatprep.subr.bf16.mxu1 %v8865_v36  ;;  %v8921_v33 = vcombine.high %v445_v8, %v449_v10  ;;  %v452_v36 = vld [vmem:[#allocation2 + $0x710] sm:$0xff]  ;;  %v501_v7 = vld [vmem:[#allocation2 + $0x898] sm:$0xff] }
 0x20a   :  { %v8926_v29 = vcombine.low %v452_v36, %v456_v15 }
 0x20c   :  { %3718 = vmatpush1.bf16.msra.mxu0 %v8862_v59  ;;  %3882 = vmatpush1.bf16.msra.mxu1 %v8864_v20  ;;  %v8920_v59 = vcombine.low %v445_v8, %v449_v10  ;;  %v8927_v20 = vcombine.high %v452_v36, %v456_v15  ;;  %v505_v8 = vld [vmem:[#allocation2 + $0x8b8] sm:$0xff]  ;;  %v512_v36 = vld [vmem:[#allocation2 + $0x8f0] sm:$0xff] }
 0x20d   :  { %3719 = vmatprep.subr.bf16.mxu0 %v8871_v21  ;;  %3883 = vmatprep.subr.bf16.mxu1 %v8873_v22  ;;  %v8929_v21 = vcombine.high %v453_v17, %v457_v18  ;;  %v460_v22 = vld [vmem:[#allocation2 + $0x750] sm:$0xff]  ;;  %v509_v15 = vld [vmem:[#allocation2 + $0x8d8] sm:$0xff] }
 0x20e   :  { %v8934_v57 = vcombine.low %v460_v22, %v464_v24 }
 0x210   :  { %3720 = vmatpush1.bf16.msra.mxu0 %v8870_v30  ;;  %3884 = vmatpush1.bf16.msra.mxu1 %v8872_v31  ;;  %v8928_v30 = vcombine.low %v453_v17, %v457_v18  ;;  %v8935_v31 = vcombine.high %v460_v22, %v464_v24  ;;  %v513_v17 = vld [vmem:[#allocation2 + $0x8f8] sm:$0xff] }
 0x211   :  { %3721 = vmatprep.subr.bf16.mxu0 %v8879_v32  ;;  %3885 = vmatprep.subr.bf16.mxu1 %v8881_v34  ;;  %v8937_v32 = vcombine.high %v461_v27, %v465_v28  ;;  %v468_v34 = vld [vmem:[#allocation2 + $0x790] sm:$0xff]  ;;  %v517_v22 = vld [vmem:[#allocation2 + $0x918] sm:$0xff] }
 0x212   :  { %v8942_v47 = vcombine.low %v468_v34, %v472_v35  ;;  %v521_v24 = vld [vmem:[#allocation2 + $0x938] sm:$0xff] }
 0x214   :  { %3722 = vmatpush1.bf16.msra.mxu0 %v8878_v38  ;;  %3886 = vmatpush1.bf16.msra.mxu1 %v8880_v39  ;;  %v8936_v38 = vcombine.low %v461_v27, %v465_v28  ;;  %v8943_v39 = vcombine.high %v468_v34, %v472_v35  ;;  %v8984_v28 = vcombine.low %v509_v15, %v513_v17  ;;  %v529_v34 = vld [vmem:[#allocation2 + $0x978] sm:$0xff] }
 0x215   :  { %3723 = vmatprep.subr.bf16.mxu0 %v8887_v40  ;;  %3887 = vmatprep.subr.bf16.mxu1 %v8889_v41  ;;  %v8945_v40 = vcombine.high %v469_v63, %v473_v37  ;;  %v476_v41 = vld [vmem:[#allocation2 + $0x7d0] sm:$0xff] }
 0x216   :  { %v8950_v56 = vcombine.low %v476_v41, %v480_v42 }
 0x218   :  { %3724 = vmatpush1.bf16.msra.mxu0 %v8886_v48  ;;  %3888 = vmatpush1.bf16.msra.mxu1 %v8888_v49  ;;  %v8944_v48 = vcombine.low %v469_v63, %v473_v37  ;;  %v8951_v49 = vcombine.high %v476_v41, %v480_v42  ;;  %v8992_v63 = vcombine.low %v517_v22, %v521_v24  ;;  %v537_v41 = vld [vmem:[#allocation2 + $0x9b8] sm:$0xff] }
 0x219   :  { %3725 = vmatprep.subr.bf16.mxu0 %v8895_v50  ;;  %3889 = vmatprep.subr.bf16.mxu1 %v8897_v51  ;;  %v8953_v50 = vcombine.high %v477_v45, %v481_v46  ;;  %v484_v51 = vld [vmem:[#allocation2 + $0x810] sm:$0xff] }
 0x21a   :  { %v8958_v1 = vcombine.low %v484_v51, %v488_v52 }
 0x21c   :  { %3726 = vmatpush1.bf16.msra.mxu0 %v8894_v58  ;;  %3890 = vmatpush1.bf16.msra.mxu1 %v8896_v23  ;;  %v8952_v58 = vcombine.low %v477_v45, %v481_v46  ;;  %v8959_v23 = vcombine.high %v484_v51, %v488_v52  ;;  %v545_v51 = vld [vmem:[#allocation2 + $0x9f8] sm:$0xff] }
 0x21d   :  { %3727 = vmatprep.subr.bf16.mxu0 %v8903_v9  ;;  %3891 = vmatprep.subr.bf16.mxu1 %v8905_v60  ;;  %v8961_v9 = vcombine.high %v485_v16, %v489_v55  ;;  %v492_v60 = vld [vmem:[#allocation2 + $0x850] sm:$0xff] }
 0x21e   :  { %v8966_v10 = vcombine.low %v492_v60, %v496_v61 }
 0x220   :  { %3728 = vmatpush1.bf16.msra.mxu0 %v8902_v2  ;;  %3892 = vmatpush1.bf16.msra.mxu1 %v8904_v3  ;;  %v8960_v2 = vcombine.low %v485_v16, %v489_v55  ;;  %v8967_v3 = vcombine.high %v492_v60, %v496_v61  ;;  %v553_v60 = vld [vmem:[#allocation2 + $0xa38] sm:$0xff] }
 0x221   :  { %3729 = vmatprep.subr.bf16.mxu0 %v8911_v25  ;;  %3893 = vmatprep.subr.bf16.mxu1 %v8913_v5  ;;  %v8969_v25 = vcombine.high %v493_v62, %v497_v0  ;;  %v500_v5 = vld [vmem:[#allocation2 + $0x890] sm:$0xff] }
 0x222   :  { %v8974_v18 = vcombine.low %v500_v5, %v504_v6 }
 0x224   :  { %3730 = vmatpush1.bf16.msra.mxu0 %v8910_v11  ;;  %3894 = vmatpush1.bf16.msra.mxu1 %v8912_v12  ;;  %v8968_v11 = vcombine.low %v493_v62, %v497_v0  ;;  %v8975_v12 = vcombine.high %v500_v5, %v504_v6  ;;  %v561_v5 = vld [vmem:[#allocation2 + $0xa78] sm:$0xff] }
 0x225   :  { %3731 = vmatprep.subr.bf16.mxu0 %v8919_v13  ;;  %3895 = vmatprep.subr.bf16.mxu1 %v8921_v33  ;;  %v8977_v13 = vcombine.high %v501_v7, %v505_v8  ;;  %v508_v33 = vld [vmem:[#allocation2 + $0x8d0] sm:$0xff] }
 0x226   :  { %v8982_v27 = vcombine.low %v508_v33, %v512_v36 }
 0x228   :  { %3732 = vmatpush1.bf16.msra.mxu0 %v8918_v19  ;;  %3896 = vmatpush1.bf16.msra.mxu1 %v8920_v59  ;;  %v8983_v19 = vcombine.high %v508_v33, %v512_v36  ;;  %v8985_v59 = vcombine.high %v509_v15, %v513_v17  ;;  %v569_v33 = vld [vmem:[#allocation2 + $0xab8] sm:$0xff] }
 0x229   :  { %3733 = vmatprep.subr.bf16.mxu0 %v8927_v20  ;;  %3897 = vmatprep.subr.bf16.mxu1 %v8929_v21  ;;  %v516_v20 = vld [vmem:[#allocation2 + $0x910] sm:$0xff] }
 0x22a   :  { %v520_v21 = vld [vmem:[#allocation2 + $0x930] sm:$0xff] }
 0x22b   :  { %v8990_v35 = vcombine.low %v516_v20, %v520_v21 }
 0x22c   :  { %3734 = vmatpush1.bf16.msra.mxu0 %v8926_v29  ;;  %3898 = vmatpush1.bf16.msra.mxu1 %v8928_v30  ;;  %v8991_v29 = vcombine.high %v516_v20, %v520_v21  ;;  %v524_v30 = vld [vmem:[#allocation2 + $0x950] sm:$0xff]  ;;  %v577_v20 = vld [vmem:[#allocation2 + $0xaf8] sm:$0xff] }
 0x22d   :  { %3735 = vmatprep.subr.bf16.mxu0 %v8935_v31  ;;  %3899 = vmatprep.subr.bf16.mxu1 %v8937_v32  ;;  %v528_v31 = vld [vmem:[#allocation2 + $0x970] sm:$0xff]  ;;  %v525_v32 = vld [vmem:[#allocation2 + $0x958] sm:$0xff] }
 0x22e   :  { %v8999_v37 = vcombine.high %v524_v30, %v528_v31  ;;  %v8998_v42 = vcombine.low %v524_v30, %v528_v31  ;;  %v9000_v45 = vcombine.low %v525_v32, %v529_v34  ;;  %v585_v30 = vld [vmem:[#allocation2 + $0xb38] sm:$0xff] }
 0x230   :  { %3736 = vmatpush1.bf16.msra.mxu0 %v8934_v57  ;;  %3900 = vmatpush1.bf16.msra.mxu1 %v8936_v38  ;;  %v9001_v57 = vcombine.high %v525_v32, %v529_v34  ;;  %v532_v38 = vld [vmem:[#allocation2 + $0x990] sm:$0xff] }
 0x231   :  { %3737 = vmatprep.subr.bf16.mxu0 %v8943_v39  ;;  %3901 = vmatprep.subr.bf16.mxu1 %v8945_v40  ;;  %v536_v39 = vld [vmem:[#allocation2 + $0x9b0] sm:$0xff]  ;;  %v533_v40 = vld [vmem:[#allocation2 + $0x998] sm:$0xff] }
 0x232   :  { %v9007_v46 = vcombine.high %v532_v38, %v536_v39  ;;  %v9006_v52 = vcombine.low %v532_v38, %v536_v39  ;;  %v9008_v16 = vcombine.low %v533_v40, %v537_v41  ;;  %v593_v38 = vld [vmem:[#allocation2 + $0xb78] sm:$0xff] }
 0x234   :  { %3738 = vmatpush1.bf16.msra.mxu0 %v8942_v47  ;;  %3902 = vmatpush1.bf16.msra.mxu1 %v8944_v48  ;;  %v9009_v47 = vcombine.high %v533_v40, %v537_v41  ;;  %v540_v48 = vld [vmem:[#allocation2 + $0x9d0] sm:$0xff] }
 0x235   :  { %3739 = vmatprep.subr.bf16.mxu0 %v8951_v49  ;;  %3903 = vmatprep.subr.bf16.mxu1 %v8953_v50  ;;  %v544_v49 = vld [vmem:[#allocation2 + $0x9f0] sm:$0xff]  ;;  %v541_v50 = vld [vmem:[#allocation2 + $0x9d8] sm:$0xff] }
 0x236   :  { %v9015_v55 = vcombine.high %v540_v48, %v544_v49  ;;  %v9014_v61 = vcombine.low %v540_v48, %v544_v49  ;;  %v9016_v62 = vcombine.low %v541_v50, %v545_v51  ;;  %v601_v48 = vld [vmem:[#allocation2 + $0xbb8] sm:$0xff] }
 0x238   :  { %3740 = vmatpush1.bf16.msra.mxu0 %v8950_v56  ;;  %3904 = vmatpush1.bf16.msra.mxu1 %v8952_v58  ;;  %v9017_v56 = vcombine.high %v541_v50, %v545_v51  ;;  %v548_v58 = vld [vmem:[#allocation2 + $0xa10] sm:$0xff] }
 0x239   :  { %3750 = vmatprep.subr.bf16.mxu0 %v8959_v23  ;;  %3914 = vmatprep.subr.bf16.mxu1 %v8961_v9  ;;  %v552_v23 = vld [vmem:[#allocation2 + $0xa30] sm:$0xff]  ;;  %v549_v9 = vld [vmem:[#allocation2 + $0xa18] sm:$0xff] }
 0x23a   :  { %v9023_v0 = vcombine.high %v548_v58, %v552_v23  ;;  %v9022_v6 = vcombine.low %v548_v58, %v552_v23  ;;  %v609_v58 = vld [vmem:[#allocation2 + $0xbf8] sm:$0xff] }
 0x23b   :  { %3742 = vmatmul.mubr.bf16.vlgmr.msra.gmra.mrb[4].mxu0 %v10976_v43  ;;  %3906 = vmatmul.mubr.bf16.vlgmr.msra.gmra.mrb[4].mxu1 %v10976_v43  ;;  %v8976_v43 = vcombine.low %v501_v7, %v505_v8  ;;  %v9024_v7 = vcombine.low %v549_v9, %v553_v60 }
 0x23c   :  { %3751 = vmatpush1.bf16.msra.mxu0 %v8958_v1  ;;  %3915 = vmatpush1.bf16.msra.mxu1 %v8960_v2  ;;  %v9025_v1 = vcombine.high %v549_v9, %v553_v60  ;;  %v556_v2 = vld [vmem:[#allocation2 + $0xa50] sm:$0xff] }
 0x23d   :  { %3752 = vmatprep.subr.bf16.mxu0 %v8967_v3  ;;  %3916 = vmatprep.subr.bf16.mxu1 %v8969_v25  ;;  %v560_v3 = vld [vmem:[#allocation2 + $0xa70] sm:$0xff]  ;;  %v557_v25 = vld [vmem:[#allocation2 + $0xa58] sm:$0xff] }
 0x23e   :  { %3782 = vmatprep.mubr.bf16.mxu0 %v10978_v54  ;;  %3946 = vmatprep.mubr.bf16.mxu1 %v10978_v54  ;;  %v8993_v54 = vcombine.high %v517_v22, %v521_v24  ;;  %v9031_v8 = vcombine.high %v556_v2, %v560_v3  ;;  %v9030_v36 = vcombine.low %v556_v2, %v560_v3  ;;  %v617_v2 = vld [vmem:[#allocation2 + $0xc38] sm:$0xff] }
 0x23f   :  { %v9032_v15 = vcombine.low %v557_v25, %v561_v5 }
 0x240   :  { %3753 = vmatpush1.bf16.msra.mxu0 %v8966_v10  ;;  %3917 = vmatpush1.bf16.msra.mxu1 %v8968_v11  ;;  %v9033_v10 = vcombine.high %v557_v25, %v561_v5  ;;  %v564_v11 = vld [vmem:[#allocation2 + $0xa90] sm:$0xff] }
 0x241   :  { %3754 = vmatprep.subr.bf16.mxu0 %v8975_v12  ;;  %3918 = vmatprep.subr.bf16.mxu1 %v8977_v13  ;;  %v568_v12 = vld [vmem:[#allocation2 + $0xab0] sm:$0xff]  ;;  %v565_v13 = vld [vmem:[#allocation2 + $0xa98] sm:$0xff] }
 0x242   :  { %v9039_v17 = vcombine.high %v564_v11, %v568_v12  ;;  %v9038_v21 = vcombine.low %v564_v11, %v568_v12  ;;  %v9040_v22 = vcombine.low %v565_v13, %v569_v33  ;;  %v625_v11 = vld [vmem:[#allocation2 + $0xc78] sm:$0xff] }
 0x244   :  { %3755 = vmatpush1.bf16.msra.mxu0 %v8974_v18  ;;  %3919 = vmatpush1.bf16.msra.mxu1 %v8976_v43  ;;  %v9041_v18 = vcombine.high %v565_v13, %v569_v33  ;;  %v572_v43 = vld [vmem:[#allocation2 + $0xad0] sm:$0xff] }
 0x245   :  { %3756 = vmatprep.subr.bf16.mxu0 %v8983_v19  ;;  %3920 = vmatprep.subr.bf16.mxu1 %v8985_v59  ;;  %v576_v19 = vld [vmem:[#allocation2 + $0xaf0] sm:$0xff]  ;;  %v573_v59 = vld [vmem:[#allocation2 + $0xad8] sm:$0xff] }
 0x246   :  { %v9047_v24 = vcombine.high %v572_v43, %v576_v19  ;;  %v9046_v31 = vcombine.low %v572_v43, %v576_v19  ;;  %v9048_v32 = vcombine.low %v573_v59, %v577_v20  ;;  %v633_v43 = vld [vmem:[#allocation2 + $0xcb8] sm:$0xff] }
 0x248   :  { %3757 = vmatpush1.bf16.msra.mxu0 %v8982_v27  ;;  %3921 = vmatpush1.bf16.msra.mxu1 %v8984_v28  ;;  %v9049_v27 = vcombine.high %v573_v59, %v577_v20  ;;  %v580_v28 = vld [vmem:[#allocation2 + $0xb10] sm:$0xff] }
 0x249   :  { %3758 = vmatprep.subr.bf16.mxu0 %v8991_v29  ;;  %3922 = vmatprep.subr.bf16.mxu1 %v8993_v54  ;;  %v584_v29 = vld [vmem:[#allocation2 + $0xb30] sm:$0xff]  ;;  %v581_v54 = vld [vmem:[#allocation2 + $0xb18] sm:$0xff] }
 0x24a   :  { %v9055_v34 = vcombine.high %v580_v28, %v584_v29  ;;  %v9054_v39 = vcombine.low %v580_v28, %v584_v29  ;;  %v9056_v40 = vcombine.low %v581_v54, %v585_v30  ;;  %v641_v28 = vld [vmem:[#allocation2 + $0xcf8] sm:$0xff] }
 0x24c   :  { %3759 = vmatpush1.bf16.msra.mxu0 %v8990_v35  ;;  %3923 = vmatpush1.bf16.msra.mxu1 %v8992_v63  ;;  %v9057_v35 = vcombine.high %v581_v54, %v585_v30  ;;  %v588_v63 = vld [vmem:[#allocation2 + $0xb50] sm:$0xff] }
 0x24d   :  { %3760 = vmatprep.subr.bf16.mxu0 %v8999_v37  ;;  %3924 = vmatprep.subr.bf16.mxu1 %v9001_v57  ;;  %v592_v37 = vld [vmem:[#allocation2 + $0xb70] sm:$0xff]  ;;  %v589_v57 = vld [vmem:[#allocation2 + $0xb58] sm:$0xff] }
 0x24e   :  { %v9063_v41 = vcombine.high %v588_v63, %v592_v37  ;;  %v9062_v49 = vcombine.low %v588_v63, %v592_v37  ;;  %v9064_v50 = vcombine.low %v589_v57, %v593_v38 }
 0x250   :  { %3761 = vmatpush1.bf16.msra.mxu0 %v8998_v42  ;;  %3925 = vmatpush1.bf16.msra.mxu1 %v9000_v45  ;;  %v9065_v42 = vcombine.high %v589_v57, %v593_v38  ;;  %v596_v45 = vld [vmem:[#allocation2 + $0xb90] sm:$0xff] }
 0x251   :  { %3762 = vmatprep.subr.bf16.mxu0 %v9007_v46  ;;  %3926 = vmatprep.subr.bf16.mxu1 %v9009_v47  ;;  %v600_v46 = vld [vmem:[#allocation2 + $0xbb0] sm:$0xff]  ;;  %v597_v47 = vld [vmem:[#allocation2 + $0xb98] sm:$0xff] }
 0x252   :  { %v9071_v51 = vcombine.high %v596_v45, %v600_v46  ;;  %v9070_v23 = vcombine.low %v596_v45, %v600_v46  ;;  %v9072_v9 = vcombine.low %v597_v47, %v601_v48  ;;  %v652_v38 = vld [vmem:[#allocation2 + $0xd50] sm:$0xff] }
 0x254   :  { %3763 = vmatpush1.bf16.msra.mxu0 %v9006_v52  ;;  %3927 = vmatpush1.bf16.msra.mxu1 %v9008_v16  ;;  %v9073_v52 = vcombine.high %v597_v47, %v601_v48  ;;  %v604_v16 = vld [vmem:[#allocation2 + $0xbd0] sm:$0xff] }
 0x255   :  { %3764 = vmatprep.subr.bf16.mxu0 %v9015_v55  ;;  %3928 = vmatprep.subr.bf16.mxu1 %v9017_v56  ;;  %v608_v55 = vld [vmem:[#allocation2 + $0xbf0] sm:$0xff]  ;;  %v605_v56 = vld [vmem:[#allocation2 + $0xbd8] sm:$0xff] }
 0x256   :  { %v9079_v60 = vcombine.high %v604_v16, %v608_v55  ;;  %v9078_v3 = vcombine.low %v604_v16, %v608_v55  ;;  %v9080_v25 = vcombine.low %v605_v56, %v609_v58  ;;  %v660_v48 = vld [vmem:[#allocation2 + $0xd90] sm:$0xff] }
 0x258   :  { %3765 = vmatpush1.bf16.msra.mxu0 %v9014_v61  ;;  %3929 = vmatpush1.bf16.msra.mxu1 %v9016_v62  ;;  %v9081_v61 = vcombine.high %v605_v56, %v609_v58  ;;  %v612_v62 = vld [vmem:[#allocation2 + $0xc10] sm:$0xff] }
 0x259   :  { %3766 = vmatprep.subr.bf16.mxu0 %v9023_v0  ;;  %3930 = vmatprep.subr.bf16.mxu1 %v9025_v1  ;;  %v616_v0 = vld [vmem:[#allocation2 + $0xc30] sm:$0xff]  ;;  %v613_v1 = vld [vmem:[#allocation2 + $0xc18] sm:$0xff] }
 0x25a   :  { %v9087_v5 = vcombine.high %v612_v62, %v616_v0  ;;  %v9086_v12 = vcombine.low %v612_v62, %v616_v0  ;;  %v9088_v13 = vcombine.low %v613_v1, %v617_v2  ;;  %v669_v62 = vld [vmem:[#allocation2 + $0xdd8] sm:$0xff] }
 0x25b   :  { %v673_v0 = vld [vmem:[#allocation2 + $0xdf8] sm:$0xff] }
 0x25c   :  { %3767 = vmatpush1.bf16.msra.mxu0 %v9022_v6  ;;  %3931 = vmatpush1.bf16.msra.mxu1 %v9024_v7  ;;  %v9089_v6 = vcombine.high %v613_v1, %v617_v2  ;;  %v620_v7 = vld [vmem:[#allocation2 + $0xc50] sm:$0xff] }
 0x25d   :  { %3768 = vmatprep.subr.bf16.mxu0 %v9031_v8  ;;  %3932 = vmatprep.subr.bf16.mxu1 %v9033_v10  ;;  %v624_v8 = vld [vmem:[#allocation2 + $0xc70] sm:$0xff]  ;;  %v621_v10 = vld [vmem:[#allocation2 + $0xc58] sm:$0xff] }
 0x25e   :  { %v9095_v33 = vcombine.high %v620_v7, %v624_v8  ;;  %v9094_v19 = vcombine.low %v620_v7, %v624_v8  ;;  %v9096_v59 = vcombine.low %v621_v10, %v625_v11 }
 0x260   :  { %3769 = vmatpush1.bf16.msra.mxu0 %v9030_v36  ;;  %3933 = vmatpush1.bf16.msra.mxu1 %v9032_v15  ;;  %v9097_v36 = vcombine.high %v621_v10, %v625_v11  ;;  %v628_v15 = vld [vmem:[#allocation2 + $0xc90] sm:$0xff]  ;;  %v9145_v10 = vcombine.high %v669_v62, %v673_v0 }
 0x261   :  { %3770 = vmatprep.subr.bf16.mxu0 %v9039_v17  ;;  %3934 = vmatprep.subr.bf16.mxu1 %v9041_v18  ;;  %v632_v17 = vld [vmem:[#allocation2 + $0xcb0] sm:$0xff]  ;;  %v629_v18 = vld [vmem:[#allocation2 + $0xc98] sm:$0xff] }
 0x262   :  { %v9103_v20 = vcombine.high %v628_v15, %v632_v17  ;;  %v9102_v29 = vcombine.low %v628_v15, %v632_v17  ;;  %v676_v11 = vld [vmem:[#allocation2 + $0xe10] sm:$0xff]  ;;  %v9144_v15 = vcombine.low %v669_v62, %v673_v0 }
 0x263   :  { %v724_v0 = vld [vmem:[#allocation2 + $0xf90] sm:$0xff] }
 0x264   :  { %3771 = vmatpush1.bf16.msra.mxu0 %v9038_v21  ;;  %3935 = vmatpush1.bf16.msra.mxu1 %v9040_v22  ;;  %v9105_v21 = vcombine.high %v629_v18, %v633_v43  ;;  %v636_v22 = vld [vmem:[#allocation2 + $0xcd0] sm:$0xff] }
 0x265   :  { %3772 = vmatprep.subr.bf16.mxu0 %v9047_v24  ;;  %3936 = vmatprep.subr.bf16.mxu1 %v9049_v27  ;;  %v640_v24 = vld [vmem:[#allocation2 + $0xcf0] sm:$0xff]  ;;  %v637_v27 = vld [vmem:[#allocation2 + $0xcd8] sm:$0xff] }
 0x266   :  { %v9111_v54 = vcombine.high %v636_v22, %v640_v24  ;;  %v9113_v30 = vcombine.high %v637_v27, %v641_v28  ;;  %v9110_v63 = vcombine.low %v636_v22, %v640_v24  ;;  %v9112_v37 = vcombine.low %v637_v27, %v641_v28  ;;  %v692_v28 = vld [vmem:[#allocation2 + $0xe90] sm:$0xff] }
 0x268   :  { %3773 = vmatpush1.bf16.msra.mxu0 %v9046_v31  ;;  %3937 = vmatpush1.bf16.msra.mxu1 %v9048_v32  ;;  %v644_v31 = vld [vmem:[#allocation2 + $0xd10] sm:$0xff] }
 0x269   :  { %3774 = vmatprep.subr.bf16.mxu0 %v9055_v34  ;;  %3938 = vmatprep.subr.bf16.mxu1 %v9057_v35  ;;  %v648_v32 = vld [vmem:[#allocation2 + $0xd30] sm:$0xff]  ;;  %v645_v34 = vld [vmem:[#allocation2 + $0xd18] sm:$0xff] }
 0x26a   :  { %v649_v35 = vld [vmem:[#allocation2 + $0xd38] sm:$0xff]  ;;  %v9119_v57 = vcombine.high %v644_v31, %v648_v32 }
 0x26b   :  { %v9120_v45 = vcombine.low %v645_v34, %v649_v35 }
 0x26c   :  { %3775 = vmatpush1.bf16.msra.mxu0 %v9054_v39  ;;  %3939 = vmatpush1.bf16.msra.mxu1 %v9056_v40  ;;  %v656_v39 = vld [vmem:[#allocation2 + $0xd70] sm:$0xff]  ;;  %v653_v40 = vld [vmem:[#allocation2 + $0xd58] sm:$0xff] }
 0x26d   :  { %3776 = vmatprep.subr.bf16.mxu0 %v9063_v41  ;;  %3940 = vmatprep.subr.bf16.mxu1 %v9065_v42  ;;  %v657_v41 = vld [vmem:[#allocation2 + $0xd78] sm:$0xff]  ;;  %v9118_v42 = vcombine.low %v644_v31, %v648_v32  ;;  %v9127_v46 = vcombine.high %v652_v38, %v656_v39 }
 0x26e   :  { %v9129_v47 = vcombine.high %v653_v40, %v657_v41  ;;  %v9128_v16 = vcombine.low %v653_v40, %v657_v41  ;;  %v708_v41 = vld [vmem:[#allocation2 + $0xf10] sm:$0xff] }
 0x270   :  { %3777 = vmatpush1.bf16.msra.mxu0 %v9062_v49  ;;  %3941 = vmatpush1.bf16.msra.mxu1 %v9064_v50  ;;  %v664_v49 = vld [vmem:[#allocation2 + $0xdb0] sm:$0xff]  ;;  %v661_v50 = vld [vmem:[#allocation2 + $0xd98] sm:$0xff] }
 0x271   :  { %3778 = vmatprep.subr.bf16.mxu0 %v9071_v51  ;;  %3942 = vmatprep.subr.bf16.mxu1 %v9073_v52  ;;  %v665_v51 = vld [vmem:[#allocation2 + $0xdb8] sm:$0xff]  ;;  %v9126_v52 = vcombine.low %v652_v38, %v656_v39  ;;  %v9135_v55 = vcombine.high %v660_v48, %v664_v49 }
 0x272   :  { %v9137_v58 = vcombine.high %v661_v50, %v665_v51 }
 0x274   :  { %3779 = vmatpush1.bf16.msra.mxu0 %v9070_v23  ;;  %3943 = vmatpush1.bf16.msra.mxu1 %v9072_v9  ;;  %v668_v23 = vld [vmem:[#allocation2 + $0xdd0] sm:$0xff] }
 0x275   :  { %3780 = vmatprep.subr.bf16.mxu0 %v9079_v60  ;;  %3944 = vmatprep.subr.bf16.mxu1 %v9081_v61  ;;  %v672_v9 = vld [vmem:[#allocation2 + $0xdf0] sm:$0xff] }
 0x276   :  { %v9143_v7 = vcombine.high %v668_v23, %v672_v9 }
 0x278   :  { %3781 = vmatpush1.bf16.msra.mxu0 %v9078_v3  ;;  %3945 = vmatpush1.bf16.msra.mxu1 %v9080_v25  ;;  %v9134_v3 = vcombine.low %v660_v48, %v664_v49 }
 0x279   :  { %3791 = vmatprep.subr.bf16.mxu0 %v9087_v5  ;;  %3955 = vmatprep.subr.bf16.mxu1 %v9089_v6  ;;  %v9136_v6 = vcombine.low %v661_v50, %v665_v51  ;;  %v716_v51 = vld [vmem:[#allocation2 + $0xf50] sm:$0xff] }
 0x27b   :  { %3783 = vmatmul.mubr.bf16.vlgmr.msra.gmra.mrb[4].mxu0 %v10993_v4  ;;  %3947 = vmatmul.mubr.bf16.vlgmr.msra.gmra.mrb[4].mxu1 %v10993_v4  ;;  %v9104_v4 = vcombine.low %v629_v18, %v633_v43  ;;  %v684_v43 = vld [vmem:[#allocation2 + $0xe50] sm:$0xff] }
 0x27c   :  { %3792 = vmatpush1.bf16.msra.mxu0 %v9086_v12  ;;  %3956 = vmatpush1.bf16.msra.mxu1 %v9088_v13  ;;  %v680_v12 = vld [vmem:[#allocation2 + $0xe30] sm:$0xff]  ;;  %v677_v13 = vld [vmem:[#allocation2 + $0xe18] sm:$0xff] }
 0x27d   :  { %3793 = vmatprep.subr.bf16.mxu0 %v9095_v33  ;;  %3957 = vmatprep.subr.bf16.mxu1 %v9097_v36  ;;  %v681_v33 = vld [vmem:[#allocation2 + $0xe38] sm:$0xff]  ;;  %v9142_v36 = vcombine.low %v668_v23, %v672_v9  ;;  %v9151_v17 = vcombine.high %v676_v11, %v680_v12 }
 0x27e   :  { %3823 = vmatprep.mubr.bf16.mxu0 %v10995_v14  ;;  %3987 = vmatprep.mubr.bf16.mxu1 %v10995_v14  ;;  %v9121_v14 = vcombine.high %v645_v34, %v649_v35  ;;  %v9153_v18 = vcombine.high %v677_v13, %v681_v33  ;;  %v9152_v22 = vcombine.low %v677_v13, %v681_v33  ;;  %v700_v35 = vld [vmem:[#allocation2 + $0xed0] sm:$0xff] }
 0x27f   :  { %v736_v13 = vld [vmem:[#allocation2 + $0xff0] sm:$0xff] }
 0x280   :  { %3794 = vmatpush1.bf16.msra.mxu0 %v9094_v19  ;;  %3958 = vmatpush1.bf16.msra.mxu1 %v9096_v59  ;;  %v688_v19 = vld [vmem:[#allocation2 + $0xe70] sm:$0xff]  ;;  %v685_v59 = vld [vmem:[#allocation2 + $0xe58] sm:$0xff] }
 0x281   :  { %3795 = vmatprep.subr.bf16.mxu0 %v9103_v20  ;;  %3959 = vmatprep.subr.bf16.mxu1 %v9105_v21  ;;  %v689_v20 = vld [vmem:[#allocation2 + $0xe78] sm:$0xff]  ;;  %v9150_v21 = vcombine.low %v676_v11, %v680_v12  ;;  %v9159_v24 = vcombine.high %v684_v43, %v688_v19  ;;  %v732_v12 = vld [vmem:[#allocation2 + $0xfd0] sm:$0xff] }
 0x282   :  { %v9161_v27 = vcombine.high %v685_v59, %v689_v20  ;;  %v9160_v31 = vcombine.low %v685_v59, %v689_v20  ;;  %v9206_v20 = vcombine.low %v732_v12, %v736_v13 }
 0x284   :  { %3796 = vmatpush1.bf16.msra.mxu0 %v9102_v29  ;;  %3960 = vmatpush1.bf16.msra.mxu1 %v9104_v4  ;;  %v696_v29 = vld [vmem:[#allocation2 + $0xeb0] sm:$0xff]  ;;  %v693_v4 = vld [vmem:[#allocation2 + $0xe98] sm:$0xff] }
 0x285   :  { %3797 = vmatprep.subr.bf16.mxu0 %v9111_v54  ;;  %3961 = vmatprep.subr.bf16.mxu1 %v9113_v30  ;;  %v697_v54 = vld [vmem:[#allocation2 + $0xeb8] sm:$0xff]  ;;  %v9158_v30 = vcombine.low %v684_v43, %v688_v19  ;;  %v9167_v32 = vcombine.high %v692_v28, %v696_v29  ;;  %v9207_v43 = vcombine.high %v732_v12, %v736_v13  ;;  %v10017_v12 = vld [vmem:[#allocation7 + $0x148] ss:$16 sps:$4 sm:$0xff]  }
 0x286   :  { %v9169_v34 = vcombine.high %v693_v4, %v697_v54  ;;  %v9168_v38 = vcombine.low %v693_v4, %v697_v54  ;;  %v9962_v4 = vld [vmem:[#allocation7 + $0x24] ss:$16 sps:$4 sm:$0xff]  }
 0x287   :  { %v10022_v13 = vld [vmem:[#allocation7 + $0x164] ss:$16 sps:$4 sm:$0xff]  }
 0x288   :  { %3798 = vmatpush1.bf16.msra.mxu0 %v9110_v63  ;;  %3962 = vmatpush1.bf16.msra.mxu1 %v9112_v37  ;;  %v704_v63 = vld [vmem:[#allocation2 + $0xef0] sm:$0xff]  ;;  %v701_v37 = vld [vmem:[#allocation2 + $0xed8] sm:$0xff] }
 0x289   :  { %3799 = vmatprep.subr.bf16.mxu0 %v9119_v57  ;;  %3963 = vmatprep.subr.bf16.mxu1 %v9121_v14  ;;  %v705_v57 = vld [vmem:[#allocation2 + $0xef8] sm:$0xff]  ;;  %v9166_v14 = vcombine.low %v692_v28, %v696_v29  ;;  %v9175_v39 = vcombine.high %v700_v35, %v704_v63  ;;  %v9957_v29 = vld [vmem:[#allocation7 + $0x8] ss:$16 sps:$4 sm:$0xff]  }
 0x28a   :  { %v9177_v40 = vcombine.high %v701_v37, %v705_v57  ;;  %v9176_v48 = vcombine.low %v701_v37, %v705_v57  ;;  %v9954_v28 = vld [vmem:[#allocation7] ss:$16 sps:$4 sm:$0xff]   ;;  %v9974_v37 = vld [vmem:[#allocation7 + $0x64] ss:$16 sps:$4 sm:$0xff]   ;;  %v9977_v57 = vld [vmem:[#allocation7 + $0x6c] ss:$16 sps:$4 sm:$0xff]  }
 0x28c   :  { %3800 = vmatpush1.bf16.msra.mxu0 %v9118_v42  ;;  %3964 = vmatpush1.bf16.msra.mxu1 %v9120_v45  ;;  %v712_v42 = vld [vmem:[#allocation2 + $0xf30] sm:$0xff]  ;;  %v709_v45 = vld [vmem:[#allocation2 + $0xf18] sm:$0xff] }
 0x28d   :  { %3801 = vmatprep.subr.bf16.mxu0 %v9127_v46  ;;  %3965 = vmatprep.subr.bf16.mxu1 %v9129_v47  ;;  %v713_v46 = vld [vmem:[#allocation2 + $0xf38] sm:$0xff]  ;;  %v9174_v47 = vcombine.low %v700_v35, %v704_v63  ;;  %v9183_v49 = vcombine.high %v708_v41, %v712_v42  ;;  %v9969_v63 = vld [vmem:[#allocation7 + $0x48] ss:$16 sps:$4 sm:$0xff]  }
 0x28e   :  { %v11021_v56 = vpop.f32.mrb[0].mxu0  ;;  %v11023_v60 = vpop.f32.mrb[0].mxu1  ;;  %v9185_v50 = vcombine.high %v709_v45, %v713_v46  ;;  %v9184_v23 = vcombine.low %v709_v45, %v713_v46  ;;  %v9966_v35 = vld [vmem:[#allocation7 + $0x40] ss:$16 sps:$4 sm:$0xff]   ;;  %v9989_v45 = vld [vmem:[#allocation7 + $0xac] ss:$16 sps:$4 sm:$0xff]  }
 0x28f   :  { %v11025_v61 = vpop.f32.mrb[1].mxu0  ;;  %v11027_v1 = vpop.f32.mrb[1].mxu1  ;;  %v9984_v46 = vld [vmem:[#allocation7 + $0xa0] ss:$16 sps:$4 sm:$0xff]  }
 0x290   :  { %v3501_v2 = vpop.f32.mrb[2].mxu0  ;;  %3802 = vmatpush1.bf16.msra.mxu0 %v9126_v52  ;;  %v3665_v25 = vpop.f32.mrb[2].mxu1  ;;  %3966 = vmatpush1.bf16.msra.mxu1 %v9128_v16  ;;  %v720_v52 = vld [vmem:[#allocation2 + $0xf70] sm:$0xff]  ;;  %v717_v16 = vld [vmem:[#allocation2 + $0xf58] sm:$0xff] }
 0x291   :  { %v3502_v5 = vpop.f32.mrb[3].mxu0  ;;  %3803 = vmatprep.subr.bf16.mxu0 %v9135_v55  ;;  %v3666_v8 = vpop.f32.mrb[3].mxu1  ;;  %3967 = vmatprep.subr.bf16.mxu1 %v9137_v58  ;;  %v721_v55 = vld [vmem:[#allocation2 + $0xf78] sm:$0xff]  ;;  %v9182_v58 = vcombine.low %v708_v41, %v712_v42  ;;  %v9191_v9 = vcombine.high %v716_v51, %v720_v52  ;;  %v728_v2 = vld [vmem:[#allocation2 + $0xfb0] sm:$0xff] }
 0x292   :  { %v9193_v62 = vcombine.high %v717_v16, %v721_v55  ;;  %v725_v25 = vld [vmem:[#allocation2 + $0xf98] sm:$0xff]  ;;  %v9192_v8 = vcombine.low %v717_v16, %v721_v55  ;;  %v9981_v41 = vld [vmem:[#allocation7 + $0x88] ss:$16 sps:$4 sm:$0xff]   ;;  %v10001_v16 = vld [vmem:[#allocation7 + $0xec] ss:$16 sps:$4 sm:$0xff]  }
 0x293   :  { %v729_v5 = vld [vmem:[#allocation2 + $0xfb8] sm:$0xff] }
 0x294   :  { %3804 = vmatpush1.bf16.msra.mxu0 %v9134_v3  ;;  %3968 = vmatpush1.bf16.msra.mxu1 %v9136_v6  ;;  %v11030_v3 = vsub.s32 1, %v10926_v44  ;;  %v11032_v6 = vld [vmem:[#allocation5] sm:$0xff]  ;;  %v9201_v11 = vcombine.high %v725_v25, %v729_v5  ;;  %v9986_v42 = vld [vmem:[#allocation7 + $0xa4] ss:$16 sps:$4 sm:$0xff]   ;;  %v9996_v55 = vld [vmem:[#allocation7 + $0xe0] ss:$16 sps:$4 sm:$0xff]  }
 0x295   :  { %3805 = vmatprep.subr.bf16.mxu0 %v9143_v7  ;;  %3969 = vmatprep.subr.bf16.mxu1 %v9145_v10  ;;  %v9190_v7 = vcombine.low %v716_v51, %v720_v52  ;;  %v9199_v10 = vcombine.high %v724_v0, %v728_v2  ;;  %v9993_v51 = vld [vmem:[#allocation7 + $0xc8] ss:$16 sps:$4 sm:$0xff]   ;;  %v9998_v52 = vld [vmem:[#allocation7 + $0xe4] ss:$16 sps:$4 sm:$0xff]  }
 0x296   :  { %v747_v33 = vrot.slane %v11032_v6, %v11030_v3 }
 0x298   :  { %3806 = vmatpush1.bf16.msra.mxu0 %v9142_v36  ;;  %3970 = vmatpush1.bf16.msra.mxu1 %v9144_v15  ;;  %v733_v36 = vld [vmem:[#allocation2 + $0xfd8] sm:$0xff]  ;;  %v9841_v59 = vadd.f32 %v11025_v61, %v747_v33  ;;  %v9965_v61 = vld [vmem:[#allocation7 + $0x2c] ss:$16 sps:$4 sm:$0xff]  }
 0x299   :  { %3807 = vmatprep.subr.bf16.mxu0 %v9151_v17  ;;  %3971 = vmatprep.subr.bf16.mxu1 %v9153_v18  ;;  %v737_v15 = vld [vmem:[#allocation2 + $0xff8] sm:$0xff]  ;;  %v9198_v17 = vcombine.low %v724_v0, %v728_v2  ;;  %v9200_v18 = vcombine.low %v725_v25, %v729_v5  ;;  %v10005_v0 = vld [vmem:[#allocation7 + $0x108] ss:$16 sps:$4 sm:$0xff]   ;;  %v10013_v25 = vld [vmem:[#allocation7 + $0x12c] ss:$16 sps:$4 sm:$0xff]  }
 0x29a   :  { %v9209_v19 = vcombine.high %v733_v36, %v737_v15  ;;  %v10010_v2 = vld [vmem:[#allocation7 + $0x124] ss:$16 sps:$4 sm:$0xff]   ;;  %v10008_v5 = vld [vmem:[#allocation7 + $0x120] ss:$16 sps:$4 sm:$0xff]   ;;  %v10025_v33 = vld [vmem:[#allocation7 + $0x16c] ss:$16 sps:$4 sm:$0xff]  }
 0x29c   :  { %3808 = vmatpush1.bf16.msra.mxu0 %v9150_v21  ;;  %3972 = vmatpush1.bf16.msra.mxu1 %v9152_v22  ;;  %v9208_v21 = vcombine.low %v733_v36, %v737_v15  ;;  %v9956_v22 = vld [vmem:[#allocation7 + $0x4] ss:$16 sps:$4 sm:$0xff]   ;;  %v10020_v36 = vld [vmem:[#allocation7 + $0x160] ss:$16 sps:$4 sm:$0xff]   ;;  %v10023_v15 = vld [vmem:[#allocation7 + $0x168] ss:$16 sps:$4 sm:$0xff]  }
 0x29d   :  { %3809 = vmatprep.subr.bf16.mxu0 %v9159_v24  ;;  %3973 = vmatprep.subr.bf16.mxu1 %v9161_v27  ;;  %v9959_v24 = vld [vmem:[#allocation7 + $0xc] ss:$16 sps:$4 sm:$0xff]   ;;  %v3997_v27 = vmax.f32 %v9841_v59, 0.0  ;;  %v10029_v59 = vld [vmem:[#allocation7 + $0x188] ss:$16 sps:$4 sm:$0xff]  }
 0x29f   :  { %v4005_v54 = vpack.c.bf16 %v3997_v27, %v3997_v27 }
 0x2a0   :  { %3810 = vmatpush1.bf16.msra.mxu0 %v9158_v30  ;;  %3974 = vmatpush1.bf16.msra.mxu1 %v9160_v31  ;;  %v9960_v30 = vld [vmem:[#allocation7 + $0x20] ss:$16 sps:$4 sm:$0xff]   ;;  %v9963_v31 = vld [vmem:[#allocation7 + $0x28] ss:$16 sps:$4 sm:$0xff]  }
 0x2a1   :  { %3811 = vmatprep.subr.bf16.mxu0 %v9167_v32  ;;  %3975 = vmatprep.subr.bf16.mxu1 %v9169_v34  ;;  %v9968_v32 = vld [vmem:[#allocation7 + $0x44] ss:$16 sps:$4 sm:$0xff]   ;;  %v9971_v34 = vld [vmem:[#allocation7 + $0x4c] ss:$16 sps:$4 sm:$0xff]  }
 0x2a4   :  { %3812 = vmatpush1.bf16.msra.mxu0 %v9166_v14  ;;  %3976 = vmatpush1.bf16.msra.mxu1 %v9168_v38  ;;  %v9975_v14 = vld [vmem:[#allocation7 + $0x68] ss:$16 sps:$4 sm:$0xff]   ;;  %v9980_v38 = vld [vmem:[#allocation7 + $0x84] ss:$16 sps:$4 sm:$0xff]  }
 0x2a5   :  { %3813 = vmatprep.subr.bf16.mxu0 %v9175_v39  ;;  %3977 = vmatprep.subr.bf16.mxu1 %v9177_v40  ;;  %v9983_v39 = vld [vmem:[#allocation7 + $0x8c] ss:$16 sps:$4 sm:$0xff]   ;;  %v9978_v40 = vld [vmem:[#allocation7 + $0x80] ss:$16 sps:$4 sm:$0xff]  }
 0x2a8   :  { %3814 = vmatpush1.bf16.msra.mxu0 %v9174_v47  ;;  %3978 = vmatpush1.bf16.msra.mxu1 %v9176_v48  ;;  %v9987_v47 = vld [vmem:[#allocation7 + $0xa8] ss:$16 sps:$4 sm:$0xff]   ;;  %v9992_v48 = vld [vmem:[#allocation7 + $0xc4] ss:$16 sps:$4 sm:$0xff]  }
 0x2a9   :  { %3815 = vmatprep.subr.bf16.mxu0 %v9183_v49  ;;  %3979 = vmatprep.subr.bf16.mxu1 %v9185_v50  ;;  %v9995_v49 = vld [vmem:[#allocation7 + $0xcc] ss:$16 sps:$4 sm:$0xff]   ;;  %v9990_v50 = vld [vmem:[#allocation7 + $0xc0] ss:$16 sps:$4 sm:$0xff]  }
 0x2ac   :  { %3816 = vmatpush1.bf16.msra.mxu0 %v9182_v58  ;;  %3980 = vmatpush1.bf16.msra.mxu1 %v9184_v23  ;;  %v9999_v58 = vld [vmem:[#allocation7 + $0xe8] ss:$16 sps:$4 sm:$0xff]   ;;  %v10004_v23 = vld [vmem:[#allocation7 + $0x104] ss:$16 sps:$4 sm:$0xff]  }
 0x2ad   :  { %3817 = vmatprep.subr.bf16.mxu0 %v9191_v9  ;;  %3981 = vmatprep.subr.bf16.mxu1 %v9193_v62  ;;  %v10007_v9 = vld [vmem:[#allocation7 + $0x10c] ss:$16 sps:$4 sm:$0xff]   ;;  %v10002_v62 = vld [vmem:[#allocation7 + $0x100] ss:$16 sps:$4 sm:$0xff]  }
 0x2b0   :  { %3818 = vmatpush1.bf16.msra.mxu0 %v9190_v7  ;;  %3982 = vmatpush1.bf16.msra.mxu1 %v9192_v8  ;;  %v10011_v7 = vld [vmem:[#allocation7 + $0x128] ss:$16 sps:$4 sm:$0xff]   ;;  %v10016_v8 = vld [vmem:[#allocation7 + $0x144] ss:$16 sps:$4 sm:$0xff]  }
 0x2b1   :  { %3819 = vmatprep.subr.bf16.mxu0 %v9199_v10  ;;  %3983 = vmatprep.subr.bf16.mxu1 %v9201_v11  ;;  %v10019_v10 = vld [vmem:[#allocation7 + $0x14c] ss:$16 sps:$4 sm:$0xff]   ;;  %v10014_v11 = vld [vmem:[#allocation7 + $0x140] ss:$16 sps:$4 sm:$0xff]  }
 0x2b4   :  { %3820 = vmatpush1.bf16.msra.mxu0 %v9198_v17  ;;  %3984 = vmatpush1.bf16.msra.mxu1 %v9200_v18  ;;  %v10028_v17 = vld [vmem:[#allocation7 + $0x184] ss:$16 sps:$4 sm:$0xff]   ;;  %v10031_v18 = vld [vmem:[#allocation7 + $0x18c] ss:$16 sps:$4 sm:$0xff]  }
 0x2b5   :  { %3821 = vmatprep.subr.bf16.mxu0 %v9207_v43  ;;  %3985 = vmatprep.subr.bf16.mxu1 %v9209_v19  ;;  %v10026_v43 = vld [vmem:[#allocation7 + $0x180] ss:$16 sps:$4 sm:$0xff]   ;;  %v11040_v19 = vsub.s32 0, %v10926_v44 }
 0x2b7   :  { %v743_v27 = vrot.slane %v11032_v6, %v11040_v19 }
 0x2b8   :  { %3822 = vmatpush1.bf16.msra.mxu0 %v9206_v20  ;;  %3986 = vmatpush1.bf16.msra.mxu1 %v9208_v21  ;;  %v10034_v20 = vld [vmem:[#allocation7 + $0x1a4] ss:$16 sps:$4 sm:$0xff]   ;;  %v10037_v21 = vld [vmem:[#allocation7 + $0x1ac] ss:$16 sps:$4 sm:$0xff]  }
 0x2b9   :  { %5570 = vmatprep.subr.bf16.mxu0 %v9956_v22  ;;  %5734 = vmatprep.subr.bf16.mxu1 %v9959_v24  ;;  %v11043_v22 = vsub.s32 3, %v10926_v44  ;;  %v10032_v24 = vld [vmem:[#allocation7 + $0x1a0] ss:$16 sps:$4 sm:$0xff]  }
 0x2bb   :  { %3824 = vmatmul.mubr.bf16.vlgmr.msra.gmra.mrb[4].mxu0 %v11003_v26  ;;  %3988 = vmatmul.mubr.bf16.vlgmr.msra.gmra.mrb[4].mxu1 %v11003_v26  ;;  %v9972_v26 = vld [vmem:[#allocation7 + $0x60] ss:$16 sps:$4 sm:$0xff]  }
 0x2bc   :  { %5571 = vmatpush1.bf16.msra.mxu0 %v9954_v28  ;;  %5602 = vmatprep.mubr.bf16.mxu0 %v4005_v54  ;;  %v10035_v28 = vld [vmem:[#allocation7 + $0x1a8] ss:$16 sps:$4 sm:$0xff]  }
 0x2bd   :  { %5735 = vmatpush1.bf16.msra.mxu1 %v9957_v29  ;;  %5766 = vmatprep.mubr.bf16.mxu1 %v4005_v54  ;;  %v10040_v29 = vld [vmem:[#allocation7 + $0x1c4] ss:$16 sps:$4 sm:$0xff]   ;;  %v755_v54 = vrot.slane %v11032_v6, %v11043_v22 }
 0x2be   :  { %5572 = vmatprep.subr.bf16.mxu0 %v9962_v4  ;;  %5736 = vmatprep.subr.bf16.mxu1 %v9965_v61  ;;  %v10043_v4 = vld [vmem:[#allocation7 + $0x1cc] ss:$16 sps:$4 sm:$0xff]   ;;  %v10038_v61 = vld [vmem:[#allocation7 + $0x1c0] ss:$16 sps:$4 sm:$0xff]  }
 0x2c0   :  { %5573 = vmatpush1.bf16.msra.mxu0 %v9960_v30  ;;  %v9840_v30 = vadd.f32 %v11021_v56, %v743_v27  ;;  %v10050_v56 = vld [vmem:[#allocation7 + $0x200] ss:$16 sps:$4 sm:$0xff]   ;;  %v10112_v27 = vld [vmem:[#allocation7 + $0x344] ss:$16 sps:$4 sm:$0xff]  }
 0x2c1   :  { %5737 = vmatpush1.bf16.msra.mxu1 %v9963_v31  ;;  %5574 = vmatprep.subr.bf16.mxu0 %v9968_v32  ;;  %v10041_v31 = vld [vmem:[#allocation7 + $0x1c8] ss:$16 sps:$4 sm:$0xff]   ;;  %v10046_v32 = vld [vmem:[#allocation7 + $0x1e4] ss:$16 sps:$4 sm:$0xff]  }
 0x2c2   :  { %5738 = vmatprep.subr.bf16.mxu1 %v9971_v34  ;;  %v10049_v34 = vld [vmem:[#allocation7 + $0x1ec] ss:$16 sps:$4 sm:$0xff]  }
 0x2c4   :  { %5575 = vmatpush1.bf16.msra.mxu0 %v9966_v35  ;;  %v9843_v35 = vadd.f32 %v11027_v1, %v755_v54  ;;  %v10061_v1 = vld [vmem:[#allocation7 + $0x22c] ss:$16 sps:$4 sm:$0xff]   ;;  %v10118_v54 = vld [vmem:[#allocation7 + $0x364] ss:$16 sps:$4 sm:$0xff]  }
 0x2c5   :  { %5739 = vmatpush1.bf16.msra.mxu1 %v9969_v63  ;;  %5576 = vmatprep.subr.bf16.mxu0 %v9974_v37  ;;  %v10044_v63 = vld [vmem:[#allocation7 + $0x1e0] ss:$16 sps:$4 sm:$0xff]   ;;  %v3996_v37 = vmax.f32 %v9840_v30, 0.0 }
 0x2c6   :  { %5740 = vmatprep.subr.bf16.mxu1 %v9977_v57  ;;  %v10047_v57 = vld [vmem:[#allocation7 + $0x1e8] ss:$16 sps:$4 sm:$0xff]   ;;  %v10116_v30 = vld [vmem:[#allocation7 + $0x360] ss:$16 sps:$4 sm:$0xff]  }
 0x2c8   :  { %5577 = vmatpush1.bf16.msra.mxu0 %v9972_v26  ;;  %v10052_v26 = vld [vmem:[#allocation7 + $0x204] ss:$16 sps:$4 sm:$0xff]  }
 0x2c9   :  { %5741 = vmatpush1.bf16.msra.mxu1 %v9975_v14  ;;  %5578 = vmatprep.subr.bf16.mxu0 %v9980_v38  ;;  %v10055_v14 = vld [vmem:[#allocation7 + $0x20c] ss:$16 sps:$4 sm:$0xff]   ;;  %v3999_v38 = vmax.f32 %v9843_v35, 0.0  ;;  %v10122_v35 = vld [vmem:[#allocation7 + $0x380] ss:$16 sps:$4 sm:$0xff]  }
 0x2ca   :  { %5742 = vmatprep.subr.bf16.mxu1 %v9983_v39  ;;  %v4004_v39 = vpack.c.bf16 %v3996_v37, %v3996_v37  ;;  %v10125_v37 = vld [vmem:[#allocation7 + $0x388] ss:$16 sps:$4 sm:$0xff]  }
 0x2cc   :  { %5579 = vmatpush1.bf16.msra.mxu0 %v9978_v40  ;;  %v10053_v40 = vld [vmem:[#allocation7 + $0x208] ss:$16 sps:$4 sm:$0xff]  }
 0x2cd   :  { %5743 = vmatpush1.bf16.msra.mxu1 %v9981_v41  ;;  %5580 = vmatprep.subr.bf16.mxu0 %v9986_v42  ;;  %v10058_v41 = vld [vmem:[#allocation7 + $0x224] ss:$16 sps:$4 sm:$0xff]   ;;  %v4007_v42 = vpack.c.bf16 %v3999_v38, %v3999_v38 }
 0x2ce   :  { %5744 = vmatprep.subr.bf16.mxu1 %v9989_v45  ;;  %v10056_v45 = vld [vmem:[#allocation7 + $0x220] ss:$16 sps:$4 sm:$0xff]  }
 0x2d0   :  { %5581 = vmatpush1.bf16.msra.mxu0 %v9984_v46  ;;  %v10059_v46 = vld [vmem:[#allocation7 + $0x228] ss:$16 sps:$4 sm:$0xff]  }
 0x2d1   :  { %5745 = vmatpush1.bf16.msra.mxu1 %v9987_v47  ;;  %5582 = vmatprep.subr.bf16.mxu0 %v9992_v48  ;;  %v10064_v47 = vld [vmem:[#allocation7 + $0x244] ss:$16 sps:$4 sm:$0xff]   ;;  %v10067_v48 = vld [vmem:[#allocation7 + $0x24c] ss:$16 sps:$4 sm:$0xff]  }
 0x2d2   :  { %5746 = vmatprep.subr.bf16.mxu1 %v9995_v49  ;;  %v10062_v49 = vld [vmem:[#allocation7 + $0x240] ss:$16 sps:$4 sm:$0xff]  }
 0x2d4   :  { %5583 = vmatpush1.bf16.msra.mxu0 %v9990_v50  ;;  %v10065_v50 = vld [vmem:[#allocation7 + $0x248] ss:$16 sps:$4 sm:$0xff]  }
 0x2d5   :  { %5747 = vmatpush1.bf16.msra.mxu1 %v9993_v51  ;;  %5584 = vmatprep.subr.bf16.mxu0 %v9998_v52  ;;  %v10070_v51 = vld [vmem:[#allocation7 + $0x264] ss:$16 sps:$4 sm:$0xff]   ;;  %v10073_v52 = vld [vmem:[#allocation7 + $0x26c] ss:$16 sps:$4 sm:$0xff]  }
 0x2d6   :  { %5748 = vmatprep.subr.bf16.mxu1 %v10001_v16  ;;  %v10068_v16 = vld [vmem:[#allocation7 + $0x260] ss:$16 sps:$4 sm:$0xff]  }
 0x2d8   :  { %5585 = vmatpush1.bf16.msra.mxu0 %v9996_v55  ;;  %v10071_v55 = vld [vmem:[#allocation7 + $0x268] ss:$16 sps:$4 sm:$0xff]  }
 0x2d9   :  { %5749 = vmatpush1.bf16.msra.mxu1 %v9999_v58  ;;  %5586 = vmatprep.subr.bf16.mxu0 %v10004_v23  ;;  %v10076_v58 = vld [vmem:[#allocation7 + $0x284] ss:$16 sps:$4 sm:$0xff]   ;;  %v10079_v23 = vld [vmem:[#allocation7 + $0x28c] ss:$16 sps:$4 sm:$0xff]  }
 0x2da   :  { %5750 = vmatprep.subr.bf16.mxu1 %v10007_v9  ;;  %v10074_v9 = vld [vmem:[#allocation7 + $0x280] ss:$16 sps:$4 sm:$0xff]  }
 0x2dc   :  { %5587 = vmatpush1.bf16.msra.mxu0 %v10002_v62  ;;  %v10077_v62 = vld [vmem:[#allocation7 + $0x288] ss:$16 sps:$4 sm:$0xff]  }
 0x2dd   :  { %5751 = vmatpush1.bf16.msra.mxu1 %v10005_v0  ;;  %5588 = vmatprep.subr.bf16.mxu0 %v10010_v2  ;;  %v10082_v0 = vld [vmem:[#allocation7 + $0x2a4] ss:$16 sps:$4 sm:$0xff]   ;;  %v10085_v2 = vld [vmem:[#allocation7 + $0x2ac] ss:$16 sps:$4 sm:$0xff]  }
 0x2de   :  { %5752 = vmatprep.subr.bf16.mxu1 %v10013_v25  ;;  %v10080_v25 = vld [vmem:[#allocation7 + $0x2a0] ss:$16 sps:$4 sm:$0xff]  }
 0x2e0   :  { %5589 = vmatpush1.bf16.msra.mxu0 %v10008_v5  ;;  %v10083_v5 = vld [vmem:[#allocation7 + $0x2a8] ss:$16 sps:$4 sm:$0xff]  }
 0x2e1   :  { %5753 = vmatpush1.bf16.msra.mxu1 %v10011_v7  ;;  %5590 = vmatprep.subr.bf16.mxu0 %v10016_v8  ;;  %v10088_v7 = vld [vmem:[#allocation7 + $0x2c4] ss:$16 sps:$4 sm:$0xff]   ;;  %v10091_v8 = vld [vmem:[#allocation7 + $0x2cc] ss:$16 sps:$4 sm:$0xff]  }
 0x2e2   :  { %5754 = vmatprep.subr.bf16.mxu1 %v10019_v10  ;;  %v10086_v10 = vld [vmem:[#allocation7 + $0x2c0] ss:$16 sps:$4 sm:$0xff]  }
 0x2e4   :  { %5591 = vmatpush1.bf16.msra.mxu0 %v10014_v11  ;;  %v10089_v11 = vld [vmem:[#allocation7 + $0x2c8] ss:$16 sps:$4 sm:$0xff]  }
 0x2e5   :  { %5755 = vmatpush1.bf16.msra.mxu1 %v10017_v12  ;;  %5592 = vmatprep.subr.bf16.mxu0 %v10022_v13  ;;  %v10094_v12 = vld [vmem:[#allocation7 + $0x2e4] ss:$16 sps:$4 sm:$0xff]   ;;  %v10097_v13 = vld [vmem:[#allocation7 + $0x2ec] ss:$16 sps:$4 sm:$0xff]  }
 0x2e6   :  { %5756 = vmatprep.subr.bf16.mxu1 %v10025_v33  ;;  %v10092_v33 = vld [vmem:[#allocation7 + $0x2e0] ss:$16 sps:$4 sm:$0xff]  }
 0x2e8   :  { %5593 = vmatpush1.bf16.msra.mxu0 %v10020_v36  ;;  %v10095_v36 = vld [vmem:[#allocation7 + $0x2e8] ss:$16 sps:$4 sm:$0xff]  }
 0x2e9   :  { %5757 = vmatpush1.bf16.msra.mxu1 %v10023_v15  ;;  %5594 = vmatprep.subr.bf16.mxu0 %v10028_v17  ;;  %v10100_v15 = vld [vmem:[#allocation7 + $0x304] ss:$16 sps:$4 sm:$0xff]   ;;  %v10103_v17 = vld [vmem:[#allocation7 + $0x30c] ss:$16 sps:$4 sm:$0xff]  }
 0x2ea   :  { %5758 = vmatprep.subr.bf16.mxu1 %v10031_v18  ;;  %v10098_v18 = vld [vmem:[#allocation7 + $0x300] ss:$16 sps:$4 sm:$0xff]  }
 0x2ec   :  { %5595 = vmatpush1.bf16.msra.mxu0 %v10026_v43  ;;  %v10101_v43 = vld [vmem:[#allocation7 + $0x308] ss:$16 sps:$4 sm:$0xff]  }
 0x2ed   :  { %5759 = vmatpush1.bf16.msra.mxu1 %v10029_v59  ;;  %5596 = vmatprep.subr.bf16.mxu0 %v10034_v20  ;;  %v10106_v59 = vld [vmem:[#allocation7 + $0x324] ss:$16 sps:$4 sm:$0xff]   ;;  %v10109_v20 = vld [vmem:[#allocation7 + $0x32c] ss:$16 sps:$4 sm:$0xff]  }
 0x2ee   :  { %5760 = vmatprep.subr.bf16.mxu1 %v10037_v21  ;;  %v10104_v21 = vld [vmem:[#allocation7 + $0x320] ss:$16 sps:$4 sm:$0xff]  }
 0x2f0   :  { %5597 = vmatpush1.bf16.msra.mxu0 %v10032_v24  ;;  %v10107_v24 = vld [vmem:[#allocation7 + $0x328] ss:$16 sps:$4 sm:$0xff]  }
 0x2f1   :  { %5761 = vmatpush1.bf16.msra.mxu1 %v10035_v28  ;;  %5598 = vmatprep.subr.bf16.mxu0 %v10040_v29  ;;  %v10115_v28 = vld [vmem:[#allocation7 + $0x34c] ss:$16 sps:$4 sm:$0xff]   ;;  %v10110_v29 = vld [vmem:[#allocation7 + $0x340] ss:$16 sps:$4 sm:$0xff]  }
 0x2f2   :  { %5762 = vmatprep.subr.bf16.mxu1 %v10043_v4  ;;  %v10113_v4 = vld [vmem:[#allocation7 + $0x348] ss:$16 sps:$4 sm:$0xff]  }
 0x2f4   :  { %5599 = vmatpush1.bf16.msra.mxu0 %v10038_v61  ;;  %v10121_v61 = vld [vmem:[#allocation7 + $0x36c] ss:$16 sps:$4 sm:$0xff]  }
 0x2f5   :  { %5763 = vmatpush1.bf16.msra.mxu1 %v10041_v31  ;;  %5600 = vmatprep.subr.bf16.mxu0 %v10046_v32  ;;  %v10119_v31 = vld [vmem:[#allocation7 + $0x368] ss:$16 sps:$4 sm:$0xff]   ;;  %v10124_v32 = vld [vmem:[#allocation7 + $0x384] ss:$16 sps:$4 sm:$0xff]  }
 0x2f6   :  { %5764 = vmatprep.subr.bf16.mxu1 %v10049_v34  ;;  %v10127_v34 = vld [vmem:[#allocation7 + $0x38c] ss:$16 sps:$4 sm:$0xff]  }
 0x2f8   :  { %5601 = vmatpush1.bf16.msra.mxu0 %v10044_v63  ;;  %v11052_v63 = vsub.s32 2, %v10926_v44 }
 0x2f9   :  { %5765 = vmatpush1.bf16.msra.mxu1 %v10047_v57  ;;  %5611 = vmatprep.subr.bf16.mxu0 %v10052_v26  ;;  %v10130_v57 = vld [vmem:[#allocation7 + $0x3a4] ss:$16 sps:$4 sm:$0xff]   ;;  %v10133_v26 = vld [vmem:[#allocation7 + $0x3ac] ss:$16 sps:$4 sm:$0xff]  }
 0x2fa   :  { %5775 = vmatprep.subr.bf16.mxu1 %v10055_v14  ;;  %v10128_v14 = vld [vmem:[#allocation7 + $0x3a0] ss:$16 sps:$4 sm:$0xff]   ;;  %v751_v38 = vrot.slane %v11032_v6, %v11052_v63 }
 0x2fb   :  { %5603 = vmatmul.mubr.bf16.vlgmr.msra.gmra.mrb[8].mxu0 %v4004_v39 }
 0x2fc   :  { %5767 = vmatmul.mubr.bf16.vlgmr.msra.gmra.mrb[8].mxu1 %v4004_v39  ;;  %5612 = vmatpush1.bf16.msra.mxu0 %v10050_v56  ;;  %v10131_v56 = vld [vmem:[#allocation7 + $0x3a8] ss:$16 sps:$4 sm:$0xff]   ;;  %v10136_v39 = vld [vmem:[#allocation7 + $0x3c4] ss:$16 sps:$4 sm:$0xff]  }
 0x2fd   :  { %5643 = vmatprep.mubr.bf16.mxu0 %v4007_v42  ;;  %5776 = vmatpush1.bf16.msra.mxu1 %v10053_v40  ;;  %v10139_v40 = vld [vmem:[#allocation7 + $0x3cc] ss:$16 sps:$4 sm:$0xff]  }
 0x2fe   :  { %5807 = vmatprep.mubr.bf16.mxu1 %v4007_v42  ;;  %5613 = vmatprep.subr.bf16.mxu0 %v10058_v41  ;;  %v10134_v41 = vld [vmem:[#allocation7 + $0x3c0] ss:$16 sps:$4 sm:$0xff]   ;;  %v9842_v42 = vadd.f32 %v11023_v60, %v751_v38  ;;  %v10149_v60 = vld [vmem:[#allocation7 + $0x408] ss:$16 sps:$4 sm:$0xff]   ;;  %v10214_v38 = vld [vmem:[#allocation7 + $0x564] ss:$16 sps:$4 sm:$0xff]  }
 0x2ff   :  { %5777 = vmatprep.subr.bf16.mxu1 %v10061_v1  ;;  %v10137_v1 = vld [vmem:[#allocation7 + $0x3c8] ss:$16 sps:$4 sm:$0xff]  }
 0x300   :  { %5614 = vmatpush1.bf16.msra.mxu0 %v10056_v45  ;;  %v10142_v45 = vld [vmem:[#allocation7 + $0x3e4] ss:$16 sps:$4 sm:$0xff]  }
 0x301   :  { %5778 = vmatpush1.bf16.msra.mxu1 %v10059_v46  ;;  %5615 = vmatprep.subr.bf16.mxu0 %v10064_v47  ;;  %v10145_v46 = vld [vmem:[#allocation7 + $0x3ec] ss:$16 sps:$4 sm:$0xff]   ;;  %v10140_v47 = vld [vmem:[#allocation7 + $0x3e0] ss:$16 sps:$4 sm:$0xff]  }
 0x302   :  { %5779 = vmatprep.subr.bf16.mxu1 %v10067_v48  ;;  %v3998_v48 = vmax.f32 %v9842_v42, 0.0  ;;  %v10223_v42 = vld [vmem:[#allocation7 + $0x58c] ss:$16 sps:$4 sm:$0xff]  }
 0x304   :  { %5616 = vmatpush1.bf16.msra.mxu0 %v10062_v49  ;;  %v10143_v49 = vld [vmem:[#allocation7 + $0x3e8] ss:$16 sps:$4 sm:$0xff]  }
 0x305   :  { %5780 = vmatpush1.bf16.msra.mxu1 %v10065_v50  ;;  %5617 = vmatprep.subr.bf16.mxu0 %v10070_v51  ;;  %v10148_v50 = vld [vmem:[#allocation7 + $0x404] ss:$16 sps:$4 sm:$0xff]   ;;  %v10151_v51 = vld [vmem:[#allocation7 + $0x40c] ss:$16 sps:$4 sm:$0xff]  }
 0x306   :  { %5781 = vmatprep.subr.bf16.mxu1 %v10073_v52  ;;  %v10146_v52 = vld [vmem:[#allocation7 + $0x400] ss:$16 sps:$4 sm:$0xff]  }
 0x308   :  { %5618 = vmatpush1.bf16.msra.mxu0 %v10068_v16  ;;  %v4006_v16 = vpack.c.bf16 %v3998_v48, %v3998_v48  ;;  %v10224_v48 = vld [vmem:[#allocation7 + $0x5a0] ss:$16 sps:$4 sm:$0xff]  }
 0x309   :  { %5782 = vmatpush1.bf16.msra.mxu1 %v10071_v55  ;;  %5619 = vmatprep.subr.bf16.mxu0 %v10076_v58  ;;  %v10154_v55 = vld [vmem:[#allocation7 + $0x424] ss:$16 sps:$4 sm:$0xff]   ;;  %v10157_v58 = vld [vmem:[#allocation7 + $0x42c] ss:$16 sps:$4 sm:$0xff]  }
 0x30a   :  { %5783 = vmatprep.subr.bf16.mxu1 %v10079_v23  ;;  %v10152_v23 = vld [vmem:[#allocation7 + $0x420] ss:$16 sps:$4 sm:$0xff]  }
 0x30c   :  { %5620 = vmatpush1.bf16.msra.mxu0 %v10074_v9  ;;  %v10155_v9 = vld [vmem:[#allocation7 + $0x428] ss:$16 sps:$4 sm:$0xff]  }
 0x30d   :  { %5784 = vmatpush1.bf16.msra.mxu1 %v10077_v62  ;;  %5621 = vmatprep.subr.bf16.mxu0 %v10082_v0  ;;  %v10160_v62 = vld [vmem:[#allocation7 + $0x444] ss:$16 sps:$4 sm:$0xff]   ;;  %v10163_v0 = vld [vmem:[#allocation7 + $0x44c] ss:$16 sps:$4 sm:$0xff]  }
 0x30e   :  { %5785 = vmatprep.subr.bf16.mxu1 %v10085_v2  ;;  %v10158_v2 = vld [vmem:[#allocation7 + $0x440] ss:$16 sps:$4 sm:$0xff]  }
 0x310   :  { %5622 = vmatpush1.bf16.msra.mxu0 %v10080_v25  ;;  %v10161_v25 = vld [vmem:[#allocation7 + $0x448] ss:$16 sps:$4 sm:$0xff]  }
 0x311   :  { %5786 = vmatpush1.bf16.msra.mxu1 %v10083_v5  ;;  %5623 = vmatprep.subr.bf16.mxu0 %v10088_v7  ;;  %v10166_v5 = vld [vmem:[#allocation7 + $0x464] ss:$16 sps:$4 sm:$0xff]   ;;  %v10169_v7 = vld [vmem:[#allocation7 + $0x46c] ss:$16 sps:$4 sm:$0xff]  }
 0x312   :  { %5787 = vmatprep.subr.bf16.mxu1 %v10091_v8  ;;  %v10164_v8 = vld [vmem:[#allocation7 + $0x460] ss:$16 sps:$4 sm:$0xff]  }
 0x314   :  { %5624 = vmatpush1.bf16.msra.mxu0 %v10086_v10  ;;  %v10167_v10 = vld [vmem:[#allocation7 + $0x468] ss:$16 sps:$4 sm:$0xff]  }
 0x315   :  { %5788 = vmatpush1.bf16.msra.mxu1 %v10089_v11  ;;  %5625 = vmatprep.subr.bf16.mxu0 %v10094_v12  ;;  %v10172_v11 = vld [vmem:[#allocation7 + $0x484] ss:$16 sps:$4 sm:$0xff]   ;;  %v10175_v12 = vld [vmem:[#allocation7 + $0x48c] ss:$16 sps:$4 sm:$0xff]  }
 0x316   :  { %5789 = vmatprep.subr.bf16.mxu1 %v10097_v13  ;;  %v10170_v13 = vld [vmem:[#allocation7 + $0x480] ss:$16 sps:$4 sm:$0xff]  }
 0x318   :  { %5626 = vmatpush1.bf16.msra.mxu0 %v10092_v33  ;;  %v10173_v33 = vld [vmem:[#allocation7 + $0x488] ss:$16 sps:$4 sm:$0xff]  }
 0x319   :  { %5790 = vmatpush1.bf16.msra.mxu1 %v10095_v36  ;;  %5627 = vmatprep.subr.bf16.mxu0 %v10100_v15  ;;  %v10178_v36 = vld [vmem:[#allocation7 + $0x4a4] ss:$16 sps:$4 sm:$0xff]   ;;  %v10181_v15 = vld [vmem:[#allocation7 + $0x4ac] ss:$16 sps:$4 sm:$0xff]  }
 0x31a   :  { %5791 = vmatprep.subr.bf16.mxu1 %v10103_v17  ;;  %v10176_v17 = vld [vmem:[#allocation7 + $0x4a0] ss:$16 sps:$4 sm:$0xff]  }
 0x31c   :  { %5628 = vmatpush1.bf16.msra.mxu0 %v10098_v18  ;;  %v10179_v18 = vld [vmem:[#allocation7 + $0x4a8] ss:$16 sps:$4 sm:$0xff]  }
 0x31d   :  { %5792 = vmatpush1.bf16.msra.mxu1 %v10101_v43  ;;  %5629 = vmatprep.subr.bf16.mxu0 %v10106_v59  ;;  %v10184_v43 = vld [vmem:[#allocation7 + $0x4c4] ss:$16 sps:$4 sm:$0xff]   ;;  %v10187_v59 = vld [vmem:[#allocation7 + $0x4cc] ss:$16 sps:$4 sm:$0xff]  }
 0x31e   :  { %5793 = vmatprep.subr.bf16.mxu1 %v10109_v20  ;;  %v10182_v20 = vld [vmem:[#allocation7 + $0x4c0] ss:$16 sps:$4 sm:$0xff]  }
 0x320   :  { %5630 = vmatpush1.bf16.msra.mxu0 %v10104_v21  ;;  %v10185_v21 = vld [vmem:[#allocation7 + $0x4c8] ss:$16 sps:$4 sm:$0xff]  }
 0x321   :  { %5794 = vmatpush1.bf16.msra.mxu1 %v10107_v24  ;;  %5631 = vmatprep.subr.bf16.mxu0 %v10112_v27  ;;  %v10190_v24 = vld [vmem:[#allocation7 + $0x4e4] ss:$16 sps:$4 sm:$0xff]   ;;  %v10193_v27 = vld [vmem:[#allocation7 + $0x4ec] ss:$16 sps:$4 sm:$0xff]  }
 0x322   :  { %5795 = vmatprep.subr.bf16.mxu1 %v10115_v28  ;;  %v10188_v28 = vld [vmem:[#allocation7 + $0x4e0] ss:$16 sps:$4 sm:$0xff]  }
 0x324   :  { %5632 = vmatpush1.bf16.msra.mxu0 %v10110_v29  ;;  %v10191_v29 = vld [vmem:[#allocation7 + $0x4e8] ss:$16 sps:$4 sm:$0xff]  }
 0x325   :  { %5796 = vmatpush1.bf16.msra.mxu1 %v10113_v4  ;;  %5633 = vmatprep.subr.bf16.mxu0 %v10118_v54  ;;  %v10196_v4 = vld [vmem:[#allocation7 + $0x504] ss:$16 sps:$4 sm:$0xff]   ;;  %v10199_v54 = vld [vmem:[#allocation7 + $0x50c] ss:$16 sps:$4 sm:$0xff]  }
 0x326   :  { %5797 = vmatprep.subr.bf16.mxu1 %v10121_v61  ;;  %v10194_v61 = vld [vmem:[#allocation7 + $0x500] ss:$16 sps:$4 sm:$0xff]  }
 0x328   :  { %5634 = vmatpush1.bf16.msra.mxu0 %v10116_v30  ;;  %v10197_v30 = vld [vmem:[#allocation7 + $0x508] ss:$16 sps:$4 sm:$0xff]  }
 0x329   :  { %5798 = vmatpush1.bf16.msra.mxu1 %v10119_v31  ;;  %5635 = vmatprep.subr.bf16.mxu0 %v10124_v32  ;;  %v10202_v31 = vld [vmem:[#allocation7 + $0x524] ss:$16 sps:$4 sm:$0xff]   ;;  %v10205_v32 = vld [vmem:[#allocation7 + $0x52c] ss:$16 sps:$4 sm:$0xff]  }
 0x32a   :  { %5799 = vmatprep.subr.bf16.mxu1 %v10127_v34  ;;  %v10200_v34 = vld [vmem:[#allocation7 + $0x520] ss:$16 sps:$4 sm:$0xff]  }
 0x32c   :  { %5636 = vmatpush1.bf16.msra.mxu0 %v10122_v35  ;;  %v10203_v35 = vld [vmem:[#allocation7 + $0x528] ss:$16 sps:$4 sm:$0xff]  }
 0x32d   :  { %5800 = vmatpush1.bf16.msra.mxu1 %v10125_v37  ;;  %5637 = vmatprep.subr.bf16.mxu0 %v10130_v57  ;;  %v10208_v37 = vld [vmem:[#allocation7 + $0x544] ss:$16 sps:$4 sm:$0xff]   ;;  %v10211_v57 = vld [vmem:[#allocation7 + $0x54c] ss:$16 sps:$4 sm:$0xff]  }
 0x32e   :  { %5801 = vmatprep.subr.bf16.mxu1 %v10133_v26  ;;  %v10206_v26 = vld [vmem:[#allocation7 + $0x540] ss:$16 sps:$4 sm:$0xff]  }
 0x330   :  { %5638 = vmatpush1.bf16.msra.mxu0 %v10128_v14  ;;  %v10209_v14 = vld [vmem:[#allocation7 + $0x548] ss:$16 sps:$4 sm:$0xff]  }
 0x331   :  { %5802 = vmatpush1.bf16.msra.mxu1 %v10131_v56  ;;  %5639 = vmatprep.subr.bf16.mxu0 %v10136_v39  ;;  %v10217_v56 = vld [vmem:[#allocation7 + $0x56c] ss:$16 sps:$4 sm:$0xff]   ;;  %v10212_v39 = vld [vmem:[#allocation7 + $0x560] ss:$16 sps:$4 sm:$0xff]  }
 0x332   :  { %5803 = vmatprep.subr.bf16.mxu1 %v10139_v40  ;;  %v10215_v40 = vld [vmem:[#allocation7 + $0x568] ss:$16 sps:$4 sm:$0xff]  }
 0x334   :  { %5640 = vmatpush1.bf16.msra.mxu0 %v10134_v41  ;;  %v10220_v41 = vld [vmem:[#allocation7 + $0x584] ss:$16 sps:$4 sm:$0xff]  }
 0x335   :  { %5804 = vmatpush1.bf16.msra.mxu1 %v10137_v1  ;;  %5641 = vmatprep.subr.bf16.mxu0 %v10142_v45  ;;  %v10218_v1 = vld [vmem:[#allocation7 + $0x580] ss:$16 sps:$4 sm:$0xff]   ;;  %v10221_v45 = vld [vmem:[#allocation7 + $0x588] ss:$16 sps:$4 sm:$0xff]  }
 0x336   :  { %5805 = vmatprep.subr.bf16.mxu1 %v10145_v46  ;;  %v10226_v46 = vld [vmem:[#allocation7 + $0x5a4] ss:$16 sps:$4 sm:$0xff]  }
 0x338   :  { %5642 = vmatpush1.bf16.msra.mxu0 %v10140_v47  ;;  %v10229_v47 = vld [vmem:[#allocation7 + $0x5ac] ss:$16 sps:$4 sm:$0xff]  }
 0x339   :  { %5806 = vmatpush1.bf16.msra.mxu1 %v10143_v49  ;;  %5652 = vmatprep.subr.bf16.mxu0 %v10148_v50  ;;  %v10227_v49 = vld [vmem:[#allocation7 + $0x5a8] ss:$16 sps:$4 sm:$0xff]   ;;  %v10232_v50 = vld [vmem:[#allocation7 + $0x5c4] ss:$16 sps:$4 sm:$0xff]  }
 0x33a   :  { %5816 = vmatprep.subr.bf16.mxu1 %v10151_v51  ;;  %v10235_v51 = vld [vmem:[#allocation7 + $0x5cc] ss:$16 sps:$4 sm:$0xff]  }
 0x33b   :  { %5644 = vmatmul.mubr.bf16.vlgmr.msra.gmra.mrb[8].mxu0 %v4006_v16 }
 0x33c   :  { %5808 = vmatmul.mubr.bf16.vlgmr.msra.gmra.mrb[8].mxu1 %v4006_v16  ;;  %5653 = vmatpush1.bf16.msra.mxu0 %v10146_v52  ;;  %v10230_v52 = vld [vmem:[#allocation7 + $0x5c0] ss:$16 sps:$4 sm:$0xff]   ;;  %v10233_v16 = vld [vmem:[#allocation7 + $0x5c8] ss:$16 sps:$4 sm:$0xff]  }
 0x33d   :  { %5817 = vmatpush1.bf16.msra.mxu1 %v10149_v60  ;;  %5654 = vmatprep.subr.bf16.mxu0 %v10154_v55  ;;  %v10238_v60 = vld [vmem:[#allocation7 + $0x5e4] ss:$16 sps:$4 sm:$0xff]   ;;  %v10241_v55 = vld [vmem:[#allocation7 + $0x5ec] ss:$16 sps:$4 sm:$0xff]  }
 0x33e   :  { %5818 = vmatprep.subr.bf16.mxu1 %v10157_v58  ;;  %v10236_v58 = vld [vmem:[#allocation7 + $0x5e0] ss:$16 sps:$4 sm:$0xff]  }
 0x340   :  { %5655 = vmatpush1.bf16.msra.mxu0 %v10152_v23  ;;  %v10239_v23 = vld [vmem:[#allocation7 + $0x5e8] ss:$16 sps:$4 sm:$0xff]  }
 0x341   :  { %5819 = vmatpush1.bf16.msra.mxu1 %v10155_v9  ;;  %5656 = vmatprep.subr.bf16.mxu0 %v10160_v62  ;;  %v10244_v9 = vld [vmem:[#allocation7 + $0x604] ss:$16 sps:$4 sm:$0xff]   ;;  %v10247_v62 = vld [vmem:[#allocation7 + $0x60c] ss:$16 sps:$4 sm:$0xff]  }
 0x342   :  { %5820 = vmatprep.subr.bf16.mxu1 %v10163_v0  ;;  %v11058_v0 = vsub.s32 4, %v10926_v44 }
 0x344   :  { %5657 = vmatpush1.bf16.msra.mxu0 %v10158_v2  ;;  %v11061_v2 = vsub.s32 5, %v10926_v44 }
 0x345   :  { %5821 = vmatpush1.bf16.msra.mxu1 %v10161_v25  ;;  %5658 = vmatprep.subr.bf16.mxu0 %v10166_v5  ;;  %v11064_v25 = vsub.s32 7, %v10926_v44  ;;  %v759_v5 = vrot.slane %v11032_v6, %v11058_v0 }
 0x346   :  { %5822 = vmatprep.subr.bf16.mxu1 %v10169_v7  ;;  %v763_v7 = vrot.slane %v11032_v6, %v11061_v2 }
 0x348   :  { %5659 = vmatpush1.bf16.msra.mxu0 %v10164_v8  ;;  %v771_v8 = vrot.slane %v11032_v6, %v11064_v25  ;;  %v10250_v6 = vld [vmem:[#allocation7 + $0x624] ss:$16 sps:$4 sm:$0xff]  }
 0x349   :  { %5823 = vmatpush1.bf16.msra.mxu1 %v10167_v10  ;;  %5660 = vmatprep.subr.bf16.mxu0 %v10172_v11 }
 0x34a   :  { %5824 = vmatprep.subr.bf16.mxu1 %v10175_v12 }
 0x34c   :  { %5661 = vmatpush1.bf16.msra.mxu0 %v10170_v13 }
 0x34d   :  { %5825 = vmatpush1.bf16.msra.mxu1 %v10173_v33  ;;  %5662 = vmatprep.subr.bf16.mxu0 %v10178_v36 }
 0x34e   :  { %5826 = vmatprep.subr.bf16.mxu1 %v10181_v15 }
 0x350   :  { %5663 = vmatpush1.bf16.msra.mxu0 %v10176_v17 }
 0x351   :  { %5827 = vmatpush1.bf16.msra.mxu1 %v10179_v18  ;;  %5664 = vmatprep.subr.bf16.mxu0 %v10184_v43 }
 0x352   :  { %5828 = vmatprep.subr.bf16.mxu1 %v10187_v59 }
 0x354   :  { %5665 = vmatpush1.bf16.msra.mxu0 %v10182_v20 }
 0x355   :  { %5829 = vmatpush1.bf16.msra.mxu1 %v10185_v21  ;;  %5666 = vmatprep.subr.bf16.mxu0 %v10190_v24 }
 0x356   :  { %5830 = vmatprep.subr.bf16.mxu1 %v10193_v27 }
 0x358   :  { %5667 = vmatpush1.bf16.msra.mxu0 %v10188_v28  ;;  %v10242_v28 = vld [vmem:[#allocation7 + $0x600] ss:$16 sps:$4 sm:$0xff]  }
 0x359   :  { %5831 = vmatpush1.bf16.msra.mxu1 %v10191_v29  ;;  %5668 = vmatprep.subr.bf16.mxu0 %v10196_v4  ;;  %v10245_v29 = vld [vmem:[#allocation7 + $0x608] ss:$16 sps:$4 sm:$0xff]  }
 0x35a   :  { %5832 = vmatprep.subr.bf16.mxu1 %v10199_v54  ;;  %v10253_v54 = vld [vmem:[#allocation7 + $0x62c] ss:$16 sps:$4 sm:$0xff]  }
 0x35c   :  { %5669 = vmatpush1.bf16.msra.mxu0 %v10194_v61 }
 0x35d   :  { %5833 = vmatpush1.bf16.msra.mxu1 %v10197_v30  ;;  %5670 = vmatprep.subr.bf16.mxu0 %v10202_v31  ;;  %v10248_v30 = vld [vmem:[#allocation7 + $0x620] ss:$16 sps:$4 sm:$0xff]   ;;  %v10251_v31 = vld [vmem:[#allocation7 + $0x628] ss:$16 sps:$4 sm:$0xff]  }
 0x35e   :  { %5834 = vmatprep.subr.bf16.mxu1 %v10205_v32  ;;  %v10256_v32 = vld [vmem:[#allocation7 + $0x644] ss:$16 sps:$4 sm:$0xff]  }
 0x360   :  { %5671 = vmatpush1.bf16.msra.mxu0 %v10200_v34  ;;  %v10259_v34 = vld [vmem:[#allocation7 + $0x64c] ss:$16 sps:$4 sm:$0xff]  }
 0x361   :  { %5835 = vmatpush1.bf16.msra.mxu1 %v10203_v35  ;;  %5672 = vmatprep.subr.bf16.mxu0 %v10208_v37  ;;  %v10254_v35 = vld [vmem:[#allocation7 + $0x640] ss:$16 sps:$4 sm:$0xff]   ;;  %v10257_v37 = vld [vmem:[#allocation7 + $0x648] ss:$16 sps:$4 sm:$0xff]  }
 0x362   :  { %5836 = vmatprep.subr.bf16.mxu1 %v10211_v57  ;;  %v10262_v57 = vld [vmem:[#allocation7 + $0x664] ss:$16 sps:$4 sm:$0xff]  }
 0x364   :  { %5673 = vmatpush1.bf16.msra.mxu0 %v10206_v26  ;;  %v10265_v26 = vld [vmem:[#allocation7 + $0x66c] ss:$16 sps:$4 sm:$0xff]  }
 0x365   :  { %5837 = vmatpush1.bf16.msra.mxu1 %v10209_v14  ;;  %5674 = vmatprep.subr.bf16.mxu0 %v10214_v38  ;;  %v10260_v14 = vld [vmem:[#allocation7 + $0x660] ss:$16 sps:$4 sm:$0xff]   ;;  %v10263_v38 = vld [vmem:[#allocation7 + $0x668] ss:$16 sps:$4 sm:$0xff]  }
 0x366   :  { %5838 = vmatprep.subr.bf16.mxu1 %v10217_v56  ;;  %v10268_v56 = vld [vmem:[#allocation7 + $0x684] ss:$16 sps:$4 sm:$0xff]  }
 0x368   :  { %5675 = vmatpush1.bf16.msra.mxu0 %v10212_v39  ;;  %v10271_v39 = vld [vmem:[#allocation7 + $0x68c] ss:$16 sps:$4 sm:$0xff]  }
 0x369   :  { %5839 = vmatpush1.bf16.msra.mxu1 %v10215_v40  ;;  %5676 = vmatprep.subr.bf16.mxu0 %v10220_v41  ;;  %v10266_v40 = vld [vmem:[#allocation7 + $0x680] ss:$16 sps:$4 sm:$0xff]   ;;  %v10269_v41 = vld [vmem:[#allocation7 + $0x688] ss:$16 sps:$4 sm:$0xff]  }
 0x36a   :  { %5840 = vmatprep.subr.bf16.mxu1 %v10223_v42  ;;  %v10274_v42 = vld [vmem:[#allocation7 + $0x6a4] ss:$16 sps:$4 sm:$0xff]  }
 0x36c   :  { %5677 = vmatpush1.bf16.msra.mxu0 %v10218_v1  ;;  %v10277_v1 = vld [vmem:[#allocation7 + $0x6ac] ss:$16 sps:$4 sm:$0xff]  }
 0x36d   :  { %5841 = vmatpush1.bf16.msra.mxu1 %v10221_v45  ;;  %5678 = vmatprep.subr.bf16.mxu0 %v10226_v46  ;;  %v10272_v45 = vld [vmem:[#allocation7 + $0x6a0] ss:$16 sps:$4 sm:$0xff]   ;;  %v10275_v46 = vld [vmem:[#allocation7 + $0x6a8] ss:$16 sps:$4 sm:$0xff]  }
 0x36e   :  { %5842 = vmatprep.subr.bf16.mxu1 %v10229_v47  ;;  %v10280_v47 = vld [vmem:[#allocation7 + $0x6c4] ss:$16 sps:$4 sm:$0xff]  }
 0x370   :  { %5679 = vmatpush1.bf16.msra.mxu0 %v10224_v48  ;;  %v10283_v48 = vld [vmem:[#allocation7 + $0x6cc] ss:$16 sps:$4 sm:$0xff]  }
 0x371   :  { %5843 = vmatpush1.bf16.msra.mxu1 %v10227_v49  ;;  %5680 = vmatprep.subr.bf16.mxu0 %v10232_v50  ;;  %v10278_v49 = vld [vmem:[#allocation7 + $0x6c0] ss:$16 sps:$4 sm:$0xff]   ;;  %v10281_v50 = vld [vmem:[#allocation7 + $0x6c8] ss:$16 sps:$4 sm:$0xff]  }
 0x372   :  { %5844 = vmatprep.subr.bf16.mxu1 %v10235_v51  ;;  %v10286_v51 = vld [vmem:[#allocation7 + $0x6e4] ss:$16 sps:$4 sm:$0xff]  }
 0x374   :  { %5681 = vmatpush1.bf16.msra.mxu0 %v10230_v52  ;;  %v10289_v52 = vld [vmem:[#allocation7 + $0x6ec] ss:$16 sps:$4 sm:$0xff]  }
 0x375   :  { %5845 = vmatpush1.bf16.msra.mxu1 %v10233_v16  ;;  %5682 = vmatprep.subr.bf16.mxu0 %v10238_v60  ;;  %v10284_v16 = vld [vmem:[#allocation7 + $0x6e0] ss:$16 sps:$4 sm:$0xff]   ;;  %v10287_v60 = vld [vmem:[#allocation7 + $0x6e8] ss:$16 sps:$4 sm:$0xff]  }
 0x376   :  { %5846 = vmatprep.subr.bf16.mxu1 %v10241_v55  ;;  %v10292_v55 = vld [vmem:[#allocation7 + $0x704] ss:$16 sps:$4 sm:$0xff]  }
 0x378   :  { %5683 = vmatpush1.bf16.msra.mxu0 %v10236_v58  ;;  %v10295_v58 = vld [vmem:[#allocation7 + $0x70c] ss:$16 sps:$4 sm:$0xff]  }
 0x379   :  { %5847 = vmatpush1.bf16.msra.mxu1 %v10239_v23  ;;  %5693 = vmatprep.subr.bf16.mxu0 %v10244_v9  ;;  %v10290_v23 = vld [vmem:[#allocation7 + $0x700] ss:$16 sps:$4 sm:$0xff]   ;;  %v10293_v9 = vld [vmem:[#allocation7 + $0x708] ss:$16 sps:$4 sm:$0xff]  }
 0x37a   :  { %5857 = vmatprep.subr.bf16.mxu1 %v10247_v62  ;;  %v10298_v62 = vld [vmem:[#allocation7 + $0x724] ss:$16 sps:$4 sm:$0xff]  }
 0x38e   :  { %v3825_v10 = vpop.f32.mrb[4].mxu0  ;;  %v11072_v12 = vpop.f32.mrb[4].mxu1 }
 0x38f   :  { %v9844_v11 = vadd.f32 %v3825_v10, %v759_v5  ;;  %v3827_v13 = vpop.f32.mrb[5].mxu0  ;;  %v3991_v36 = vpop.f32.mrb[5].mxu1  ;;  %v10301_v5 = vld [vmem:[#allocation7 + $0x72c] ss:$16 sps:$4 sm:$0xff]   ;;  %v10304_v10 = vld [vmem:[#allocation7 + $0x744] ss:$16 sps:$4 sm:$0xff]  }
 0x390   :  { %v9845_v33 = vadd.f32 %v3827_v13, %v763_v7  ;;  %v3829_v15 = vpop.f32.mrb[6].mxu0  ;;  %v9847_v18 = vadd.f32 %v3991_v36, %v771_v8  ;;  %v3993_v43 = vpop.f32.mrb[6].mxu1  ;;  %v10296_v7 = vld [vmem:[#allocation7 + $0x720] ss:$16 sps:$4 sm:$0xff]   ;;  %v10299_v8 = vld [vmem:[#allocation7 + $0x728] ss:$16 sps:$4 sm:$0xff]  }
 0x391   :  { %v4000_v17 = vmax.f32 %v9844_v11, 0.0  ;;  %v3830_v59 = vpop.f32.mrb[7].mxu0  ;;  %v3994_v21 = vpop.f32.mrb[7].mxu1  ;;  %v10307_v11 = vld [vmem:[#allocation7 + $0x74c] ss:$16 sps:$4 sm:$0xff]  }
 0x392   :  { %v4001_v20 = vmax.f32 %v9845_v33, 0.0  ;;  %v4003_v24 = vmax.f32 %v9847_v18, 0.0  ;;  %v10302_v13 = vld [vmem:[#allocation7 + $0x740] ss:$16 sps:$4 sm:$0xff]   ;;  %v10305_v33 = vld [vmem:[#allocation7 + $0x748] ss:$16 sps:$4 sm:$0xff]  }
 0x393   :  { %v4008_v4 = vpack.c.bf16 %v4000_v17, %v4000_v17  ;;  %v10310_v36 = vld [vmem:[#allocation7 + $0x764] ss:$16 sps:$4 sm:$0xff]   ;;  %v10313_v15 = vld [vmem:[#allocation7 + $0x76c] ss:$16 sps:$4 sm:$0xff]   ;;  %v10308_v17 = vld [vmem:[#allocation7 + $0x760] ss:$16 sps:$4 sm:$0xff]  }
 0x394   :  { %v4009_v27 = vpack.c.bf16 %v4001_v20, %v4001_v20  ;;  %v4011_v61 = vpack.c.bf16 %v4003_v24, %v4003_v24  ;;  %v10311_v18 = vld [vmem:[#allocation7 + $0x768] ss:$16 sps:$4 sm:$0xff]   ;;  %v10316_v43 = vld [vmem:[#allocation7 + $0x784] ss:$16 sps:$4 sm:$0xff]   ;;  %v10319_v59 = vld [vmem:[#allocation7 + $0x78c] ss:$16 sps:$4 sm:$0xff]  }
 0x395   :  { %v10314_v20 = vld [vmem:[#allocation7 + $0x780] ss:$16 sps:$4 sm:$0xff]   ;;  %v10317_v21 = vld [vmem:[#allocation7 + $0x788] ss:$16 sps:$4 sm:$0xff]   ;;  %v11075_v24 = vsub.s32 6, %v10926_v44 }
 0x396   :  { %5684 = vmatprep.mubr.bf16.mxu0 %v4009_v27  ;;  %5848 = vmatprep.mubr.bf16.mxu1 %v4009_v27  ;;  %v10322_v27 = vld [vmem:[#allocation7 + $0x7a4] ss:$16 sps:$4 sm:$0xff]   ;;  %v10329_v44 = vld [vmem:[#allocation7 + $0x7c8] ss:$16 sps:$4 sm:$0xff]  }
 0x397   :  { %5685 = vmatmul.mubr.bf16.vlgmr.msra.gmra.mrb[8].mxu0 %v4008_v4  ;;  %5849 = vmatmul.mubr.bf16.vlgmr.msra.gmra.mrb[8].mxu1 %v4008_v4  ;;  %v10323_v4 = vld [vmem:[#allocation7 + $0x7a8] ss:$16 sps:$4 sm:$0xff]  }
 0x398   :  { %5694 = vmatpush1.bf16.msra.mxu0 %v10242_v28  ;;  %5858 = vmatpush1.bf16.msra.mxu1 %v10245_v29  ;;  %v10325_v28 = vld [vmem:[#allocation7 + $0x7ac] ss:$16 sps:$4 sm:$0xff]   ;;  %v10320_v29 = vld [vmem:[#allocation7 + $0x7a0] ss:$16 sps:$4 sm:$0xff]  }
 0x399   :  { %5725 = vmatprep.mubr.bf16.mxu0 %v4011_v61  ;;  %5889 = vmatprep.mubr.bf16.mxu1 %v4011_v61  ;;  %v10328_v61 = vld [vmem:[#allocation7 + $0x7c4] ss:$16 sps:$4 sm:$0xff]  }
 0x39a   :  { %5695 = vmatprep.subr.bf16.mxu0 %v10250_v6  ;;  %5859 = vmatprep.subr.bf16.mxu1 %v10253_v54  ;;  %v10452_v6 = vld [vmem:[#allocation5] sm:$0xff] }
 0x39b   :  { %v767_v54 = vrot.slane %v10452_v6, %v11075_v24  ;;  %v6428_v6 = vld [vmem:[#allocation13 + $0x140] sm:$0xff] }
 0x39c   :  { %5696 = vmatpush1.bf16.msra.mxu0 %v10248_v30  ;;  %5860 = vmatpush1.bf16.msra.mxu1 %v10251_v31  ;;  %v10331_v30 = vld [vmem:[#allocation7 + $0x7cc] ss:$16 sps:$4 sm:$0xff]   ;;  %v10326_v31 = vld [vmem:[#allocation7 + $0x7c0] ss:$16 sps:$4 sm:$0xff]  }
 0x39d   :  { %5697 = vmatprep.subr.bf16.mxu0 %v10256_v32  ;;  %5861 = vmatprep.subr.bf16.mxu1 %v10259_v34  ;;  %v9846_v32 = vadd.f32 %v11072_v12, %v767_v54  ;;  %v10334_v34 = vld [vmem:[#allocation7 + $0x7e4] ss:$16 sps:$4 sm:$0xff]  }
 0x39e   :  { %v10341_v12 = vld [vmem:[#allocation10 + $0x10] ss:$8 sps:$4 sm:$0xff]  }
 0x3a0   :  { %5698 = vmatpush1.bf16.msra.mxu0 %v10254_v35  ;;  %5862 = vmatpush1.bf16.msra.mxu1 %v10257_v37  ;;  %v10337_v35 = vld [vmem:[#allocation7 + $0x7ec] ss:$16 sps:$4 sm:$0xff]   ;;  %v10332_v37 = vld [vmem:[#allocation7 + $0x7e0] ss:$16 sps:$4 sm:$0xff]  }
 0x3a1   :  { %5699 = vmatprep.subr.bf16.mxu0 %v10262_v57  ;;  %5863 = vmatprep.subr.bf16.mxu1 %v10265_v26  ;;  %v10335_v57 = vld [vmem:[#allocation7 + $0x7e8] ss:$16 sps:$4 sm:$0xff]   ;;  %v4002_v26 = vmax.f32 %v9846_v32, 0.0 }
 0x3a4   :  { %5700 = vmatpush1.bf16.msra.mxu0 %v10260_v14  ;;  %5864 = vmatpush1.bf16.msra.mxu1 %v10263_v38  ;;  %v10340_v14 = vld [vmem:[#allocation10 + $0x4] ss:$8 sps:$4 sm:$0xff]   ;;  %v10338_v38 = vld [vmem:[#allocation10] ss:$8 sps:$4 sm:$0xff]  }
 0x3a5   :  { %5701 = vmatprep.subr.bf16.mxu0 %v10268_v56  ;;  %5865 = vmatprep.subr.bf16.mxu1 %v10271_v39  ;;  %v4010_v56 = vpack.c.bf16 %v4002_v26, %v4002_v26  ;;  %v10343_v39 = vld [vmem:[#allocation10 + $0x14] ss:$8 sps:$4 sm:$0xff]   ;;  %v6468_v26 = vld [vmem:[#allocation13 + $0x280] sm:$0xff] }
 0x3a8   :  { %5702 = vmatpush1.bf16.msra.mxu0 %v10266_v40  ;;  %5866 = vmatpush1.bf16.msra.mxu1 %v10269_v41  ;;  %v10346_v40 = vld [vmem:[#allocation10 + $0x24] ss:$8 sps:$4 sm:$0xff]   ;;  %v10344_v41 = vld [vmem:[#allocation10 + $0x20] ss:$8 sps:$4 sm:$0xff]  }
 0x3a9   :  { %5703 = vmatprep.subr.bf16.mxu0 %v10274_v42  ;;  %5867 = vmatprep.subr.bf16.mxu1 %v10277_v1  ;;  %v10349_v42 = vld [vmem:[#allocation10 + $0x34] ss:$8 sps:$4 sm:$0xff]   ;;  %v10347_v1 = vld [vmem:[#allocation10 + $0x30] ss:$8 sps:$4 sm:$0xff]  }
 0x3ac   :  { %5704 = vmatpush1.bf16.msra.mxu0 %v10272_v45  ;;  %5868 = vmatpush1.bf16.msra.mxu1 %v10275_v46  ;;  %v10352_v45 = vld [vmem:[#allocation10 + $0x44] ss:$8 sps:$4 sm:$0xff]   ;;  %v10350_v46 = vld [vmem:[#allocation10 + $0x40] ss:$8 sps:$4 sm:$0xff]  }
 0x3ad   :  { %5705 = vmatprep.subr.bf16.mxu0 %v10280_v47  ;;  %5869 = vmatprep.subr.bf16.mxu1 %v10283_v48  ;;  %v10355_v47 = vld [vmem:[#allocation10 + $0x54] ss:$8 sps:$4 sm:$0xff]   ;;  %v10353_v48 = vld [vmem:[#allocation10 + $0x50] ss:$8 sps:$4 sm:$0xff]  }
 0x3b0   :  { %5706 = vmatpush1.bf16.msra.mxu0 %v10278_v49  ;;  %5870 = vmatpush1.bf16.msra.mxu1 %v10281_v50  ;;  %v10358_v49 = vld [vmem:[#allocation10 + $0x64] ss:$8 sps:$4 sm:$0xff]   ;;  %v10356_v50 = vld [vmem:[#allocation10 + $0x60] ss:$8 sps:$4 sm:$0xff]  }
 0x3b1   :  { %5707 = vmatprep.subr.bf16.mxu0 %v10286_v51  ;;  %5871 = vmatprep.subr.bf16.mxu1 %v10289_v52  ;;  %v10361_v51 = vld [vmem:[#allocation10 + $0x74] ss:$8 sps:$4 sm:$0xff]   ;;  %v10359_v52 = vld [vmem:[#allocation10 + $0x70] ss:$8 sps:$4 sm:$0xff]  }
 0x3b4   :  { %5708 = vmatpush1.bf16.msra.mxu0 %v10284_v16  ;;  %5872 = vmatpush1.bf16.msra.mxu1 %v10287_v60  ;;  %v10364_v16 = vld [vmem:[#allocation10 + $0x84] ss:$8 sps:$4 sm:$0xff]   ;;  %v10362_v60 = vld [vmem:[#allocation10 + $0x80] ss:$8 sps:$4 sm:$0xff]  }
 0x3b5   :  { %5709 = vmatprep.subr.bf16.mxu0 %v10292_v55  ;;  %5873 = vmatprep.subr.bf16.mxu1 %v10295_v58  ;;  %v10367_v55 = vld [vmem:[#allocation10 + $0x94] ss:$8 sps:$4 sm:$0xff]   ;;  %v10365_v58 = vld [vmem:[#allocation10 + $0x90] ss:$8 sps:$4 sm:$0xff]  }
 0x3b8   :  { %5710 = vmatpush1.bf16.msra.mxu0 %v10290_v23  ;;  %5874 = vmatpush1.bf16.msra.mxu1 %v10293_v9  ;;  %v10370_v23 = vld [vmem:[#allocation10 + $0xa4] ss:$8 sps:$4 sm:$0xff]   ;;  %v10368_v9 = vld [vmem:[#allocation10 + $0xa0] ss:$8 sps:$4 sm:$0xff]  }
 0x3b9   :  { %5711 = vmatprep.subr.bf16.mxu0 %v10298_v62  ;;  %5875 = vmatprep.subr.bf16.mxu1 %v10301_v5  ;;  %v10373_v62 = vld [vmem:[#allocation10 + $0xb4] ss:$8 sps:$4 sm:$0xff]   ;;  %v10371_v5 = vld [vmem:[#allocation10 + $0xb0] ss:$8 sps:$4 sm:$0xff]  }
 0x3bc   :  { %5712 = vmatpush1.bf16.msra.mxu0 %v10296_v7  ;;  %5876 = vmatpush1.bf16.msra.mxu1 %v10299_v8  ;;  %v10376_v7 = vld [vmem:[#allocation10 + $0xc4] ss:$8 sps:$4 sm:$0xff]   ;;  %v10374_v8 = vld [vmem:[#allocation10 + $0xc0] ss:$8 sps:$4 sm:$0xff]  }
 0x3bd   :  { %5713 = vmatprep.subr.bf16.mxu0 %v10304_v10  ;;  %5877 = vmatprep.subr.bf16.mxu1 %v10307_v11  ;;  %v10379_v10 = vld [vmem:[#allocation10 + $0xd4] ss:$8 sps:$4 sm:$0xff]   ;;  %v10377_v11 = vld [vmem:[#allocation10 + $0xd0] ss:$8 sps:$4 sm:$0xff]  }
 0x3c0   :  { %5714 = vmatpush1.bf16.msra.mxu0 %v10302_v13  ;;  %5878 = vmatpush1.bf16.msra.mxu1 %v10305_v33  ;;  %v10382_v13 = vld [vmem:[#allocation10 + $0xe4] ss:$8 sps:$4 sm:$0xff]   ;;  %v10380_v33 = vld [vmem:[#allocation10 + $0xe0] ss:$8 sps:$4 sm:$0xff]  }
 0x3c1   :  { %5715 = vmatprep.subr.bf16.mxu0 %v10310_v36  ;;  %5879 = vmatprep.subr.bf16.mxu1 %v10313_v15  ;;  %v10385_v36 = vld [vmem:[#allocation10 + $0xf4] ss:$8 sps:$4 sm:$0xff]   ;;  %v10383_v15 = vld [vmem:[#allocation10 + $0xf0] ss:$8 sps:$4 sm:$0xff]  }
 0x3c4   :  { %5716 = vmatpush1.bf16.msra.mxu0 %v10308_v17  ;;  %5880 = vmatpush1.bf16.msra.mxu1 %v10311_v18  ;;  %v10388_v17 = vld [vmem:[#allocation10 + $0x104] ss:$8 sps:$4 sm:$0xff]  }
 0x3c5   :  { %5717 = vmatprep.subr.bf16.mxu0 %v10316_v43  ;;  %5881 = vmatprep.subr.bf16.mxu1 %v10319_v59  ;;  %v6388_v18 = vld [vmem:[#allocation13] sm:$0xff] }
 0x3c6   :  { %v6396_v43 = vld [vmem:[#allocation13 + $0x40] sm:$0xff] }
 0x3c7   :  { %v9530_v59 = vcombine.low %v6388_v18, %v6396_v43 }
 0x3c8   :  { %5718 = vmatpush1.bf16.msra.mxu0 %v10314_v20  ;;  %5882 = vmatpush1.bf16.msra.mxu1 %v10317_v21  ;;  %v9531_v20 = vcombine.high %v6388_v18, %v6396_v43  ;;  %v6404_v21 = vld [vmem:[#allocation13 + $0x80] sm:$0xff] }
 0x3c9   :  { %5719 = vmatprep.subr.bf16.mxu0 %v10322_v27  ;;  %5883 = vmatprep.subr.bf16.mxu1 %v10325_v28  ;;  %v6412_v27 = vld [vmem:[#allocation13 + $0xc0] sm:$0xff] }
 0x3ca   :  { %v9547_v28 = vcombine.high %v6404_v21, %v6412_v27 }
 0x3cc   :  { %5720 = vmatpush1.bf16.msra.mxu0 %v10320_v29  ;;  %5884 = vmatpush1.bf16.msra.mxu1 %v10323_v4  ;;  %v9546_v29 = vcombine.low %v6404_v21, %v6412_v27  ;;  %v6420_v4 = vld [vmem:[#allocation13 + $0x100] sm:$0xff] }
 0x3cd   :  { %5721 = vmatprep.subr.bf16.mxu0 %v10328_v61  ;;  %5885 = vmatprep.subr.bf16.mxu1 %v10331_v30  ;;  %v9563_v54 = vcombine.high %v6420_v4, %v6428_v6  ;;  %v9562_v61 = vcombine.low %v6420_v4, %v6428_v6  ;;  %v6436_v30 = vld [vmem:[#allocation13 + $0x180] sm:$0xff] }
 0x3d0   :  { %5722 = vmatpush1.bf16.msra.mxu0 %v10326_v31  ;;  %5886 = vmatpush1.bf16.msra.mxu1 %v10329_v44  ;;  %v6444_v31 = vld [vmem:[#allocation13 + $0x1c0] sm:$0xff] }
 0x3d1   :  { %5723 = vmatprep.subr.bf16.mxu0 %v10334_v34  ;;  %5887 = vmatprep.subr.bf16.mxu1 %v10337_v35  ;;  %v9579_v44 = vcombine.high %v6436_v30, %v6444_v31  ;;  %v9578_v32 = vcombine.low %v6436_v30, %v6444_v31  ;;  %v6452_v34 = vld [vmem:[#allocation13 + $0x200] sm:$0xff] }
 0x3d2   :  { %v6460_v35 = vld [vmem:[#allocation13 + $0x240] sm:$0xff] }
 0x3d4   :  { %5724 = vmatpush1.bf16.msra.mxu0 %v10332_v37  ;;  %5888 = vmatpush1.bf16.msra.mxu1 %v10335_v57  ;;  %v9595_v37 = vcombine.high %v6452_v34, %v6460_v35  ;;  %v9594_v57 = vcombine.low %v6452_v34, %v6460_v35 }
 0x3d5   :  { %6302 = vmatprep.subr.bf16.mxu0 %v10340_v14  ;;  %8008 = vmatprep.subr.bf16.mxu1 %v9531_v20  ;;  %v6476_v14 = vld [vmem:[#allocation13 + $0x2c0] sm:$0xff] }
 0x3d7   :  { %5726 = vmatmul.mubr.bf16.vlgmr.msra.gmra.mrb[8].mxu0 %v4010_v56  ;;  %5890 = vmatmul.mubr.bf16.vlgmr.msra.gmra.mrb[8].mxu1 %v4010_v56  ;;  %v9610_v56 = vcombine.low %v6468_v26, %v6476_v14 }
 0x3d8   :  { %6303 = vmatpush1.bf16.msra.mxu0 %v10338_v38  ;;  %8009 = vmatpush1.bf16.msra.mxu1 %v9530_v59  ;;  %v9611_v38 = vcombine.high %v6468_v26, %v6476_v14  ;;  %v10386_v26 = vld [vmem:[#allocation10 + $0x100] ss:$8 sps:$4 sm:$0xff]  }
 0x3d9   :  { %6304 = vmatprep.subr.bf16.mxu0 %v10343_v39  ;;  %8010 = vmatprep.subr.bf16.mxu1 %v9547_v28  ;;  %v6484_v39 = vld [vmem:[#allocation13 + $0x300] sm:$0xff] }
 0x3dc   :  { %6305 = vmatpush1.bf16.msra.mxu0 %v10341_v12  ;;  %8011 = vmatpush1.bf16.msra.mxu1 %v9546_v29  ;;  %v6492_v12 = vld [vmem:[#allocation13 + $0x340] sm:$0xff] }
 0x3dd   :  { %6306 = vmatprep.subr.bf16.mxu0 %v10346_v40  ;;  %8012 = vmatprep.subr.bf16.mxu1 %v9563_v54  ;;  %v9627_v40 = vcombine.high %v6484_v39, %v6492_v12 }
 0x3e0   :  { %6307 = vmatpush1.bf16.msra.mxu0 %v10344_v41  ;;  %8013 = vmatpush1.bf16.msra.mxu1 %v9562_v61  ;;  %v9626_v41 = vcombine.low %v6484_v39, %v6492_v12  ;;  %v10389_v39 = vld [vmem:[#allocation10 + $0x110] ss:$8 sps:$4 sm:$0xff]   ;;  %v10394_v12 = vld [vmem:[#allocation10 + $0x124] ss:$8 sps:$4 sm:$0xff]  }
 0x3e1   :  { %6308 = vmatprep.subr.bf16.mxu0 %v10349_v42  ;;  %8014 = vmatprep.subr.bf16.mxu1 %v9579_v44  ;;  %v6500_v42 = vld [vmem:[#allocation13 + $0x380] sm:$0xff] }
 0x3e4   :  { %6309 = vmatpush1.bf16.msra.mxu0 %v10347_v1  ;;  %8015 = vmatpush1.bf16.msra.mxu1 %v9578_v32  ;;  %v6508_v1 = vld [vmem:[#allocation13 + $0x3c0] sm:$0xff] }
 0x3e5   :  { %6310 = vmatprep.subr.bf16.mxu0 %v10352_v45  ;;  %8016 = vmatprep.subr.bf16.mxu1 %v9595_v37  ;;  %v9643_v45 = vcombine.high %v6500_v42, %v6508_v1 }
 0x3e8   :  { %6311 = vmatpush1.bf16.msra.mxu0 %v10350_v46  ;;  %8017 = vmatpush1.bf16.msra.mxu1 %v9594_v57  ;;  %v9642_v46 = vcombine.low %v6500_v42, %v6508_v1  ;;  %v10395_v42 = vld [vmem:[#allocation10 + $0x130] ss:$8 sps:$4 sm:$0xff]   ;;  %v10400_v1 = vld [vmem:[#allocation10 + $0x144] ss:$8 sps:$4 sm:$0xff]  }
 0x3e9   :  { %6312 = vmatprep.subr.bf16.mxu0 %v10355_v47  ;;  %8018 = vmatprep.subr.bf16.mxu1 %v9611_v38  ;;  %v6516_v47 = vld [vmem:[#allocation13 + $0x400] sm:$0xff]  ;;  %v10391_v38 = vld [vmem:[#allocation10 + $0x114] ss:$8 sps:$4 sm:$0xff]  }
 0x3ec   :  { %6313 = vmatpush1.bf16.msra.mxu0 %v10353_v48  ;;  %8019 = vmatpush1.bf16.msra.mxu1 %v9610_v56  ;;  %v6524_v48 = vld [vmem:[#allocation13 + $0x440] sm:$0xff] }
 0x3ed   :  { %6314 = vmatprep.subr.bf16.mxu0 %v10358_v49  ;;  %8020 = vmatprep.subr.bf16.mxu1 %v9627_v40  ;;  %v9659_v49 = vcombine.high %v6516_v47, %v6524_v48  ;;  %v10392_v40 = vld [vmem:[#allocation10 + $0x120] ss:$8 sps:$4 sm:$0xff]  }
 0x3f0   :  { %6315 = vmatpush1.bf16.msra.mxu0 %v10356_v50  ;;  %8021 = vmatpush1.bf16.msra.mxu1 %v9626_v41  ;;  %v9658_v50 = vcombine.low %v6516_v47, %v6524_v48  ;;  %v10397_v41 = vld [vmem:[#allocation10 + $0x134] ss:$8 sps:$4 sm:$0xff]   ;;  %v10401_v47 = vld [vmem:[#allocation10 + $0x150] ss:$8 sps:$4 sm:$0xff]   ;;  %v10406_v48 = vld [vmem:[#allocation10 + $0x164] ss:$8 sps:$4 sm:$0xff]  }
 0x3f1   :  { %6316 = vmatprep.subr.bf16.mxu0 %v10361_v51  ;;  %8022 = vmatprep.subr.bf16.mxu1 %v9643_v45  ;;  %v6532_v51 = vld [vmem:[#allocation13 + $0x480] sm:$0xff] }
 0x3f2   :  { %v10398_v45 = vld [vmem:[#allocation10 + $0x140] ss:$8 sps:$4 sm:$0xff]  }
 0x3f4   :  { %6317 = vmatpush1.bf16.msra.mxu0 %v10359_v52  ;;  %8023 = vmatpush1.bf16.msra.mxu1 %v9642_v46  ;;  %v6540_v52 = vld [vmem:[#allocation13 + $0x4c0] sm:$0xff]  ;;  %v10403_v46 = vld [vmem:[#allocation10 + $0x154] ss:$8 sps:$4 sm:$0xff]  }
 0x3f5   :  { %6318 = vmatprep.subr.bf16.mxu0 %v10364_v16  ;;  %8024 = vmatprep.subr.bf16.mxu1 %v9659_v49  ;;  %v9675_v16 = vcombine.high %v6532_v51, %v6540_v52  ;;  %v10404_v49 = vld [vmem:[#allocation10 + $0x160] ss:$8 sps:$4 sm:$0xff]  }
 0x3f8   :  { %6319 = vmatpush1.bf16.msra.mxu0 %v10362_v60  ;;  %8025 = vmatpush1.bf16.msra.mxu1 %v9658_v50  ;;  %v9674_v60 = vcombine.low %v6532_v51, %v6540_v52  ;;  %v10409_v50 = vld [vmem:[#allocation10 + $0x174] ss:$8 sps:$4 sm:$0xff]   ;;  %v10407_v51 = vld [vmem:[#allocation10 + $0x170] ss:$8 sps:$4 sm:$0xff]   ;;  %v10412_v52 = vld [vmem:[#allocation10 + $0x184] ss:$8 sps:$4 sm:$0xff]  }
 0x3f9   :  { %6320 = vmatprep.subr.bf16.mxu0 %v10367_v55  ;;  %8026 = vmatprep.subr.bf16.mxu1 %v9675_v16  ;;  %v6548_v55 = vld [vmem:[#allocation13 + $0x500] sm:$0xff] }
 0x3fa   :  { %v10410_v16 = vld [vmem:[#allocation10 + $0x180] ss:$8 sps:$4 sm:$0xff]  }
 0x3fc   :  { %6321 = vmatpush1.bf16.msra.mxu0 %v10365_v58  ;;  %v6556_v58 = vld [vmem:[#allocation13 + $0x540] sm:$0xff]  ;;  %8027 = vmatpush1.bf16.msra.mxu1 %v9674_v60  ;;  %v10415_v60 = vld [vmem:[#allocation10 + $0x194] ss:$8 sps:$4 sm:$0xff]  }
 0x3fd   :  { %6322 = vmatprep.subr.bf16.mxu0 %v10370_v23  ;;  %v9691_v23 = vcombine.high %v6548_v55, %v6556_v58 }
 0x3ff   :  { %8028 = vmatprep.subr.bf16.mxu1 %v9691_v23  ;;  %v10416_v23 = vld [vmem:[#allocation10 + $0x1a0] ss:$8 sps:$4 sm:$0xff]  }
 0x400   :  { %6323 = vmatpush1.bf16.msra.mxu0 %v10368_v9  ;;  %v9690_v9 = vcombine.low %v6548_v55, %v6556_v58  ;;  %v10413_v55 = vld [vmem:[#allocation10 + $0x190] ss:$8 sps:$4 sm:$0xff]   ;;  %v10418_v58 = vld [vmem:[#allocation10 + $0x1a4] ss:$8 sps:$4 sm:$0xff]  }
 0x401   :  { %6324 = vmatprep.subr.bf16.mxu0 %v10373_v62  ;;  %v6564_v62 = vld [vmem:[#allocation13 + $0x580] sm:$0xff] }
 0x402   :  { %8029 = vmatpush1.bf16.msra.mxu1 %v9690_v9  ;;  %v10421_v9 = vld [vmem:[#allocation10 + $0x1b4] ss:$8 sps:$4 sm:$0xff]  }
 0x404   :  { %6325 = vmatpush1.bf16.msra.mxu0 %v10371_v5  ;;  %v6572_v5 = vld [vmem:[#allocation13 + $0x5c0] sm:$0xff] }
 0x405   :  { %6326 = vmatprep.subr.bf16.mxu0 %v10376_v7  ;;  %v9707_v7 = vcombine.high %v6564_v62, %v6572_v5 }
 0x407   :  { %8030 = vmatprep.subr.bf16.mxu1 %v9707_v7  ;;  %v10422_v7 = vld [vmem:[#allocation10 + $0x1c0] ss:$8 sps:$4 sm:$0xff]  }
 0x408   :  { %6327 = vmatpush1.bf16.msra.mxu0 %v10374_v8  ;;  %v9706_v8 = vcombine.low %v6564_v62, %v6572_v5  ;;  %v10419_v62 = vld [vmem:[#allocation10 + $0x1b0] ss:$8 sps:$4 sm:$0xff]   ;;  %v10424_v5 = vld [vmem:[#allocation10 + $0x1c4] ss:$8 sps:$4 sm:$0xff]  }
 0x409   :  { %6328 = vmatprep.subr.bf16.mxu0 %v10379_v10  ;;  %v6580_v10 = vld [vmem:[#allocation13 + $0x600] sm:$0xff] }
 0x40a   :  { %8031 = vmatpush1.bf16.msra.mxu1 %v9706_v8  ;;  %v10427_v8 = vld [vmem:[#allocation10 + $0x1d4] ss:$8 sps:$4 sm:$0xff]  }
 0x40c   :  { %6329 = vmatpush1.bf16.msra.mxu0 %v10377_v11  ;;  %v6588_v11 = vld [vmem:[#allocation13 + $0x640] sm:$0xff] }
 0x40d   :  { %6330 = vmatprep.subr.bf16.mxu0 %v10382_v13  ;;  %v9723_v13 = vcombine.high %v6580_v10, %v6588_v11 }
 0x40f   :  { %8032 = vmatprep.subr.bf16.mxu1 %v9723_v13  ;;  %v10430_v13 = vld [vmem:[#allocation10 + $0x1e4] ss:$8 sps:$4 sm:$0xff]  }
 0x410   :  { %6331 = vmatpush1.bf16.msra.mxu0 %v10380_v33  ;;  %v9722_v33 = vcombine.low %v6580_v10, %v6588_v11  ;;  %v10425_v10 = vld [vmem:[#allocation10 + $0x1d0] ss:$8 sps:$4 sm:$0xff]  }
 0x411   :  { %6332 = vmatprep.subr.bf16.mxu0 %v10385_v36  ;;  %v11079_v36 = vld [vmem:[#allocation8] sm:$0xf] }
 0x412   :  { %v4273_v43 = vrot.slane %v11079_v36, %v11040_v19  ;;  %8033 = vmatpush1.bf16.msra.mxu1 %v9722_v33  ;;  %v4277_v20 = vrot.slane %v11079_v36, %v11030_v3  ;;  %v4285_v21 = vrot.slane %v11079_v36, %v11043_v22  ;;  %v4281_v11 = vrot.slane %v11079_v36, %v11052_v63  ;;  %v10428_v33 = vld [vmem:[#allocation10 + $0x1e0] ss:$8 sps:$4 sm:$0xff]  }
 0x414   :  { %6333 = vmatpush1.bf16.msra.mxu0 %v10383_v15  ;;  %v6596_v15 = vld [vmem:[#allocation13 + $0x680] sm:$0xff] }
 0x415   :  { %6343 = vmatprep.subr.bf16.mxu0 %v10388_v17  ;;  %v6604_v17 = vld [vmem:[#allocation13 + $0x6c0] sm:$0xff] }
 0x416   :  { %v9739_v18 = vcombine.high %v6596_v15, %v6604_v17  ;;  %v9738_v59 = vcombine.low %v6596_v15, %v6604_v17  ;;  %v10433_v17 = vld [vmem:[#allocation10 + $0x1f4] ss:$8 sps:$4 sm:$0xff]  }
 0x418   :  { %8034 = vmatprep.subr.bf16.mxu1 %v9739_v18  ;;  %v6390_v18 = vld [vmem:[#allocation13 + $0x10] sm:$0xff] }
 0x419   :  { %8035 = vmatpush1.bf16.msra.mxu1 %v9738_v59  ;;  %v10431_v59 = vld [vmem:[#allocation10 + $0x1f0] ss:$8 sps:$4 sm:$0xff]  }
 0x4aa   :  { %v5727_v27 = vpop.f32.mrb[8].mxu0  ;;  %v11087_v28 = vpop.f32.mrb[8].mxu1 }
 0x4ab   :  { %v9848_v29 = vadd.f32 %v5727_v27, %v4273_v43  ;;  %v5729_v4 = vpop.f32.mrb[9].mxu0  ;;  %v5893_v6 = vpop.f32.mrb[9].mxu1  ;;  %v9850_v15 = vadd.f32 %v11087_v28, %v4281_v11  ;;  %v6398_v43 = vld [vmem:[#allocation13 + $0x50] sm:$0xff] }
 0x4ac   :  { %v9849_v54 = vadd.f32 %v5729_v4, %v4277_v20  ;;  %v9851_v61 = vadd.f32 %v5893_v6, %v4285_v21  ;;  %v5731_v30 = vpop.f32.mrb[10].mxu0  ;;  %v5895_v31 = vpop.f32.mrb[10].mxu1  ;;  %v9535_v21 = vcombine.high %v6390_v18, %v6398_v43  ;;  %v6406_v27 = vld [vmem:[#allocation13 + $0x90] sm:$0xff]  ;;  %v9534_v4 = vcombine.low %v6390_v18, %v6398_v43 }
 0x4ad   :  { %v5898_v44 = vmax.f32 %v9848_v29, 0.0  ;;  %v5732_v32 = vpop.f32.mrb[11].mxu0  ;;  %v5896_v34 = vpop.f32.mrb[11].mxu1  ;;  %v5900_v20 = vmax.f32 %v9850_v15, 0.0  ;;  %v6414_v29 = vld [vmem:[#allocation13 + $0xd0] sm:$0xff] }
 0x4ae   :  { %v5899_v35 = vmax.f32 %v9849_v54, 0.0  ;;  %v5901_v37 = vmax.f32 %v9851_v61, 0.0  ;;  %v9551_v6 = vcombine.high %v6406_v27, %v6414_v29  ;;  %v6422_v54 = vld [vmem:[#allocation13 + $0x110] sm:$0xff]  ;;  %v9550_v28 = vcombine.low %v6406_v27, %v6414_v29  ;;  %v6620_v27 = vld [vmem:[#allocation13 + $0x740] sm:$0xff] }
 0x4af   :  { %v5902_v14 = vpack.c.bf16 %v5898_v44, %v5898_v44  ;;  %v5904_v36 = vpack.c.bf16 %v5900_v20, %v5900_v20  ;;  %v6430_v61 = vld [vmem:[#allocation13 + $0x150] sm:$0xff] }
 0x4b0   :  { %v5903_v57 = vpack.c.bf16 %v5899_v35, %v5899_v35  ;;  %v5905_v56 = vpack.c.bf16 %v5901_v37, %v5901_v37  ;;  %v9567_v30 = vcombine.high %v6422_v54, %v6430_v61  ;;  %v6438_v31 = vld [vmem:[#allocation13 + $0x190] sm:$0xff]  ;;  %v9566_v32 = vcombine.low %v6422_v54, %v6430_v61 }
 0x4b1   :  { %v6446_v44 = vld [vmem:[#allocation13 + $0x1d0] sm:$0xff] }
 0x4b2   :  { %6334 = vmatprep.mubr.bf16.mxu0 %v5903_v57  ;;  %v9583_v34 = vcombine.high %v6438_v31, %v6446_v44  ;;  %v6454_v35 = vld [vmem:[#allocation13 + $0x210] sm:$0xff]  ;;  %v9582_v57 = vcombine.low %v6438_v31, %v6446_v44 }
 0x4b3   :  { %6335 = vmatmul.mubr.bf16.vlgmr.msra.gmra.mrb[12].mxu0 %v5902_v14  ;;  %v6462_v37 = vld [vmem:[#allocation13 + $0x250] sm:$0xff] }
 0x4b4   :  { %6344 = vmatpush1.bf16.msra.mxu0 %v10386_v26  ;;  %6375 = vmatprep.mubr.bf16.mxu0 %v5905_v56  ;;  %v9599_v26 = vcombine.high %v6454_v35, %v6462_v37  ;;  %v6470_v14 = vld [vmem:[#allocation13 + $0x290] sm:$0xff]  ;;  %v9598_v56 = vcombine.low %v6454_v35, %v6462_v37 }
 0x4b5   :  { %6345 = vmatprep.subr.bf16.mxu0 %v10391_v38  ;;  %v6478_v38 = vld [vmem:[#allocation13 + $0x2d0] sm:$0xff] }
 0x4b6   :  { %v6582_v11 = vld [vmem:[#allocation13 + $0x610] sm:$0xff] }
 0x4b7   :  { %v6606_v18 = vld [vmem:[#allocation13 + $0x6d0] sm:$0xff] }
 0x4b8   :  { %6346 = vmatpush1.bf16.msra.mxu0 %v10389_v39  ;;  %v9615_v39 = vcombine.high %v6470_v14, %v6478_v38  ;;  %v6614_v29 = vld [vmem:[#allocation13 + $0x710] sm:$0xff] }
 0x4b9   :  { %6347 = vmatprep.subr.bf16.mxu0 %v10394_v12  ;;  %v6486_v12 = vld [vmem:[#allocation13 + $0x310] sm:$0xff] }
 0x4ba   :  { %v6630_v31 = vld [vmem:[#allocation13 + $0x790] sm:$0xff] }
 0x4bc   :  { %6348 = vmatpush1.bf16.msra.mxu0 %v10392_v40  ;;  %v6494_v40 = vld [vmem:[#allocation13 + $0x350] sm:$0xff] }
 0x4bd   :  { %6349 = vmatprep.subr.bf16.mxu0 %v10397_v41  ;;  %v9614_v41 = vcombine.low %v6470_v14, %v6478_v38  ;;  %v6392_v14 = vld [vmem:[#allocation13 + $0x20] sm:$0xff] }
 0x4c0   :  { %6350 = vmatpush1.bf16.msra.mxu0 %v10395_v42  ;;  %v9631_v42 = vcombine.high %v6486_v12, %v6494_v40 }
 0x4c1   :  { %6351 = vmatprep.subr.bf16.mxu0 %v10400_v1  ;;  %v6502_v1 = vld [vmem:[#allocation13 + $0x390] sm:$0xff] }
 0x4c4   :  { %6352 = vmatpush1.bf16.msra.mxu0 %v10398_v45  ;;  %v6510_v45 = vld [vmem:[#allocation13 + $0x3d0] sm:$0xff] }
 0x4c5   :  { %6353 = vmatprep.subr.bf16.mxu0 %v10403_v46  ;;  %v9630_v46 = vcombine.low %v6486_v12, %v6494_v40 }
 0x4c8   :  { %6354 = vmatpush1.bf16.msra.mxu0 %v10401_v47  ;;  %v9647_v47 = vcombine.high %v6502_v1, %v6510_v45 }
 0x4c9   :  { %6355 = vmatprep.subr.bf16.mxu0 %v10406_v48  ;;  %v6518_v48 = vld [vmem:[#allocation13 + $0x410] sm:$0xff] }
 0x4cc   :  { %6356 = vmatpush1.bf16.msra.mxu0 %v10404_v49  ;;  %v6526_v49 = vld [vmem:[#allocation13 + $0x450] sm:$0xff] }
 0x4cd   :  { %6357 = vmatprep.subr.bf16.mxu0 %v10409_v50  ;;  %v9646_v50 = vcombine.low %v6502_v1, %v6510_v45 }
 0x4d0   :  { %6358 = vmatpush1.bf16.msra.mxu0 %v10407_v51  ;;  %v9663_v51 = vcombine.high %v6518_v48, %v6526_v49 }
 0x4d1   :  { %6359 = vmatprep.subr.bf16.mxu0 %v10412_v52  ;;  %v6534_v52 = vld [vmem:[#allocation13 + $0x490] sm:$0xff] }
 0x4d4   :  { %6360 = vmatpush1.bf16.msra.mxu0 %v10410_v16  ;;  %v6542_v16 = vld [vmem:[#allocation13 + $0x4d0] sm:$0xff] }
 0x4d5   :  { %6361 = vmatprep.subr.bf16.mxu0 %v10415_v60  ;;  %v9662_v60 = vcombine.low %v6518_v48, %v6526_v49 }
 0x4d8   :  { %6362 = vmatpush1.bf16.msra.mxu0 %v10413_v55  ;;  %v9679_v55 = vcombine.high %v6534_v52, %v6542_v16 }
 0x4d9   :  { %6363 = vmatprep.subr.bf16.mxu0 %v10418_v58  ;;  %v6550_v58 = vld [vmem:[#allocation13 + $0x510] sm:$0xff] }
 0x4dc   :  { %6364 = vmatpush1.bf16.msra.mxu0 %v10416_v23  ;;  %v6558_v23 = vld [vmem:[#allocation13 + $0x550] sm:$0xff] }
 0x4dd   :  { %6365 = vmatprep.subr.bf16.mxu0 %v10421_v9  ;;  %v9678_v9 = vcombine.low %v6534_v52, %v6542_v16  ;;  %v6405_v16 = vld [vmem:[#allocation13 + $0x88] sm:$0xff] }
 0x4e0   :  { %6366 = vmatpush1.bf16.msra.mxu0 %v10419_v62  ;;  %v9695_v62 = vcombine.high %v6550_v58, %v6558_v23 }
 0x4e1   :  { %6367 = vmatprep.subr.bf16.mxu0 %v10424_v5  ;;  %v6566_v5 = vld [vmem:[#allocation13 + $0x590] sm:$0xff] }
 0x4e4   :  { %6368 = vmatpush1.bf16.msra.mxu0 %v10422_v7  ;;  %v6574_v7 = vld [vmem:[#allocation13 + $0x5d0] sm:$0xff] }
 0x4e5   :  { %6369 = vmatprep.subr.bf16.mxu0 %v10427_v8  ;;  %v9694_v8 = vcombine.low %v6550_v58, %v6558_v23  ;;  %v6416_v58 = vld [vmem:[#allocation13 + $0xe0] sm:$0xff] }
 0x4e8   :  { %6370 = vmatpush1.bf16.msra.mxu0 %v10425_v10  ;;  %v9711_v10 = vcombine.high %v6566_v5, %v6574_v7 }
 0x4e9   :  { %6371 = vmatprep.subr.bf16.mxu0 %v10430_v13  ;;  %v6590_v13 = vld [vmem:[#allocation13 + $0x650] sm:$0xff] }
 0x4ea   :  { %v9727_v15 = vcombine.high %v6582_v11, %v6590_v13  ;;  %v9726_v43 = vcombine.low %v6582_v11, %v6590_v13  ;;  %v6432_v11 = vld [vmem:[#allocation13 + $0x160] sm:$0xff] }
 0x4ec   :  { %6372 = vmatpush1.bf16.msra.mxu0 %v10428_v33  ;;  %v9710_v33 = vcombine.low %v6566_v5, %v6574_v7 }
 0x4ed   :  { %6373 = vmatprep.subr.bf16.mxu0 %v10433_v17  ;;  %v6598_v17 = vld [vmem:[#allocation13 + $0x690] sm:$0xff] }
 0x4ee   :  { %v9742_v20 = vcombine.low %v6598_v17, %v6606_v18 }
 0x4f0   :  { %6374 = vmatpush1.bf16.msra.mxu0 %v10431_v59  ;;  %v9743_v59 = vcombine.high %v6598_v17, %v6606_v18  ;;  %v6437_v18 = vld [vmem:[#allocation13 + $0x188] sm:$0xff] }
 0x4f1   :  { %8090 = vmatprep.subr.bf16.mxu0 %v9535_v21  ;;  %v6612_v21 = vld [vmem:[#allocation13 + $0x700] sm:$0xff] }
 0x4f3   :  { %6376 = vmatmul.mubr.bf16.vlgmr.msra.gmra.mrb[12].mxu0 %v5904_v36  ;;  %v6622_v36 = vld [vmem:[#allocation13 + $0x750] sm:$0xff] }
 0x4f4   :  { %8091 = vmatpush1.bf16.msra.mxu0 %v9534_v4  ;;  %v9755_v4 = vcombine.high %v6612_v21, %v6620_v27  ;;  %v9758_v54 = vcombine.low %v6614_v29, %v6622_v36  ;;  %v9759_v61 = vcombine.high %v6614_v29, %v6622_v36  ;;  %v6453_v36 = vld [vmem:[#allocation13 + $0x208] sm:$0xff] }
 0x4f5   :  { %8092 = vmatprep.subr.bf16.mxu0 %v9551_v6  ;;  %v9754_v6 = vcombine.low %v6612_v21, %v6620_v27 }
 0x4f6   :  { %8036 = vmatprep.subr.bf16.mxu1 %v9755_v4 }
 0x4f7   :  { %8037 = vmatpush1.bf16.msra.mxu1 %v9754_v6  ;;  %v6461_v6 = vld [vmem:[#allocation13 + $0x248] sm:$0xff] }
 0x4f8   :  { %8093 = vmatpush1.bf16.msra.mxu0 %v9550_v28  ;;  %v6628_v28 = vld [vmem:[#allocation13 + $0x780] sm:$0xff] }
 0x4f9   :  { %8094 = vmatprep.subr.bf16.mxu0 %v9567_v30  ;;  %v6636_v30 = vld [vmem:[#allocation13 + $0x7c0] sm:$0xff] }
 0x4fa   :  { %v9771_v44 = vcombine.high %v6628_v28, %v6636_v30 }
 0x4fc   :  { %8095 = vmatpush1.bf16.msra.mxu0 %v9566_v32  ;;  %v6638_v32 = vld [vmem:[#allocation13 + $0x7d0] sm:$0xff]  ;;  %8038 = vmatprep.subr.bf16.mxu1 %v9771_v44 }
 0x4fd   :  { %8096 = vmatprep.subr.bf16.mxu0 %v9583_v34  ;;  %v9770_v34 = vcombine.low %v6628_v28, %v6636_v30  ;;  %v9774_v35 = vcombine.low %v6630_v31, %v6638_v32  ;;  %v9775_v37 = vcombine.high %v6630_v31, %v6638_v32  ;;  %v9597_v31 = vcombine.high %v6453_v36, %v6461_v6  ;;  %v6469_v32 = vld [vmem:[#allocation13 + $0x288] sm:$0xff] }
 0x4ff   :  { %8039 = vmatpush1.bf16.msra.mxu1 %v9770_v34  ;;  %v6477_v34 = vld [vmem:[#allocation13 + $0x2c8] sm:$0xff] }
 0x500   :  { %8097 = vmatpush1.bf16.msra.mxu0 %v9582_v57  ;;  %v6389_v57 = vld [vmem:[#allocation13 + $0x8] sm:$0xff] }
 0x501   :  { %8098 = vmatprep.subr.bf16.mxu0 %v9599_v26  ;;  %v6397_v26 = vld [vmem:[#allocation13 + $0x48] sm:$0xff] }
 0x502   :  { %v9533_v38 = vcombine.high %v6389_v57, %v6397_v26 }
 0x504   :  { %8099 = vmatpush1.bf16.msra.mxu0 %v9598_v56  ;;  %v6400_v56 = vld [vmem:[#allocation13 + $0x60] sm:$0xff]  ;;  %8049 = vmatprep.subr.bf16.mxu1 %v9533_v38 }
 0x505   :  { %8100 = vmatprep.subr.bf16.mxu0 %v9615_v39  ;;  %v9532_v39 = vcombine.low %v6389_v57, %v6397_v26  ;;  %v9538_v12 = vcombine.low %v6392_v14, %v6400_v56  ;;  %v9539_v40 = vcombine.high %v6392_v14, %v6400_v56  ;;  %v9596_v57 = vcombine.low %v6453_v36, %v6461_v6  ;;  %v6485_v56 = vld [vmem:[#allocation13 + $0x308] sm:$0xff] }
 0x506   :  { %v9613_v14 = vcombine.high %v6469_v32, %v6477_v34 }
 0x508   :  { %8101 = vmatpush1.bf16.msra.mxu0 %v9614_v41  ;;  %v5970_v41 = vld [vmem:[#allocation11] sm:$0x3] }
 0x509   :  { %8102 = vmatprep.subr.bf16.mxu0 %v9631_v42  ;;  %v5975_v42 = vrot.slane %v5970_v41, %v11040_v19  ;;  %v5979_v1 = vrot.slane %v5970_v41, %v11030_v3  ;;  %v9612_v41 = vcombine.low %v6469_v32, %v6477_v34 }
 0x50c   :  { %8103 = vmatpush1.bf16.msra.mxu0 %v9630_v46 }
 0x50d   :  { %8104 = vmatprep.subr.bf16.mxu0 %v9647_v47 }
 0x510   :  { %8105 = vmatpush1.bf16.msra.mxu0 %v9646_v50 }
 0x511   :  { %8106 = vmatprep.subr.bf16.mxu0 %v9663_v51 }
 0x514   :  { %8107 = vmatpush1.bf16.msra.mxu0 %v9662_v60  ;;  %v6413_v60 = vld [vmem:[#allocation13 + $0xc8] sm:$0xff] }
 0x515   :  { %8108 = vmatprep.subr.bf16.mxu0 %v9679_v55  ;;  %v6408_v55 = vld [vmem:[#allocation13 + $0xa0] sm:$0xff]  ;;  %v9549_v5 = vcombine.high %v6405_v16, %v6413_v60  ;;  %v9548_v13 = vcombine.low %v6405_v16, %v6413_v60  ;;  %v6517_v60 = vld [vmem:[#allocation13 + $0x408] sm:$0xff] }
 0x516   :  { %v9555_v7 = vcombine.high %v6408_v55, %v6416_v58 }
 0x518   :  { %8109 = vmatpush1.bf16.msra.mxu0 %v9678_v9 }
 0x519   :  { %8110 = vmatprep.subr.bf16.mxu0 %v9695_v62  ;;  %v6421_v62 = vld [vmem:[#allocation13 + $0x108] sm:$0xff] }
 0x51c   :  { %8111 = vmatpush1.bf16.msra.mxu0 %v9694_v8  ;;  %v6429_v8 = vld [vmem:[#allocation13 + $0x148] sm:$0xff] }
 0x51d   :  { %8112 = vmatprep.subr.bf16.mxu0 %v9711_v10  ;;  %v6424_v10 = vld [vmem:[#allocation13 + $0x120] sm:$0xff]  ;;  %v9564_v21 = vcombine.low %v6421_v62, %v6429_v8 }
 0x51e   :  { %v9571_v17 = vcombine.high %v6424_v10, %v6432_v11  ;;  %v9570_v27 = vcombine.low %v6424_v10, %v6432_v11  ;;  %v6533_v11 = vld [vmem:[#allocation13 + $0x488] sm:$0xff] }
 0x520   :  { %8113 = vmatpush1.bf16.msra.mxu0 %v9710_v33  ;;  %v9554_v33 = vcombine.low %v6408_v55, %v6416_v58  ;;  %v6525_v55 = vld [vmem:[#allocation13 + $0x448] sm:$0xff]  ;;  %v6520_v58 = vld [vmem:[#allocation13 + $0x420] sm:$0xff] }
 0x521   :  { %8114 = vmatprep.subr.bf16.mxu0 %v9727_v15  ;;  %v9565_v15 = vcombine.high %v6421_v62, %v6429_v8  ;;  %v6528_v62 = vld [vmem:[#allocation13 + $0x460] sm:$0xff]  ;;  %v9661_v8 = vcombine.high %v6517_v60, %v6525_v55 }
 0x522   :  { %v9667_v10 = vcombine.high %v6520_v58, %v6528_v62 }
 0x524   :  { %8115 = vmatpush1.bf16.msra.mxu0 %v9726_v43  ;;  %v6445_v43 = vld [vmem:[#allocation13 + $0x1c8] sm:$0xff] }
 0x525   :  { %8116 = vmatprep.subr.bf16.mxu0 %v9743_v59  ;;  %v6440_v59 = vld [vmem:[#allocation13 + $0x1a0] sm:$0xff]  ;;  %v9581_v29 = vcombine.high %v6437_v18, %v6445_v43  ;;  %v9580_v28 = vcombine.low %v6437_v18, %v6445_v43  ;;  %v9666_v18 = vcombine.low %v6520_v58, %v6528_v62  ;;  %v6629_v62 = vld [vmem:[#allocation13 + $0x788] sm:$0xff] }
 0x528   :  { %8117 = vmatpush1.bf16.msra.mxu0 %v9742_v20  ;;  %v6448_v20 = vld [vmem:[#allocation13 + $0x1e0] sm:$0xff] }
 0x529   :  { %8118 = vmatprep.subr.bf16.mxu0 %v9759_v61  ;;  %v9587_v4 = vcombine.high %v6440_v59, %v6448_v20  ;;  %v6464_v61 = vld [vmem:[#allocation13 + $0x260] sm:$0xff]  ;;  %v9586_v30 = vcombine.low %v6440_v59, %v6448_v20  ;;  %v6549_v20 = vld [vmem:[#allocation13 + $0x508] sm:$0xff] }
 0x52c   :  { %8119 = vmatpush1.bf16.msra.mxu0 %v9758_v54  ;;  %v6456_v54 = vld [vmem:[#allocation13 + $0x220] sm:$0xff] }
 0x52d   :  { %8120 = vmatprep.subr.bf16.mxu0 %v9775_v37  ;;  %v9603_v44 = vcombine.high %v6456_v54, %v6464_v61  ;;  %v6480_v37 = vld [vmem:[#allocation13 + $0x2e0] sm:$0xff]  ;;  %v9602_v26 = vcombine.low %v6456_v54, %v6464_v61  ;;  %v6565_v61 = vld [vmem:[#allocation13 + $0x588] sm:$0xff] }
 0x530   :  { %8121 = vmatpush1.bf16.msra.mxu0 %v9774_v35  ;;  %v6472_v35 = vld [vmem:[#allocation13 + $0x2a0] sm:$0xff] }
 0x531   :  { %8172 = vmatprep.subr.bf16.mxu0 %v9539_v40  ;;  %v9619_v38 = vcombine.high %v6472_v35, %v6480_v37  ;;  %v6496_v40 = vld [vmem:[#allocation13 + $0x360] sm:$0xff] }
 0x5c6   :  { %v6377_v45 = vpop.f32.mrb[12].mxu0 }
 0x5c7   :  { %v9852_v46 = vadd.f32 %v6377_v45, %v5975_v42  ;;  %v6379_v47 = vpop.f32.mrb[13].mxu0  ;;  %v9618_v42 = vcombine.low %v6472_v35, %v6480_v37  ;;  %v6581_v37 = vld [vmem:[#allocation13 + $0x608] sm:$0xff] }
 0x5c8   :  { %v9853_v48 = vadd.f32 %v6379_v47, %v5979_v1  ;;  %v6381_v49 = vpop.f32.mrb[14].mxu0  ;;  %v6509_v47 = vld [vmem:[#allocation13 + $0x3c8] sm:$0xff] }
 0x5c9   :  { %v6384_v50 = vmax.f32 %v9852_v46, 0.0  ;;  %v6382_v51 = vpop.f32.mrb[15].mxu0  ;;  %v6501_v46 = vld [vmem:[#allocation13 + $0x388] sm:$0xff]  ;;  %v6512_v49 = vld [vmem:[#allocation13 + $0x3e0] sm:$0xff] }
 0x5ca   :  { %v6385_v52 = vmax.f32 %v9853_v48, 0.0  ;;  %v6504_v48 = vld [vmem:[#allocation13 + $0x3a0] sm:$0xff] }
 0x5cb   :  { %v11096_v9 = vpack.c.bf16 %v6384_v50, %v6384_v50  ;;  %v9651_v16 = vcombine.high %v6504_v48, %v6512_v49 }
 0x5cc   :  { %v11094_v23 = vpack.c.bf16 %v6385_v52, %v6385_v52  ;;  %v9645_v52 = vcombine.high %v6501_v46, %v6509_v47 }
 0x5ce   :  { %8040 = vmatprep.mubr.bf16.mxu1 %v11094_v23  ;;  %8122 = vmatprep.mubr.bf16.mxu0 %v11094_v23 }
 0x5cf   :  { %8041 = vmatmul.mubr.bf16.vlgmr.msra.gmra.mrb[12].mxu1 %v11096_v9  ;;  %8123 = vmatmul.mubr.bf16.vlgmr.msra.gmra.mrb[16].mxu0 %v11096_v9 }
 0x5d0   :  { %8050 = vmatpush1.bf16.msra.mxu1 %v9532_v39  ;;  %8173 = vmatpush1.bf16.msra.mxu0 %v9538_v12  ;;  %v6493_v39 = vld [vmem:[#allocation13 + $0x348] sm:$0xff]  ;;  %v6488_v12 = vld [vmem:[#allocation13 + $0x320] sm:$0xff] }
 0x5d1   :  { %8081 = vmatprep.mubr.bf16.mxu1 %v11094_v23  ;;  %8204 = vmatprep.mubr.bf16.mxu0 %v11094_v23  ;;  %v9629_v1 = vcombine.high %v6485_v56, %v6493_v39  ;;  %v9635_v45 = vcombine.high %v6488_v12, %v6496_v40  ;;  %v9628_v50 = vcombine.low %v6485_v56, %v6493_v39 }
 0x5d2   :  { %8051 = vmatprep.subr.bf16.mxu1 %v9549_v5  ;;  %8174 = vmatprep.subr.bf16.mxu0 %v9555_v7  ;;  %v9634_v51 = vcombine.low %v6488_v12, %v6496_v40  ;;  %v9644_v5 = vcombine.low %v6501_v46, %v6509_v47  ;;  %v9650_v7 = vcombine.low %v6504_v48, %v6512_v49  ;;  %v6597_v40 = vld [vmem:[#allocation13 + $0x688] sm:$0xff] }
 0x5d3   :  { %v6613_v49 = vld [vmem:[#allocation13 + $0x708] sm:$0xff] }
 0x5d4   :  { %8052 = vmatpush1.bf16.msra.mxu1 %v9548_v13  ;;  %8175 = vmatpush1.bf16.msra.mxu0 %v9554_v33  ;;  %v6541_v13 = vld [vmem:[#allocation13 + $0x4c8] sm:$0xff]  ;;  %v6536_v33 = vld [vmem:[#allocation13 + $0x4a0] sm:$0xff] }
 0x5d5   :  { %8053 = vmatprep.subr.bf16.mxu1 %v9565_v15  ;;  %8176 = vmatprep.subr.bf16.mxu0 %v9571_v17  ;;  %v6544_v15 = vld [vmem:[#allocation13 + $0x4e0] sm:$0xff]  ;;  %v9660_v17 = vcombine.low %v6517_v60, %v6525_v55  ;;  %v9677_v43 = vcombine.high %v6533_v11, %v6541_v13 }
 0x5d6   :  { %v9683_v59 = vcombine.high %v6536_v33, %v6544_v15  ;;  %v9682_v36 = vcombine.low %v6536_v33, %v6544_v15  ;;  %v6391_v15 = vld [vmem:[#allocation13 + $0x18] sm:$0xff] }
 0x5d8   :  { %8054 = vmatpush1.bf16.msra.mxu1 %v9564_v21  ;;  %8177 = vmatpush1.bf16.msra.mxu0 %v9570_v27  ;;  %v6557_v21 = vld [vmem:[#allocation13 + $0x548] sm:$0xff]  ;;  %v6552_v27 = vld [vmem:[#allocation13 + $0x520] sm:$0xff] }
 0x5d9   :  { %8055 = vmatprep.subr.bf16.mxu1 %v9581_v29  ;;  %8178 = vmatprep.subr.bf16.mxu0 %v9587_v4  ;;  %v6560_v29 = vld [vmem:[#allocation13 + $0x560] sm:$0xff]  ;;  %v9676_v4 = vcombine.low %v6533_v11, %v6541_v13  ;;  %v9693_v6 = vcombine.high %v6549_v20, %v6557_v21 }
 0x5da   :  { %v9699_v54 = vcombine.high %v6552_v27, %v6560_v29  ;;  %v9698_v32 = vcombine.low %v6552_v27, %v6560_v29  ;;  %v6407_v29 = vld [vmem:[#allocation13 + $0x98] sm:$0xff] }
 0x5dc   :  { %8056 = vmatpush1.bf16.msra.mxu1 %v9580_v28  ;;  %8179 = vmatpush1.bf16.msra.mxu0 %v9586_v30  ;;  %v6573_v28 = vld [vmem:[#allocation13 + $0x5c8] sm:$0xff]  ;;  %v6568_v30 = vld [vmem:[#allocation13 + $0x5a0] sm:$0xff] }
 0x5dd   :  { %8057 = vmatprep.subr.bf16.mxu1 %v9597_v31  ;;  %8180 = vmatprep.subr.bf16.mxu0 %v9603_v44  ;;  %v6576_v31 = vld [vmem:[#allocation13 + $0x5e0] sm:$0xff]  ;;  %v9692_v44 = vcombine.low %v6549_v20, %v6557_v21  ;;  %v9709_v34 = vcombine.high %v6565_v61, %v6573_v28 }
 0x5de   :  { %v9715_v35 = vcombine.high %v6568_v30, %v6576_v31  ;;  %v9714_v56 = vcombine.low %v6568_v30, %v6576_v31  ;;  %v6423_v31 = vld [vmem:[#allocation13 + $0x118] sm:$0xff] }
 0x5e0   :  { %8058 = vmatpush1.bf16.msra.mxu1 %v9596_v57  ;;  %8181 = vmatpush1.bf16.msra.mxu0 %v9602_v26  ;;  %v6589_v57 = vld [vmem:[#allocation13 + $0x648] sm:$0xff]  ;;  %v6584_v26 = vld [vmem:[#allocation13 + $0x620] sm:$0xff] }
 0x5e1   :  { %8059 = vmatprep.subr.bf16.mxu1 %v9613_v14  ;;  %8182 = vmatprep.subr.bf16.mxu0 %v9619_v38  ;;  %v6592_v14 = vld [vmem:[#allocation13 + $0x660] sm:$0xff]  ;;  %v9708_v38 = vcombine.low %v6565_v61, %v6573_v28  ;;  %v9725_v39 = vcombine.high %v6581_v37, %v6589_v57 }
 0x5e2   :  { %v9731_v12 = vcombine.high %v6584_v26, %v6592_v14  ;;  %v9730_v46 = vcombine.low %v6584_v26, %v6592_v14  ;;  %v6439_v14 = vld [vmem:[#allocation13 + $0x198] sm:$0xff] }
 0x5e4   :  { %8060 = vmatpush1.bf16.msra.mxu1 %v9612_v41  ;;  %8183 = vmatpush1.bf16.msra.mxu0 %v9618_v42  ;;  %v6605_v41 = vld [vmem:[#allocation13 + $0x6c8] sm:$0xff]  ;;  %v6600_v42 = vld [vmem:[#allocation13 + $0x6a0] sm:$0xff] }
 0x5e5   :  { %8061 = vmatprep.subr.bf16.mxu1 %v9629_v1  ;;  %8184 = vmatprep.subr.bf16.mxu0 %v9635_v45  ;;  %v6608_v1 = vld [vmem:[#allocation13 + $0x6e0] sm:$0xff]  ;;  %v9724_v45 = vcombine.low %v6581_v37, %v6589_v57  ;;  %v9741_v47 = vcombine.high %v6597_v40, %v6605_v41 }
 0x5e6   :  { %v9747_v48 = vcombine.high %v6600_v42, %v6608_v1  ;;  %v9746_v60 = vcombine.low %v6600_v42, %v6608_v1  ;;  %v6455_v1 = vld [vmem:[#allocation13 + $0x218] sm:$0xff] }
 0x5e8   :  { %8062 = vmatpush1.bf16.msra.mxu1 %v9628_v50  ;;  %8185 = vmatpush1.bf16.msra.mxu0 %v9634_v51  ;;  %v6621_v50 = vld [vmem:[#allocation13 + $0x748] sm:$0xff]  ;;  %v6616_v51 = vld [vmem:[#allocation13 + $0x720] sm:$0xff] }
 0x5e9   :  { %8063 = vmatprep.subr.bf16.mxu1 %v9645_v52  ;;  %8186 = vmatprep.subr.bf16.mxu0 %v9651_v16  ;;  %v6624_v52 = vld [vmem:[#allocation13 + $0x760] sm:$0xff]  ;;  %v9740_v16 = vcombine.low %v6597_v40, %v6605_v41  ;;  %v9757_v55 = vcombine.high %v6613_v49, %v6621_v50 }
 0x5ea   :  { %v9763_v58 = vcombine.high %v6616_v51, %v6624_v52  ;;  %v9762_v11 = vcombine.low %v6616_v51, %v6624_v52  ;;  %v6471_v52 = vld [vmem:[#allocation13 + $0x298] sm:$0xff] }
 0x5ec   :  { %8064 = vmatpush1.bf16.msra.mxu1 %v9644_v5  ;;  %8187 = vmatpush1.bf16.msra.mxu0 %v9650_v7  ;;  %v6637_v5 = vld [vmem:[#allocation13 + $0x7c8] sm:$0xff]  ;;  %v6632_v7 = vld [vmem:[#allocation13 + $0x7a0] sm:$0xff] }
 0x5ed   :  { %8065 = vmatprep.subr.bf16.mxu1 %v9661_v8  ;;  %8188 = vmatprep.subr.bf16.mxu0 %v9667_v10  ;;  %v6640_v8 = vld [vmem:[#allocation13 + $0x7e0] sm:$0xff]  ;;  %v9756_v10 = vcombine.low %v6613_v49, %v6621_v50  ;;  %v9773_v13 = vcombine.high %v6629_v62, %v6637_v5 }
 0x5ee   :  { %v9779_v33 = vcombine.high %v6632_v7, %v6640_v8  ;;  %v9778_v20 = vcombine.low %v6632_v7, %v6640_v8  ;;  %v6487_v8 = vld [vmem:[#allocation13 + $0x318] sm:$0xff] }
 0x5f0   :  { %8066 = vmatpush1.bf16.msra.mxu1 %v9660_v17  ;;  %8189 = vmatpush1.bf16.msra.mxu0 %v9666_v18  ;;  %v6399_v17 = vld [vmem:[#allocation13 + $0x58] sm:$0xff]  ;;  %v6394_v18 = vld [vmem:[#allocation13 + $0x30] sm:$0xff] }
 0x5f1   :  { %8067 = vmatprep.subr.bf16.mxu1 %v9677_v43  ;;  %8190 = vmatprep.subr.bf16.mxu0 %v9683_v59  ;;  %v6402_v43 = vld [vmem:[#allocation13 + $0x70] sm:$0xff]  ;;  %v9772_v59 = vcombine.low %v6629_v62, %v6637_v5  ;;  %v9537_v21 = vcombine.high %v6391_v15, %v6399_v17 }
 0x5f2   :  { %v9543_v27 = vcombine.high %v6394_v18, %v6402_v43  ;;  %v9542_v61 = vcombine.low %v6394_v18, %v6402_v43  ;;  %v6503_v43 = vld [vmem:[#allocation13 + $0x398] sm:$0xff] }
 0x5f4   :  { %8068 = vmatpush1.bf16.msra.mxu1 %v9676_v4  ;;  %8191 = vmatpush1.bf16.msra.mxu0 %v9682_v36  ;;  %v6415_v4 = vld [vmem:[#allocation13 + $0xd8] sm:$0xff]  ;;  %v6410_v36 = vld [vmem:[#allocation13 + $0xb0] sm:$0xff] }
 0x5f5   :  { %8069 = vmatprep.subr.bf16.mxu1 %v9693_v6  ;;  %8192 = vmatprep.subr.bf16.mxu0 %v9699_v54  ;;  %v6418_v6 = vld [vmem:[#allocation13 + $0xf0] sm:$0xff]  ;;  %v9536_v54 = vcombine.low %v6391_v15, %v6399_v17  ;;  %v9553_v28 = vcombine.high %v6407_v29, %v6415_v4 }
 0x5f6   :  { %v9559_v30 = vcombine.high %v6410_v36, %v6418_v6  ;;  %v9558_v37 = vcombine.low %v6410_v36, %v6418_v6  ;;  %v6519_v6 = vld [vmem:[#allocation13 + $0x418] sm:$0xff] }
 0x5f8   :  { %8070 = vmatpush1.bf16.msra.mxu1 %v9692_v44  ;;  %8193 = vmatpush1.bf16.msra.mxu0 %v9698_v32  ;;  %v6431_v44 = vld [vmem:[#allocation13 + $0x158] sm:$0xff]  ;;  %v6426_v32 = vld [vmem:[#allocation13 + $0x130] sm:$0xff] }
 0x5f9   :  { %8071 = vmatprep.subr.bf16.mxu1 %v9709_v34  ;;  %8194 = vmatprep.subr.bf16.mxu0 %v9715_v35  ;;  %v6434_v34 = vld [vmem:[#allocation13 + $0x170] sm:$0xff]  ;;  %v9552_v35 = vcombine.low %v6407_v29, %v6415_v4  ;;  %v9569_v57 = vcombine.high %v6423_v31, %v6431_v44 }
 0x5fa   :  { %v9575_v26 = vcombine.high %v6426_v32, %v6434_v34  ;;  %v9574_v40 = vcombine.low %v6426_v32, %v6434_v34  ;;  %v6535_v34 = vld [vmem:[#allocation13 + $0x498] sm:$0xff] }
 0x5fc   :  { %8072 = vmatpush1.bf16.msra.mxu1 %v9708_v38  ;;  %8195 = vmatpush1.bf16.msra.mxu0 %v9714_v56  ;;  %v6447_v38 = vld [vmem:[#allocation13 + $0x1d8] sm:$0xff]  ;;  %v6442_v56 = vld [vmem:[#allocation13 + $0x1b0] sm:$0xff] }
 0x5fd   :  { %8073 = vmatprep.subr.bf16.mxu1 %v9725_v39  ;;  %8196 = vmatprep.subr.bf16.mxu0 %v9731_v12  ;;  %v6450_v39 = vld [vmem:[#allocation13 + $0x1f0] sm:$0xff]  ;;  %v9568_v12 = vcombine.low %v6423_v31, %v6431_v44  ;;  %v9585_v41 = vcombine.high %v6439_v14, %v6447_v38 }
 0x5fe   :  { %v9591_v42 = vcombine.high %v6442_v56, %v6450_v39  ;;  %v9590_v49 = vcombine.low %v6442_v56, %v6450_v39  ;;  %v6551_v39 = vld [vmem:[#allocation13 + $0x518] sm:$0xff] }
 0x600   :  { %8074 = vmatpush1.bf16.msra.mxu1 %v9724_v45  ;;  %8197 = vmatpush1.bf16.msra.mxu0 %v9730_v46  ;;  %v6463_v45 = vld [vmem:[#allocation13 + $0x258] sm:$0xff]  ;;  %v6458_v46 = vld [vmem:[#allocation13 + $0x230] sm:$0xff] }
 0x601   :  { %8075 = vmatprep.subr.bf16.mxu1 %v9741_v47  ;;  %8198 = vmatprep.subr.bf16.mxu0 %v9747_v48  ;;  %v6466_v47 = vld [vmem:[#allocation13 + $0x270] sm:$0xff]  ;;  %v9584_v48 = vcombine.low %v6439_v14, %v6447_v38  ;;  %v9601_v50 = vcombine.high %v6455_v1, %v6463_v45 }
 0x602   :  { %v9607_v51 = vcombine.high %v6458_v46, %v6466_v47  ;;  %v9606_v62 = vcombine.low %v6458_v46, %v6466_v47  ;;  %v6567_v47 = vld [vmem:[#allocation13 + $0x598] sm:$0xff] }
 0x604   :  { %8076 = vmatpush1.bf16.msra.mxu1 %v9740_v16  ;;  %8199 = vmatpush1.bf16.msra.mxu0 %v9746_v60  ;;  %v6479_v16 = vld [vmem:[#allocation13 + $0x2d8] sm:$0xff]  ;;  %v6474_v60 = vld [vmem:[#allocation13 + $0x2b0] sm:$0xff] }
 0x605   :  { %8077 = vmatprep.subr.bf16.mxu1 %v9757_v55  ;;  %8200 = vmatprep.subr.bf16.mxu0 %v9763_v58  ;;  %v6482_v55 = vld [vmem:[#allocation13 + $0x2f0] sm:$0xff]  ;;  %v9600_v58 = vcombine.low %v6455_v1, %v6463_v45  ;;  %v9617_v5 = vcombine.high %v6471_v52, %v6479_v16 }
 0x606   :  { %v9623_v7 = vcombine.high %v6474_v60, %v6482_v55  ;;  %v9622_v15 = vcombine.low %v6474_v60, %v6482_v55  ;;  %v6583_v55 = vld [vmem:[#allocation13 + $0x618] sm:$0xff] }
 0x608   :  { %8078 = vmatpush1.bf16.msra.mxu1 %v9756_v10  ;;  %8201 = vmatpush1.bf16.msra.mxu0 %v9762_v11  ;;  %v6495_v10 = vld [vmem:[#allocation13 + $0x358] sm:$0xff]  ;;  %v6490_v11 = vld [vmem:[#allocation13 + $0x330] sm:$0xff] }
 0x609   :  { %8079 = vmatprep.subr.bf16.mxu1 %v9773_v13  ;;  %8202 = vmatprep.subr.bf16.mxu0 %v9779_v33  ;;  %v6498_v13 = vld [vmem:[#allocation13 + $0x370] sm:$0xff]  ;;  %v9616_v33 = vcombine.low %v6471_v52, %v6479_v16  ;;  %v9633_v17 = vcombine.high %v6487_v8, %v6495_v10 }
 0x60a   :  { %v9639_v18 = vcombine.high %v6490_v11, %v6498_v13  ;;  %v9638_v29 = vcombine.low %v6490_v11, %v6498_v13  ;;  %v6599_v13 = vld [vmem:[#allocation13 + $0x698] sm:$0xff] }
 0x60c   :  { %8080 = vmatpush1.bf16.msra.mxu1 %v9772_v59  ;;  %8203 = vmatpush1.bf16.msra.mxu0 %v9778_v20  ;;  %v6511_v59 = vld [vmem:[#allocation13 + $0x3d8] sm:$0xff]  ;;  %v6506_v20 = vld [vmem:[#allocation13 + $0x3b0] sm:$0xff] }
 0x60d   :  { %8131 = vmatprep.subr.bf16.mxu1 %v9537_v21  ;;  %8254 = vmatprep.subr.bf16.mxu0 %v9543_v27  ;;  %v6514_v21 = vld [vmem:[#allocation13 + $0x3f0] sm:$0xff]  ;;  %v9632_v27 = vcombine.low %v6487_v8, %v6495_v10  ;;  %v9649_v4 = vcombine.high %v6503_v43, %v6511_v59 }
 0x60e   :  { %v9655_v36 = vcombine.high %v6506_v20, %v6514_v21  ;;  %v9654_v31 = vcombine.low %v6506_v20, %v6514_v21  ;;  %v6615_v21 = vld [vmem:[#allocation13 + $0x718] sm:$0xff] }
 0x60f   :  { %8082 = vmatmul.mubr.bf16.vlgmr.msra.gmra.mrb[16].mxu1 %v11096_v9  ;;  %8205 = vmatmul.mubr.bf16.vlgmr.msra.gmra.mrb[20].mxu0 %v11096_v9 }
 0x610   :  { %8132 = vmatpush1.bf16.msra.mxu1 %v9536_v54  ;;  %8163 = vmatprep.mubr.bf16.mxu1 %v11094_v23  ;;  %v6527_v54 = vld [vmem:[#allocation13 + $0x458] sm:$0xff] }
 0x611   :  { %8255 = vmatpush1.bf16.msra.mxu0 %v9542_v61  ;;  %8286 = vmatprep.mubr.bf16.mxu0 %v11094_v23  ;;  %v6522_v61 = vld [vmem:[#allocation13 + $0x430] sm:$0xff]  ;;  %v9665_v44 = vcombine.high %v6519_v6, %v6527_v54 }
 0x612   :  { %8133 = vmatprep.subr.bf16.mxu1 %v9553_v28  ;;  %8256 = vmatprep.subr.bf16.mxu0 %v9559_v30  ;;  %v6530_v28 = vld [vmem:[#allocation13 + $0x470] sm:$0xff]  ;;  %v9648_v30 = vcombine.low %v6503_v43, %v6511_v59 }
 0x613   :  { %v9671_v32 = vcombine.high %v6522_v61, %v6530_v28  ;;  %v9670_v14 = vcombine.low %v6522_v61, %v6530_v28  ;;  %v6631_v28 = vld [vmem:[#allocation13 + $0x798] sm:$0xff] }
 0x614   :  { %8134 = vmatpush1.bf16.msra.mxu1 %v9552_v35  ;;  %v6543_v35 = vld [vmem:[#allocation13 + $0x4d8] sm:$0xff] }
 0x615   :  { %8257 = vmatpush1.bf16.msra.mxu0 %v9558_v37  ;;  %8135 = vmatprep.subr.bf16.mxu1 %v9569_v57  ;;  %v6538_v37 = vld [vmem:[#allocation13 + $0x4b0] sm:$0xff]  ;;  %v9681_v38 = vcombine.high %v6535_v34, %v6543_v35 }
 0x616   :  { %8258 = vmatprep.subr.bf16.mxu0 %v9575_v26  ;;  %v6546_v57 = vld [vmem:[#allocation13 + $0x4f0] sm:$0xff]  ;;  %v9664_v26 = vcombine.low %v6519_v6, %v6527_v54 }
 0x617   :  { %v9687_v56 = vcombine.high %v6538_v37, %v6546_v57  ;;  %v9686_v1 = vcombine.low %v6538_v37, %v6546_v57  ;;  %v6393_v57 = vld [vmem:[#allocation13 + $0x28] sm:$0xff] }
 0x618   :  { %8136 = vmatpush1.bf16.msra.mxu1 %v9568_v12  ;;  %v6559_v12 = vld [vmem:[#allocation13 + $0x558] sm:$0xff] }
 0x619   :  { %8259 = vmatpush1.bf16.msra.mxu0 %v9574_v40  ;;  %8137 = vmatprep.subr.bf16.mxu1 %v9585_v41  ;;  %v6554_v40 = vld [vmem:[#allocation13 + $0x530] sm:$0xff]  ;;  %v9697_v45 = vcombine.high %v6551_v39, %v6559_v12 }
 0x61a   :  { %8260 = vmatprep.subr.bf16.mxu0 %v9591_v42  ;;  %v6562_v41 = vld [vmem:[#allocation13 + $0x570] sm:$0xff]  ;;  %v9680_v42 = vcombine.low %v6535_v34, %v6543_v35 }
 0x61b   :  { %v9703_v46 = vcombine.high %v6554_v40, %v6562_v41  ;;  %v9702_v52 = vcombine.low %v6554_v40, %v6562_v41  ;;  %v6417_v40 = vld [vmem:[#allocation13 + $0xe8] sm:$0xff] }
 0x61c   :  { %8138 = vmatpush1.bf16.msra.mxu1 %v9584_v48  ;;  %v6575_v48 = vld [vmem:[#allocation13 + $0x5d8] sm:$0xff] }
 0x61d   :  { %8261 = vmatpush1.bf16.msra.mxu0 %v9590_v49  ;;  %8139 = vmatprep.subr.bf16.mxu1 %v9601_v50  ;;  %v6570_v49 = vld [vmem:[#allocation13 + $0x5b0] sm:$0xff]  ;;  %v9713_v16 = vcombine.high %v6567_v47, %v6575_v48 }
 0x61e   :  { %8262 = vmatprep.subr.bf16.mxu0 %v9607_v51  ;;  %v6578_v50 = vld [vmem:[#allocation13 + $0x5f0] sm:$0xff]  ;;  %v9696_v51 = vcombine.low %v6551_v39, %v6559_v12  ;;  %v6409_v12 = vld [vmem:[#allocation13 + $0xa8] sm:$0xff] }
 0x61f   :  { %v9719_v60 = vcombine.high %v6570_v49, %v6578_v50  ;;  %v9718_v8 = vcombine.low %v6570_v49, %v6578_v50  ;;  %v10434_v39 = vld [vmem:[%s11265_s9 + $0x40] sm:$0xff]   ;;  %v10437_v49 = vld [vmem:[%s11265_s9 + $0x8] sm:$0xff]  }
 0x620   :  { %8140 = vmatpush1.bf16.msra.mxu1 %v9600_v58  ;;  %v6591_v58 = vld [vmem:[#allocation13 + $0x658] sm:$0xff] }
 0x621   :  { %8263 = vmatpush1.bf16.msra.mxu0 %v9606_v62  ;;  %8141 = vmatprep.subr.bf16.mxu1 %v9617_v5  ;;  %v6586_v62 = vld [vmem:[#allocation13 + $0x630] sm:$0xff]  ;;  %v9729_v10 = vcombine.high %v6583_v55, %v6591_v58 }
 0x622   :  { %8264 = vmatprep.subr.bf16.mxu0 %v9623_v7  ;;  %v6594_v5 = vld [vmem:[#allocation13 + $0x670] sm:$0xff]  ;;  %v9712_v7 = vcombine.low %v6567_v47, %v6575_v48  ;;  %v10436_v47 = vld [vmem:[%s11265_s9 + $0x48] sm:$0xff]   ;;  %v9556_v48 = vcombine.low %v6409_v12, %v6417_v40 }
 0x623   :  { %v9735_v11 = vcombine.high %v6586_v62, %v6594_v5  ;;  %v9734_v43 = vcombine.low %v6586_v62, %v6594_v5  ;;  %v10440_v62 = vld [vmem:[%s11265_s9 + $0x58] sm:$0xff]  }
 0x624   :  { %8142 = vmatpush1.bf16.msra.mxu1 %v9616_v33  ;;  %v6607_v33 = vld [vmem:[#allocation13 + $0x6d8] sm:$0xff]  ;;  %v6457_v5 = vld [vmem:[#allocation13 + $0x228] sm:$0xff] }
 0x625   :  { %8265 = vmatpush1.bf16.msra.mxu0 %v9622_v15  ;;  %8143 = vmatprep.subr.bf16.mxu1 %v9633_v17  ;;  %v6602_v15 = vld [vmem:[#allocation13 + $0x6b0] sm:$0xff]  ;;  %v9745_v59 = vcombine.high %v6599_v13, %v6607_v33 }
 0x626   :  { %8266 = vmatprep.subr.bf16.mxu0 %v9639_v18  ;;  %v6610_v17 = vld [vmem:[#allocation13 + $0x6f0] sm:$0xff]  ;;  %v9728_v18 = vcombine.low %v6583_v55, %v6591_v58  ;;  %v10439_v55 = vld [vmem:[%s11265_s9 + $0x10] sm:$0xff]  }
 0x627   :  { %v9751_v20 = vcombine.high %v6602_v15, %v6610_v17  ;;  %v9750_v6 = vcombine.low %v6602_v15, %v6610_v17  ;;  %v6481_v15 = vld [vmem:[#allocation13 + $0x2e8] sm:$0xff] }
 0x628   :  { %8144 = vmatpush1.bf16.msra.mxu1 %v9632_v27  ;;  %v6623_v27 = vld [vmem:[#allocation13 + $0x758] sm:$0xff] }
 0x629   :  { %8267 = vmatpush1.bf16.msra.mxu0 %v9638_v29  ;;  %8145 = vmatprep.subr.bf16.mxu1 %v9649_v4  ;;  %v6618_v29 = vld [vmem:[#allocation13 + $0x730] sm:$0xff]  ;;  %v9761_v54 = vcombine.high %v6615_v21, %v6623_v27 }
 0x62a   :  { %8268 = vmatprep.subr.bf16.mxu0 %v9655_v36  ;;  %v6626_v4 = vld [vmem:[#allocation13 + $0x770] sm:$0xff]  ;;  %v9744_v36 = vcombine.low %v6599_v13, %v6607_v33  ;;  %v6473_v33 = vld [vmem:[#allocation13 + $0x2a8] sm:$0xff] }
 0x62b   :  { %v9767_v61 = vcombine.high %v6618_v29, %v6626_v4  ;;  %v9766_v34 = vcombine.low %v6618_v29, %v6626_v4  ;;  %v10442_v13 = vld [vmem:[%s11265_s9 + $0x60] sm:$0xff]   ;;  %v10445_v29 = vld [vmem:[%s11265_s9 + $0x28] sm:$0xff]  }
 0x62c   :  { %8146 = vmatpush1.bf16.msra.mxu1 %v9648_v30  ;;  %v6639_v30 = vld [vmem:[#allocation13 + $0x7d8] sm:$0xff] }
 0x62d   :  { %8269 = vmatpush1.bf16.msra.mxu0 %v9654_v31  ;;  %8147 = vmatprep.subr.bf16.mxu1 %v9665_v44  ;;  %v6634_v31 = vld [vmem:[#allocation13 + $0x7b0] sm:$0xff]  ;;  %v9777_v35 = vcombine.high %v6631_v28, %v6639_v30 }
 0x62e   :  { %8270 = vmatprep.subr.bf16.mxu0 %v9671_v32  ;;  %v6642_v44 = vld [vmem:[#allocation13 + $0x7f0] sm:$0xff]  ;;  %v9760_v32 = vcombine.low %v6615_v21, %v6623_v27  ;;  %v6497_v21 = vld [vmem:[#allocation13 + $0x368] sm:$0xff]  ;;  %v9620_v27 = vcombine.low %v6473_v33, %v6481_v15 }
 0x62f   :  { %v9783_v37 = vcombine.high %v6634_v31, %v6642_v44 }
 0x630   :  { %8148 = vmatpush1.bf16.msra.mxu1 %v9664_v26  ;;  %v6401_v26 = vld [vmem:[#allocation13 + $0x68] sm:$0xff] }
 0x631   :  { %8271 = vmatpush1.bf16.msra.mxu0 %v9670_v14  ;;  %8149 = vmatprep.subr.bf16.mxu1 %v9681_v38  ;;  %v9776_v14 = vcombine.low %v6631_v28, %v6639_v30  ;;  %v9782_v38 = vcombine.low %v6634_v31, %v6642_v44  ;;  %v9540_v41 = vcombine.low %v6393_v57, %v6401_v26  ;;  %v10447_v28 = vld [vmem:[%s11265_s9 + $0x30] sm:$0xff]   ;;  %v10448_v31 = vld [vmem:[%s11265_s9 + $0x78] sm:$0xff]  }
 0x632   :  { %8272 = vmatprep.subr.bf16.mxu0 %v9687_v56  ;;  %v9541_v56 = vcombine.high %v6393_v57, %v6401_v26  ;;  %v6521_v44 = vld [vmem:[#allocation13 + $0x428] sm:$0xff] }
 0x633   :  { %v6537_v57 = vld [vmem:[#allocation13 + $0x4a8] sm:$0xff] }
 0x634   :  { %8150 = vmatpush1.bf16.msra.mxu1 %v9680_v42  ;;  %v10435_v42 = vld [vmem:[%s11265_s9] sm:$0xff]   ;;  %v6545_v26 = vld [vmem:[#allocation13 + $0x4e8] sm:$0xff] }
 0x635   :  { %8273 = vmatpush1.bf16.msra.mxu0 %v9686_v1  ;;  %8151 = vmatprep.subr.bf16.mxu1 %v9697_v45  ;;  %v9557_v1 = vcombine.high %v6409_v12, %v6417_v40  ;;  %v6425_v45 = vld [vmem:[#allocation13 + $0x128] sm:$0xff]  ;;  %v9684_v12 = vcombine.low %v6537_v57, %v6545_v26 }
 0x636   :  { %8274 = vmatprep.subr.bf16.mxu0 %v9703_v46  ;;  %v6433_v46 = vld [vmem:[#allocation13 + $0x168] sm:$0xff] }
 0x637   :  { %v9573_v50 = vcombine.high %v6425_v45, %v6433_v46 }
 0x638   :  { %8152 = vmatpush1.bf16.msra.mxu1 %v9696_v51  ;;  %v10438_v51 = vld [vmem:[%s11265_s9 + $0x50] sm:$0xff]  }
 0x639   :  { %8275 = vmatpush1.bf16.msra.mxu0 %v9702_v52  ;;  %8153 = vmatprep.subr.bf16.mxu1 %v9713_v16  ;;  %v6441_v52 = vld [vmem:[#allocation13 + $0x1a8] sm:$0xff] }
 0x63a   :  { %8276 = vmatprep.subr.bf16.mxu0 %v9719_v60  ;;  %v6449_v16 = vld [vmem:[#allocation13 + $0x1e8] sm:$0xff]  ;;  %v9572_v60 = vcombine.low %v6425_v45, %v6433_v46 }
 0x63b   :  { %v9589_v58 = vcombine.high %v6441_v52, %v6449_v16  ;;  %v6585_v46 = vld [vmem:[#allocation13 + $0x628] sm:$0xff] }
 0x63c   :  { %8154 = vmatpush1.bf16.msra.mxu1 %v9712_v7  ;;  %v6465_v7 = vld [vmem:[#allocation13 + $0x268] sm:$0xff] }
 0x63d   :  { %8277 = vmatpush1.bf16.msra.mxu0 %v9718_v8  ;;  %8155 = vmatprep.subr.bf16.mxu1 %v9729_v10  ;;  %v9588_v8 = vcombine.low %v6441_v52, %v6449_v16  ;;  %v10441_v10 = vld [vmem:[%s11265_s9 + $0x18] sm:$0xff]   ;;  %v9604_v17 = vcombine.low %v6457_v5, %v6465_v7 }
 0x63e   :  { %8278 = vmatprep.subr.bf16.mxu0 %v9735_v11  ;;  %v9605_v11 = vcombine.high %v6457_v5, %v6465_v7  ;;  %v6633_v5 = vld [vmem:[#allocation13 + $0x7a8] sm:$0xff] }
 0x63f   :  { %v6641_v7 = vld [vmem:[#allocation13 + $0x7e8] sm:$0xff] }
 0x640   :  { %8156 = vmatpush1.bf16.msra.mxu1 %v9728_v18  ;;  %v10443_v18 = vld [vmem:[%s11265_s9 + $0x20] sm:$0xff]  }
 0x641   :  { %8279 = vmatpush1.bf16.msra.mxu0 %v9734_v43  ;;  %8157 = vmatprep.subr.bf16.mxu1 %v9745_v59  ;;  %v9621_v43 = vcombine.high %v6473_v33, %v6481_v15  ;;  %v10444_v59 = vld [vmem:[%s11265_s9 + $0x68] sm:$0xff]   ;;  %v9780_v33 = vcombine.low %v6633_v5, %v6641_v7 }
 0x642   :  { %8280 = vmatprep.subr.bf16.mxu0 %v9751_v20  ;;  %v6489_v20 = vld [vmem:[#allocation13 + $0x328] sm:$0xff] }
 0x643   :  { %v9637_v4 = vcombine.high %v6489_v20, %v6497_v21 }
 0x644   :  { %8158 = vmatpush1.bf16.msra.mxu1 %v9744_v36  ;;  %v10446_v36 = vld [vmem:[%s11265_s9 + $0x70] sm:$0xff]  }
 0x645   :  { %8281 = vmatpush1.bf16.msra.mxu0 %v9750_v6  ;;  %8159 = vmatprep.subr.bf16.mxu1 %v9761_v54  ;;  %v6505_v6 = vld [vmem:[#allocation13 + $0x3a8] sm:$0xff] }
 0x646   :  { %8282 = vmatprep.subr.bf16.mxu0 %v9767_v61  ;;  %v6513_v54 = vld [vmem:[#allocation13 + $0x3e8] sm:$0xff]  ;;  %v9636_v61 = vcombine.low %v6489_v20, %v6497_v21  ;;  %v6427_v20 = vld [vmem:[#allocation13 + $0x138] sm:$0xff] }
 0x647   :  { %v9653_v30 = vcombine.high %v6505_v6, %v6513_v54  ;;  %v6435_v21 = vld [vmem:[#allocation13 + $0x178] sm:$0xff] }
 0x648   :  { %8160 = vmatpush1.bf16.msra.mxu1 %v9760_v32  ;;  %v6529_v32 = vld [vmem:[#allocation13 + $0x468] sm:$0xff] }
 0x649   :  { %8283 = vmatpush1.bf16.msra.mxu0 %v9766_v34  ;;  %8161 = vmatprep.subr.bf16.mxu1 %v9777_v35  ;;  %v9652_v34 = vcombine.low %v6505_v6, %v6513_v54  ;;  %v10449_v35 = vld [vmem:[%s11265_s9 + $0x38] sm:$0xff]   ;;  %v9576_v6 = vcombine.low %v6427_v20, %v6435_v21 }
 0x64a   :  { %8284 = vmatprep.subr.bf16.mxu0 %v9783_v37  ;;  %v9669_v37 = vcombine.high %v6521_v44, %v6529_v32 }
 0x64c   :  { %8162 = vmatpush1.bf16.msra.mxu1 %v9776_v14  ;;  %v9668_v14 = vcombine.low %v6521_v44, %v6529_v32  ;;  %v6475_v44 = vld [vmem:[#allocation13 + $0x2b8] sm:$0xff] }
 0x64d   :  { %8285 = vmatpush1.bf16.msra.mxu0 %v9782_v38  ;;  %8213 = vmatprep.subr.bf16.mxu1 %v9541_v56  ;;  %v9685_v38 = vcombine.high %v6537_v57, %v6545_v26  ;;  %v6553_v56 = vld [vmem:[#allocation13 + $0x528] sm:$0xff]  ;;  %v6483_v32 = vld [vmem:[#allocation13 + $0x2f8] sm:$0xff] }
 0x64e   :  { %9807 = vmatprep.subr.bf16.mxu0 %v10434_v39  ;;  %v6561_v39 = vld [vmem:[#allocation13 + $0x568] sm:$0xff]  ;;  %v6499_v57 = vld [vmem:[#allocation13 + $0x378] sm:$0xff] }
 0x64f   :  { %8164 = vmatmul.mubr.bf16.vlgmr.msra.gmra.mrb[20].mxu1 %v11096_v9  ;;  %v9701_v40 = vcombine.high %v6553_v56, %v6561_v39 }
 0x650   :  { %8287 = vmatmul.mubr.bf16.vlgmr.msra.gmra.mrb[24].mxu0 %v11096_v9  ;;  %8214 = vmatpush1.bf16.msra.mxu1 %v9540_v41  ;;  %v6569_v41 = vld [vmem:[#allocation13 + $0x5a8] sm:$0xff] }
 0x651   :  { %8245 = vmatprep.mubr.bf16.mxu1 %v11094_v23  ;;  %9808 = vmatpush3.bf16.msra.mxu0 %v10435_v42  ;;  %v6577_v42 = vld [vmem:[#allocation13 + $0x5e8] sm:$0xff] }
 0x652   :  { %8595 = vmatprep.mubr.bf16.mxu0 %v11094_v23  ;;  %8215 = vmatprep.subr.bf16.mxu1 %v9557_v1  ;;  %v9700_v1 = vcombine.low %v6553_v56, %v6561_v39  ;;  %v9717_v45 = vcombine.high %v6569_v41, %v6577_v42 }
 0x653   :  { %9809 = vmatprep.subr.bf16.mxu0 %v10436_v47  ;;  %v6593_v47 = vld [vmem:[#allocation13 + $0x668] sm:$0xff] }
 0x654   :  { %8216 = vmatpush1.bf16.msra.mxu1 %v9556_v48  ;;  %v9716_v48 = vcombine.low %v6569_v41, %v6577_v42  ;;  %v9732_v52 = vcombine.low %v6585_v46, %v6593_v47  ;;  %v6507_v42 = vld [vmem:[#allocation13 + $0x3b8] sm:$0xff] }
 0x655   :  { %9810 = vmatpush3.bf16.msra.mxu0 %v10437_v49  ;;  %8217 = vmatprep.subr.bf16.mxu1 %v9573_v50  ;;  %v9733_v49 = vcombine.high %v6585_v46, %v6593_v47  ;;  %v6601_v50 = vld [vmem:[#allocation13 + $0x6a8] sm:$0xff] }
 0x656   :  { %9811 = vmatprep.subr.bf16.mxu0 %v10438_v51  ;;  %v6609_v51 = vld [vmem:[#allocation13 + $0x6e8] sm:$0xff] }
 0x657   :  { %v9749_v16 = vcombine.high %v6601_v50, %v6609_v51 }
 0x658   :  { %8218 = vmatpush1.bf16.msra.mxu1 %v9572_v60  ;;  %v6617_v60 = vld [vmem:[#allocation13 + $0x728] sm:$0xff] }
 0x659   :  { %9812 = vmatpush3.bf16.msra.mxu0 %v10439_v55  ;;  %8219 = vmatprep.subr.bf16.mxu1 %v9589_v58  ;;  %v6625_v55 = vld [vmem:[#allocation13 + $0x768] sm:$0xff]  ;;  %v9748_v58 = vcombine.low %v6601_v50, %v6609_v51 }
 0x65a   :  { %9813 = vmatprep.subr.bf16.mxu0 %v10440_v62  ;;  %v9765_v62 = vcombine.high %v6617_v60, %v6625_v55 }
 0x65c   :  { %8220 = vmatpush1.bf16.msra.mxu1 %v9588_v8  ;;  %v9764_v8 = vcombine.low %v6617_v60, %v6625_v55 }
 0x65d   :  { %9814 = vmatpush3.bf16.msra.mxu0 %v10441_v10  ;;  %8221 = vmatprep.subr.bf16.mxu1 %v9605_v11  ;;  %v9781_v10 = vcombine.high %v6633_v5, %v6641_v7  ;;  %v6395_v11 = vld [vmem:[#allocation13 + $0x38] sm:$0xff] }
 0x65e   :  { %9815 = vmatprep.subr.bf16.mxu0 %v10442_v13  ;;  %v6403_v13 = vld [vmem:[#allocation13 + $0x78] sm:$0xff] }
 0x65f   :  { %v9545_v15 = vcombine.high %v6395_v11, %v6403_v13  ;;  %v6523_v7 = vld [vmem:[#allocation13 + $0x438] sm:$0xff] }
 0x660   :  { %8222 = vmatpush1.bf16.msra.mxu1 %v9604_v17  ;;  %v6411_v17 = vld [vmem:[#allocation13 + $0xb8] sm:$0xff] }
 0x661   :  { %9816 = vmatpush3.bf16.msra.mxu0 %v10443_v18  ;;  %8223 = vmatprep.subr.bf16.mxu1 %v9621_v43  ;;  %v6419_v18 = vld [vmem:[#allocation13 + $0xf8] sm:$0xff]  ;;  %v9544_v43 = vcombine.low %v6395_v11, %v6403_v13 }
 0x662   :  { %9817 = vmatprep.subr.bf16.mxu0 %v10444_v59  ;;  %v9561_v59 = vcombine.high %v6411_v17, %v6419_v18  ;;  %v6539_v13 = vld [vmem:[#allocation13 + $0x4b8] sm:$0xff] }
 0x664   :  { %8224 = vmatpush1.bf16.msra.mxu1 %v9620_v27  ;;  %v9560_v27 = vcombine.low %v6411_v17, %v6419_v18  ;;  %v6555_v18 = vld [vmem:[#allocation13 + $0x538] sm:$0xff] }
 0x665   :  { %9818 = vmatpush3.bf16.msra.mxu0 %v10445_v29  ;;  %8225 = vmatprep.subr.bf16.mxu1 %v9637_v4  ;;  %v9577_v29 = vcombine.high %v6427_v20, %v6435_v21  ;;  %v6443_v4 = vld [vmem:[#allocation13 + $0x1b8] sm:$0xff] }
 0x666   :  { %9819 = vmatprep.subr.bf16.mxu0 %v10446_v36  ;;  %v6451_v36 = vld [vmem:[#allocation13 + $0x1f8] sm:$0xff] }
 0x667   :  { %v9593_v54 = vcombine.high %v6443_v4, %v6451_v36  ;;  %v6571_v21 = vld [vmem:[#allocation13 + $0x5b8] sm:$0xff] }
 0x668   :  { %8226 = vmatpush1.bf16.msra.mxu1 %v9636_v61  ;;  %v6459_v61 = vld [vmem:[#allocation13 + $0x238] sm:$0xff] }
 0x669   :  { %9820 = vmatpush3.bf16.msra.mxu0 %v10447_v28  ;;  %8227 = vmatprep.subr.bf16.mxu1 %v9653_v30  ;;  %v6467_v28 = vld [vmem:[#allocation13 + $0x278] sm:$0xff]  ;;  %v9592_v30 = vcombine.low %v6443_v4, %v6451_v36 }
 0x66a   :  { %9821 = vmatprep.subr.bf16.mxu0 %v10448_v31  ;;  %v9609_v31 = vcombine.high %v6459_v61, %v6467_v28  ;;  %v6587_v36 = vld [vmem:[#allocation13 + $0x638] sm:$0xff] }
 0x66c   :  { %8228 = vmatpush1.bf16.msra.mxu1 %v9652_v34  ;;  %v9608_v34 = vcombine.low %v6459_v61, %v6467_v28  ;;  %v6603_v28 = vld [vmem:[#allocation13 + $0x6b8] sm:$0xff] }
 0x66d   :  { %9822 = vmatpush3.bf16.msra.mxu0 %v10449_v35  ;;  %8229 = vmatprep.subr.bf16.mxu1 %v9669_v37  ;;  %v9625_v35 = vcombine.high %v6475_v44, %v6483_v32  ;;  %v6491_v37 = vld [vmem:[#allocation13 + $0x338] sm:$0xff] }
 0x670   :  { %8596 = vmatmul.mubr.bf16.vlgmr.msra.gmra.mrb[28].mxu0 %v11096_v9  ;;  %8230 = vmatpush1.bf16.msra.mxu1 %v9668_v14 }
 0x671   :  { %8231 = vmatprep.subr.bf16.mxu1 %v9685_v38  ;;  %v9624_v38 = vcombine.low %v6475_v44, %v6483_v32  ;;  %v6619_v32 = vld [vmem:[#allocation13 + $0x738] sm:$0xff] }
 0x674   :  { %8232 = vmatpush1.bf16.msra.mxu1 %v9684_v12  ;;  %v9641_v12 = vcombine.high %v6491_v37, %v6499_v57 }
 0x675   :  { %8233 = vmatprep.subr.bf16.mxu1 %v9701_v40 }
 0x678   :  { %8234 = vmatpush1.bf16.msra.mxu1 %v9700_v1  ;;  %v6515_v1 = vld [vmem:[#allocation13 + $0x3f8] sm:$0xff] }
 0x679   :  { %8235 = vmatprep.subr.bf16.mxu1 %v9717_v45 }
 0x67c   :  { %8236 = vmatpush1.bf16.msra.mxu1 %v9716_v48 }
 0x67d   :  { %8237 = vmatprep.subr.bf16.mxu1 %v9733_v49 }
 0x680   :  { %8238 = vmatpush1.bf16.msra.mxu1 %v9732_v52 }
 0x681   :  { %8239 = vmatprep.subr.bf16.mxu1 %v9749_v16  ;;  %v9640_v16 = vcombine.low %v6491_v37, %v6499_v57  ;;  %v6635_v57 = vld [vmem:[#allocation13 + $0x7b8] sm:$0xff] }
 0x684   :  { %8240 = vmatpush1.bf16.msra.mxu1 %v9748_v58  ;;  %v9657_v58 = vcombine.high %v6507_v42, %v6515_v1 }
 0x685   :  { %8241 = vmatprep.subr.bf16.mxu1 %v9765_v62 }
 0x688   :  { %8242 = vmatpush1.bf16.msra.mxu1 %v9764_v8  ;;  %v6531_v8 = vld [vmem:[#allocation13 + $0x478] sm:$0xff] }
 0x689   :  { %8243 = vmatprep.subr.bf16.mxu1 %v9781_v10  ;;  %v9656_v10 = vcombine.low %v6507_v42, %v6515_v1  ;;  %v9673_v11 = vcombine.high %v6523_v7, %v6531_v8 }
 0x68c   :  { %8244 = vmatpush1.bf16.msra.mxu1 %v9780_v33  ;;  %v6547_v33 = vld [vmem:[#allocation13 + $0x4f8] sm:$0xff] }
 0x68d   :  { %8295 = vmatprep.subr.bf16.mxu1 %v9545_v15  ;;  %v9672_v15 = vcombine.low %v6523_v7, %v6531_v8  ;;  %v9689_v17 = vcombine.high %v6539_v13, %v6547_v33 }
 0x68f   :  { %8246 = vmatmul.mubr.bf16.vlgmr.msra.gmra.mrb[24].mxu1 %v11096_v9 }
 0x690   :  { %8296 = vmatpush1.bf16.msra.mxu1 %v9544_v43  ;;  %8327 = vmatprep.mubr.bf16.mxu1 %v11094_v23  ;;  %v11163_v23 = vld [vmem:[#allocation14] sm:$0xff]  ;;  %v6563_v43 = vld [vmem:[#allocation13 + $0x578] sm:$0xff] }
 0x691   :  { %8297 = vmatprep.subr.bf16.mxu1 %v9561_v59  ;;  %v6651_v26 = vrot.slane %v11163_v23, %v11040_v19  ;;  %v6667_v14 = vrot.slane %v11163_v23, %v11058_v0  ;;  %v6655_v56 = vrot.slane %v11163_v23, %v11030_v3  ;;  %v6671_v39 = vrot.slane %v11163_v23, %v11061_v2 }
 0x692   :  { %v9688_v59 = vcombine.low %v6539_v13, %v6547_v33  ;;  %v9705_v20 = vcombine.high %v6555_v18, %v6563_v43  ;;  %v6659_v42 = vrot.slane %v11163_v23, %v11052_v63 }
 0x694   :  { %8298 = vmatpush1.bf16.msra.mxu1 %v9560_v27  ;;  %v6579_v27 = vld [vmem:[#allocation13 + $0x5f8] sm:$0xff] }
 0x695   :  { %8299 = vmatprep.subr.bf16.mxu1 %v9577_v29  ;;  %v9704_v29 = vcombine.low %v6555_v18, %v6563_v43  ;;  %v9721_v4 = vcombine.high %v6571_v21, %v6579_v27  ;;  %v6675_v18 = vrot.slane %v11163_v23, %v11075_v24 }
 0x698   :  { %8300 = vmatpush1.bf16.msra.mxu1 %v9576_v6  ;;  %v6595_v6 = vld [vmem:[#allocation13 + $0x678] sm:$0xff] }
 0x699   :  { %8301 = vmatprep.subr.bf16.mxu1 %v9593_v54  ;;  %v9720_v54 = vcombine.low %v6571_v21, %v6579_v27  ;;  %v9737_v61 = vcombine.high %v6587_v36, %v6595_v6 }
 0x69c   :  { %8302 = vmatpush1.bf16.msra.mxu1 %v9592_v30  ;;  %v6611_v30 = vld [vmem:[#allocation13 + $0x6f8] sm:$0xff] }
 0x69d   :  { %8303 = vmatprep.subr.bf16.mxu1 %v9609_v31  ;;  %v9736_v31 = vcombine.low %v6587_v36, %v6595_v6  ;;  %v9753_v44 = vcombine.high %v6603_v28, %v6611_v30 }
 0x6a0   :  { %8304 = vmatpush1.bf16.msra.mxu1 %v9608_v34  ;;  %v6627_v34 = vld [vmem:[#allocation13 + $0x778] sm:$0xff] }
 0x6a1   :  { %8305 = vmatprep.subr.bf16.mxu1 %v9625_v35  ;;  %v9752_v35 = vcombine.low %v6603_v28, %v6611_v30  ;;  %v9769_v37 = vcombine.high %v6619_v32, %v6627_v34 }
 0x6a2   :  { %v8042_v40 = vpop.f32.mrb[12].mxu1  ;;  %v8124_v41 = vpop.f32.mrb[16].mxu0 }
 0x6a3   :  { %v11173_v45 = vadd.f32 %v8042_v40, %v6651_v26  ;;  %v11175_v46 = vadd.f32 %v8124_v41, %v6667_v14  ;;  %v8044_v47 = vpop.f32.mrb[13].mxu1  ;;  %v8126_v48 = vpop.f32.mrb[17].mxu0  ;;  %v6643_v26 = vld [vmem:[#allocation13 + $0x7f8] sm:$0xff]  ;;  %v9768_v14 = vcombine.low %v6619_v32, %v6627_v34  ;;  %v11192_v41 = vld [vmem:[#allocation14 + $0x8] sm:$0xff]  ;;  %v9786_v32 = vld [vmem:[#allocation16] ss:$0 sm:$0xff] }
 0x6a4   :  { %v11177_v49 = vadd.f32 %v8044_v47, %v6655_v56  ;;  %v11179_v50 = vadd.f32 %v8126_v48, %v6671_v39  ;;  %8306 = vmatpush1.bf16.msra.mxu1 %v9624_v38  ;;  %v8046_v51 = vpop.f32.mrb[14].mxu1  ;;  %v8128_v52 = vpop.f32.mrb[18].mxu0  ;;  %v9785_v38 = vcombine.high %v6635_v57, %v6643_v26  ;;  %v9784_v56 = vcombine.low %v6635_v57, %v6643_v26  ;;  %v10450_v39 = vld [vmem:[%s11267_s11] sm:$0xff]   ;;  %v10451_v40 = vld [vmem:[%s11267_s11 + $0x8] sm:$0xff]  }
 0x6a5   :  { %v8047_v60 = vpop.f32.mrb[15].mxu1  ;;  %v8129_v55 = vpop.f32.mrb[19].mxu0  ;;  %8307 = vmatprep.subr.bf16.mxu1 %v9641_v12  ;;  %v10728_v12 = vmov 0.0   ;;  %v6683_v1 = vrot.slane %v11192_v41, %v11040_v19  ;;  %v6687_v47 = vrot.slane %v11192_v41, %v11030_v3  ;;  %v6699_v43 = vrot.slane %v11192_v41, %v11058_v0 }
 0x6a6   :  { %v8352_v62 = vcombine.low %v11173_v45, %v11177_v49  ;;  %v8369_v5 = vcombine.low %v11175_v46, %v11179_v50  ;;  %v6703_v45 = vrot.slane %v11192_v41, %v11061_v2  ;;  %v6691_v46 = vrot.slane %v11192_v41, %v11052_v63 }
 0x6a7   :  { %v6695_v50 = vrot.slane %v11192_v41, %v11043_v22  ;;  %v6707_v63 = vrot.slane %v11192_v41, %v11075_v24  ;;  %v9803_v24 = vld [vmem:[#allocation17] ss:$0 sm:$0xff] }
 0x6a8   :  { %8308 = vmatpush1.bf16.msra.mxu1 %v9640_v16 }
 0x6a9   :  { %8309 = vmatprep.subr.bf16.mxu1 %v9657_v58 }
 0x6ac   :  { %8310 = vmatpush1.bf16.msra.mxu1 %v9656_v10 }
 0x6ad   :  { %8311 = vmatprep.subr.bf16.mxu1 %v9673_v11 }
 0x6b0   :  { %8312 = vmatpush1.bf16.msra.mxu1 %v9672_v15  ;;  %v8360_v15 = vrot.slane %v8352_v62, %v10929_v53 }
 0x6b1   :  { %8313 = vmatprep.subr.bf16.mxu1 %v9689_v17 }
 0x6b4   :  { %8314 = vmatpush1.bf16.msra.mxu1 %v9688_v59  ;;  %v6679_v59 = vrot.slane %v11163_v23, %v11064_v25 }
 0x6b5   :  { %8315 = vmatprep.subr.bf16.mxu1 %v9705_v20 }
 0x6b8   :  { %8316 = vmatpush1.bf16.msra.mxu1 %v9704_v29 }
 0x6b9   :  { %8317 = vmatprep.subr.bf16.mxu1 %v9721_v4 }
 0x6bc   :  { %8318 = vmatpush1.bf16.msra.mxu1 %v9720_v54 }
 0x6bd   :  { %8319 = vmatprep.subr.bf16.mxu1 %v9737_v61 }
 0x6c0   :  { %8320 = vmatpush1.bf16.msra.mxu1 %v9736_v31 }
 0x6c1   :  { %8321 = vmatprep.subr.bf16.mxu1 %v9753_v44 }
 0x6c4   :  { %8322 = vmatpush1.bf16.msra.mxu1 %v9752_v35 }
 0x6c5   :  { %8323 = vmatprep.subr.bf16.mxu1 %v9769_v37 }
 0x6c8   :  { %8324 = vmatpush1.bf16.msra.mxu1 %v9768_v14 }
 0x6c9   :  { %8325 = vmatprep.subr.bf16.mxu1 %v9785_v38 }
 0x6cc   :  { %8326 = vmatpush1.bf16.msra.mxu1 %v9784_v56 }
 0x6cd   :  { %9832 = vmatprep.subr.bf16.mxu1 %v10728_v12 }
 0x6cf   :  { %8328 = vmatmul.mubr.bf16.vlgmr.msra.gmra.mrb[28].mxu1 %v11096_v9  ;;  %v6663_v9 = vrot.slane %v11163_v23, %v11043_v22  ;;  %v8377_v23 = vrot.slane %v8369_v5, %v10929_v53  ;;  %v6711_v22 = vrot.slane %v11192_v41, %v11064_v25 }
 0x6d0   :  { %9833 = vmatpush3.bf16.msra.mxu1 %v10450_v39  ;;  %9836 = vmatprep.mubr.msk.bf16.mxu1 %vm10729_vm0, %v10728_v12 }
 0x6d1   :  { %9834 = vmatprep.subr.bf16.mxu1 %v10728_v12 }
 0x6d4   :  { %9835 = vmatpush3.bf16.msra.mxu1 %v10451_v40 }
 0x6e2   :  { %v8083_v48 = vpop.f32.mrb[16].mxu1  ;;  %v8206_v51 = vpop.f32.mrb[20].mxu0 }
 0x6e3   :  { %v8084_v52 = vadd.f32 %v8083_v48, %v6659_v42  ;;  %v8207_v16 = vadd.f32 %v8206_v51, %v6683_v1  ;;  %v8085_v60 = vpop.f32.mrb[17].mxu1  ;;  %v8208_v55 = vpop.f32.mrb[21].mxu0 }
 0x6e4   :  { %v8086_v58 = vadd.f32 %v8085_v60, %v6663_v9  ;;  %v8209_v7 = vadd.f32 %v8208_v55, %v6687_v47  ;;  %v8087_v8 = vpop.f32.mrb[18].mxu1  ;;  %v8210_v10 = vpop.f32.mrb[22].mxu0 }
 0x6e5   :  { %v8088_v11 = vpop.f32.mrb[19].mxu1  ;;  %v8211_v13 = vpop.f32.mrb[23].mxu0 }
 0x6e6   :  { %v8353_v33 = vcombine.low %v8084_v52, %v8086_v58  ;;  %v8386_v19 = vcombine.low %v8207_v16, %v8209_v7 }
 0x6e8   :  { %v8367_v3 = vrot.slane %v8353_v33, %v10929_v53  ;;  %v8394_v9 = vrot.slane %v8386_v19, %v10929_v53 }
 0x6ea   :  { %v8368_v17 = vcombine.low %v8360_v15, %v8367_v3 }
 0x6ec   :  { %8424 = vst [vmem:[%s11270_s14] sm:$0xff] %v8368_v17 }
 0x722   :  { %v8165_v49 = vpop.f32.mrb[20].mxu1 }
 0x723   :  { %v8166_v62 = vadd.f32 %v8165_v49, %v6675_v18  ;;  %v8288_v20 = vpop.f32.mrb[24].mxu0  ;;  %v8167_v21 = vpop.f32.mrb[21].mxu1 }
 0x724   :  { %v8289_v27 = vadd.f32 %v8288_v20, %v6699_v43  ;;  %v8168_v29 = vadd.f32 %v8167_v21, %v6679_v59  ;;  %v8290_v4 = vpop.f32.mrb[25].mxu0  ;;  %v8169_v36 = vpop.f32.mrb[22].mxu1 }
 0x725   :  { %v8291_v6 = vadd.f32 %v8290_v4, %v6703_v45  ;;  %v8292_v54 = vpop.f32.mrb[26].mxu0  ;;  %v8170_v61 = vpop.f32.mrb[23].mxu1 }
 0x726   :  { %v8370_v28 = vcombine.low %v8166_v62, %v8168_v29  ;;  %v8293_v30 = vpop.f32.mrb[27].mxu0 }
 0x727   :  { %v8403_v0 = vcombine.low %v8289_v27, %v8291_v6 }
 0x728   :  { %v8384_v2 = vrot.slane %v8370_v28, %v10929_v53 }
 0x729   :  { %v8411_v8 = vrot.slane %v8403_v0, %v10929_v53 }
 0x72a   :  { %v8385_v31 = vcombine.low %v8377_v23, %v8384_v2 }
 0x72c   :  { %8425 = vst [vmem:[%s11270_s14 + $0x8] sm:$0xff] %v8385_v31 }
 0x743   :  { %v9823_v44 = vpop.f32.mrb[28].mxu0 }
 0x744   :  { %v9824_v34 = vpop.f32.mrb[29].mxu0 }
 0x745   :  { %v9825_v35 = vadd.f32 %v9824_v34, %v9823_v44  ;;  %v9826_v37 = vpop.f32.mrb[30].mxu0 }
 0x746   :  { %v9827_v57 = vpop.f32.mrb[31].mxu0 }
 0x747   :  { %v8598_v26 = vadd.f32 %v9825_v35, %v9786_v32 }
 0x749   :  { %v8603_v14 = vmax.f32 %v8598_v26, 0.0 }
 0x74b   :  { %v8604_v38 = vpack.c.bf16 %v8603_v14, %v8603_v14 }
 0x74d   :  { %9837 = vmatmul.mubr.msk.bf16.vlgmr.msra.gmra.mrb[32].mxu1 %vm8628_vm1, %v8604_v38 }
 0x762   :  { %v8247_v5 = vpop.f32.mrb[24].mxu1 }
 0x763   :  { %v8248_v56 = vadd.f32 %v8247_v5, %v6691_v46  ;;  %v8249_v39 = vpop.f32.mrb[25].mxu1 }
 0x764   :  { %v8250_v12 = vadd.f32 %v8249_v39, %v6695_v50  ;;  %v8251_v40 = vpop.f32.mrb[26].mxu1 }
 0x765   :  { %v8252_v42 = vpop.f32.mrb[27].mxu1 }
 0x766   :  { %v8387_v1 = vcombine.low %v8248_v56, %v8250_v12 }
 0x768   :  { %v8401_v47 = vrot.slane %v8387_v1, %v10929_v53 }
 0x76a   :  { %v8402_v48 = vcombine.low %v8394_v9, %v8401_v47 }
 0x76c   :  { %8426 = vst [vmem:[%s11270_s14 + $0x10] sm:$0xff] %v8402_v48 }
 0x7a2   :  { %v8329_v51 = vpop.f32.mrb[28].mxu1 }
 0x7a3   :  { %v8330_v52 = vadd.f32 %v8329_v51, %v6707_v63  ;;  %v8331_v16 = vpop.f32.mrb[29].mxu1 }
 0x7a4   :  { %v8332_v60 = vadd.f32 %v8331_v16, %v6711_v22  ;;  %v8333_v55 = vpop.f32.mrb[30].mxu1 }
 0x7a5   :  { %v8334_v58 = vpop.f32.mrb[31].mxu1 }
 0x7a6   :  { %v8404_v7 = vcombine.low %v8330_v52, %v8332_v60 }
 0x7a8   :  { %v8418_v10 = vrot.slane %v8404_v7, %v10929_v53 }
 0x7aa   :  { %v8419_v11 = vcombine.low %v8411_v8, %v8418_v10 }
 0x7ac   :  { %8427 = vst [vmem:[%s11270_s14 + $0x18] sm:$0xff] %v8419_v11 }
 0x820   :  { %v8666_v25 = vpop.f32.mrb[32].mxu1 }
 0x821   :  { %v8667_v41 = vadd.f32 %v9803_v24, %v8666_v25  ;;  %v9838_v13 = vpop.f32.mrb[33].mxu1 }
 0x822   :  { %v8669_v33 = vpop.f32.mrb[34].mxu1 }
 0x823   :  { %v9839_v19 = vpop.f32.mrb[35].mxu1  ;;  %8673 = vst.msk [vmem:[#allocation19] sm:$0x3] %vm8672_vm2, %v8667_v41 }
 0x824   :  { %10684 = shalt.err (!%p10681_p0)
}
 0x825   :  { %s10685_s8 = scalar_lea.hbm %s11269_s13, 32 }
 0x826   :  { %p10686_p1 = scmp.ne.s32.totalorder %s11269_s13, %s10685_s8  ;;  %p10689_p2 = scmp.lt.u32.totalorder %s10685_s8, %s11269_s13 }
 0x828   :  { %p10691_p3 = pnand %p10689_p2, %p10686_p1 }
 0x82a   :  { %10694 = shalt.err (!%p10691_p3)
}
 0x82b   :  { %8683 = dma.vmem_to_hbm [thread:$0]  %s8681_s20, 32, %s11269_s13, [#allocation4]  }
 0x82c   :  { %10707 = dma.done.wait [#allocation4], 32  }
 0x82d   :  { %10708 = vsyncadd [#allocation4], 4294967264 }
 0x82e   :  { %8691 = vsyncpa [#allocation3], 1 }
 0x82f   :  { %8692 = vsyncpa [#allocation6], 1 }
 0x830   :  { %8693 = vsyncpa [#allocation9], 1 }
 0x831   :  { %8694 = vsyncpa [#allocation12], 1 }
 0x832   :  { %8695 = vsyncpa [#allocation15], 1 }
 0x833   :  { %8696 = vsyncpa [#allocation18], 1 }
 0x834   :  { %8697 = vsyncpa [#allocation4], 1 }

</bundles_post_ra>
